<compile_context>
chip_gen: v6e
topology: v6e:2x2x1
jax: 0.10.0
libtpu: 0.0.40
codegen_flags: <defaults>
</compile_context>

<pallas_src>
import jax
import jax.numpy as jnp
from jax.experimental import pallas as pl
from jax.experimental.pallas import tpu as pltpu

BN_EPS = 1e-5
CLAMP_HI = 20.0  # ReLU in the reference module is Hardtanh(0, 20)


def _make_basic_block_kernel(row_tile, mm_dtype):
    """Build the fused BasicBlock kernel for a given row tile / matmul dtype."""

    def kernel(x_ref, w1_ref, s1_ref, b1_ref, w2_ref, s2_ref, b2_ref,
               o_ref, xp_ref, y1p_ref):
        # x_ref:   (1, H, W, C)       one batch element, NHWC (channels on lanes)
        # w*_ref:  (9, C, C)          per-tap (kh*3+kw) conv weights, (Cin, Cout)
        # s*/b*:   (1, C)             folded BN scale / bias
        # o_ref:   (1, H, W, C)
        # xp_ref:  (H+2, W+2, C)      VMEM scratch: zero-padded x
        # y1p_ref: (H+2, W+2, C)      VMEM scratch: zero-padded stage-1 output
        _, H, W, C = x_ref.shape
        n_tiles = H // row_tile
        M = row_tile * W

        # ---- in-kernel padding: interior copy + halo-only zero fill ----
        xp_ref[1:H + 1, 1:W + 1, :] = x_ref[0]
        zrow = jnp.zeros((1, W + 2, C), xp_ref.dtype)
        zcol = jnp.zeros((H + 2, 1, C), xp_ref.dtype)
        for pad_ref in (xp_ref, y1p_ref):            # y1p interior is written by stage 1
            pad_ref[0:1, :, :] = zrow
            pad_ref[H + 1:H + 2, :, :] = zrow
            pad_ref[:, 0:1, :] = zcol
            pad_ref[:, W + 1:W + 2, :] = zcol

        # ---- hoisted BN scale/bias broadcasts (JAX does not CSE these) ----
        s1b = jnp.broadcast_to(s1_ref[0], (M, C))
        b1b = jnp.broadcast_to(b1_ref[0], (M, C))
        s2b = jnp.broadcast_to(s2_ref[0], (M, C))
        b2b = jnp.broadcast_to(b2_ref[0], (M, C))

        def conv_tile(src_ref, w_ref, r):
            # 3x3 conv for output rows [r*row_tile, (r+1)*row_tile): nine
            # accumulating (M, C) x (C, C) dots reading shifted slices of the
            # padded image directly (no im2col staging buffer).
            # TODO(synk): kw=1,2 slices are sublane-unaligned; if the XLU read
            # path ever dominates, pre-shift with pltpu.roll once per image.
            h0 = r * row_tile
            acc = jnp.zeros((M, C), jnp.float32)
            for kh in range(3):
                for kw in range(3):
                    patch = src_ref[h0 + kh:h0 + kh + row_tile,
                                    kw:kw + W, :].reshape(M, C)
                    acc = acc + jnp.dot(patch.astype(mm_dtype),
                                        w_ref[kh * 3 + kw],
                                        preferred_element_type=jnp.float32)
            return acc

        # ---- stage 1: conv1 -> bn1 -> clamp(0, 20), result stays in VMEM ----
        for r in range(n_tiles):
            y = jnp.clip(conv_tile(xp_ref, w1_ref, r) * s1b + b1b, 0.0, CLAMP_HI)
            y1p_ref[1 + r * row_tile:1 + (r + 1) * row_tile, 1:W + 1, :] = (
                y.reshape(row_tile, W, C).astype(y1p_ref.dtype))

        # ---- stage 2: conv2 -> bn2 -> + residual -> clamp(0, 20) ----
        for r in range(n_tiles):
            acc = conv_tile(y1p_ref, w2_ref, r)
            res = x_ref[0, r * row_tile:(r + 1) * row_tile, :, :].reshape(M, C)
            y = jnp.clip(acc * s2b + b2b + res.astype(jnp.float32), 0.0, CLAMP_HI)
            o_ref[0, r * row_tile:(r + 1) * row_tile, :, :] = (
                y.reshape(row_tile, W, C).astype(o_ref.dtype))

    return kernel


def _pick_row_tile(H, W):
    """Largest divisor t of H such that the matmul M = t*W stays <= 256.

    M <= 256 keeps the f32 dot result plus the scale/bias/clip/reshape
    epilogue within the 64-vreg file (no spills); larger M buys little MXU
    efficiency here.
    """
    best = 1
    for t in range(1, H + 1):
        if H % t == 0 and t * W <= 256:
            best = t
    return best


def _vmem_padded_bytes(shape, itemsize):
    """Bytes of a VMEM buffer after (8, 128) register-tiling padding."""
    s = list(shape)
    s[-1] = -(-s[-1] // 128) * 128
    if len(s) >= 2:
        s[-2] = -(-s[-2] // 8) * 8
    n = itemsize
    for d in s:
        n *= d
    return n


def _bn_fold(gamma, beta, mean, var):
    scale = gamma / jnp.sqrt(var + BN_EPS)
    bias = beta - mean * scale
    return scale.reshape(1, -1), bias.reshape(1, -1)


def basic_block_forward(x_nchw, params, use_bf16_matmul=True):
    """BasicBlock forward. x_nchw: (N, C, H, W) float32 -> (N, C, H, W)."""
    # TODO(synk): stride>1 / downsample path not implemented (module defaults).
    # TODO(synk): for C < 128 (like the C=4 test) a W-on-lanes or Cout-padded
    # layout would fill vregs/lanes better; NHWC kept since real BasicBlock
    # planes are 64-512.
    x = jnp.transpose(x_nchw, (0, 2, 3, 1)).astype(jnp.float32)
    N, H, W, C = x.shape

    mm_dtype = jnp.bfloat16 if use_bf16_matmul else jnp.float32

    # PyTorch conv weight (Cout, Cin, 3, 3) -> (3, 3, Cin, Cout) -> (9, Cin, Cout)
    # with tap order kh*3+kw matching the in-kernel loop.
    w1 = jnp.transpose(params["w1"], (2, 3, 1, 0)).reshape(9, C, C).astype(mm_dtype)
    w2 = jnp.transpose(params["w2"], (2, 3, 1, 0)).reshape(9, C, C).astype(mm_dtype)
    s1, b1 = _bn_fold(params["bn1_gamma"], params["bn1_beta"],
                      params["bn1_mean"], params["bn1_var"])
    s2, b2 = _bn_fold(params["bn2_gamma"], params["bn2_beta"],
                      params["bn2_mean"], params["bn2_var"])

    row_tile = _pick_row_tile(H, W)
    kernel = _make_basic_block_kernel(row_tile, mm_dtype)

    # Explicit VMEM budget from the actual (padded) block/scratch sizes;
    # no 2x hedge, cap at physical VMEM (exploits v6e's 128 MiB, safe on v7x).
    mm_bytes = jnp.dtype(mm_dtype).itemsize
    est = 0
    est += 2 * _vmem_padded_bytes((1, H, W, C), 4)            # x (double-buffered)
    est += 2 * _vmem_padded_bytes((1, H, W, C), 4)            # out (double-buffered)
    est += 2 * 2 * _vmem_padded_bytes((9, C, C), mm_bytes)    # w1, w2
    est += 4 * 2 * _vmem_padded_bytes((1, C), 4)              # scales / biases
    est += 2 * _vmem_padded_bytes((H + 2, W + 2, C), 4)       # xp, y1p scratch
    try:
        phys = int(pltpu.get_tpu_info().vmem_capacity_bytes)
    except Exception:
        phys = 64 << 20                                       # v7x per-TC VMEM
    vmem_limit = int(min(phys - (8 << 20), max(16 << 20, est + (4 << 20))))

    # TODO(synk): for very large feature maps / N==1 on v7x, add a halo-tiled
    # spatial "parallel" grid axis and DMA x straight into xp (memory_space=
    # pl.ANY) instead of one whole image per grid step.
    grid_spec = pltpu.PrefetchScalarGridSpec(
        num_scalar_prefetch=0,
        grid=(N,),
        in_specs=[
            pl.BlockSpec((1, H, W, C), lambda n: (n, 0, 0, 0)),   # x
            pl.BlockSpec((9, C, C), lambda n: (0, 0, 0)),         # w1
            pl.BlockSpec((1, C), lambda n: (0, 0)),               # s1
            pl.BlockSpec((1, C), lambda n: (0, 0)),               # b1
            pl.BlockSpec((9, C, C), lambda n: (0, 0, 0)),         # w2
            pl.BlockSpec((1, C), lambda n: (0, 0)),               # s2
            pl.BlockSpec((1, C), lambda n: (0, 0)),               # b2
        ],
        out_specs=pl.BlockSpec((1, H, W, C), lambda n: (n, 0, 0, 0)),
        scratch_shapes=[
            pltpu.VMEM((H + 2, W + 2, C), jnp.float32),   # padded x
            pltpu.VMEM((H + 2, W + 2, C), jnp.float32),   # padded y1
        ],
    )

    out = pl.pallas_call(
        kernel,
        out_shape=jax.ShapeDtypeStruct((N, H, W, C), jnp.float32),
        grid_spec=grid_spec,
        compiler_params=pltpu.CompilerParams(
            dimension_semantics=("parallel",),
            vmem_limit_bytes=vmem_limit),
    )(x, w1, s1, b1, w2, s2, b2)

    # NHWC -> NCHW
    return jnp.transpose(out, (0, 3, 1, 2))


def _reference_forward(x_nchw, params, mm_dtype=jnp.float32):
    """Pure-JAX reference (lax conv). With mm_dtype=bf16 it matches the
    kernel's bf16-operand / f32-accumulate matmul numerics."""
    dn = jax.lax.conv_dimension_numbers(x_nchw.shape, params["w1"].shape,
                                        ("NCHW", "OIHW", "NCHW"))

    def conv(x, w):
        return jax.lax.conv_general_dilated(
            x.astype(mm_dtype), w.astype(mm_dtype), (1, 1), ((1, 1), (1, 1)),
            dimension_numbers=dn, preferred_element_type=jnp.float32)

    def bn(x, g, b, m, v):
        g, b, m, v = (a.reshape(1, -1, 1, 1) for a in (g, b, m, v))
        return (x - m) / jnp.sqrt(v + BN_EPS) * g + b

    out = conv(x_nchw, params["w1"])
    out = bn(out, params["bn1_gamma"], params["bn1_beta"],
             params["bn1_mean"], params["bn1_var"])
    out = jnp.clip(out, 0.0, CLAMP_HI)
    out = conv(out, params["w2"])
    out = bn(out, params["bn2_gamma"], params["bn2_beta"],
             params["bn2_mean"], params["bn2_var"])
    out = out + x_nchw.astype(jnp.float32)
    return jnp.clip(out, 0.0, CLAMP_HI)


if __name__ == "__main__":
    key = jax.random.PRNGKey(0)
    N, C, H, W = 2, 4, 16, 16          # inplanes = planes = 4, stride = 1
    ks = jax.random.split(key, 8)

    x = jax.random.normal(ks[0], (N, C, H, W), jnp.float32)
    params = {
        "w1": jax.random.normal(ks[1], (C, C, 3, 3), jnp.float32) * 0.2,
        "w2": jax.random.normal(ks[2], (C, C, 3, 3), jnp.float32) * 0.2,
        "bn1_gamma": jax.random.uniform(ks[3], (C,), jnp.float32, 0.5, 1.5),
        "bn1_beta": jax.random.normal(ks[4], (C,), jnp.float32) * 0.1,
        "bn1_mean": jax.random.normal(ks[5], (C,), jnp.float32) * 0.1,
        "bn1_var": jax.random.uniform(ks[6], (C,), jnp.float32, 0.5, 1.5),
        "bn2_gamma": jax.random.uniform(ks[7], (C,), jnp.float32, 0.5, 1.5),
        "bn2_beta": jnp.zeros((C,), jnp.float32),
        "bn2_mean": jnp.zeros((C,), jnp.float32),
        "bn2_var": jnp.ones((C,), jnp.float32),
    }

    out = jax.block_until_ready(basic_block_forward(x, params))
    # Reference with matching bf16-operand / f32-accumulate conv numerics, so
    # the check isolates kernel correctness from bf16 quantization error.
    ref = jax.block_until_ready(
        _reference_forward(x, params, mm_dtype=jnp.bfloat16))
    assert out.shape == (N, C, H, W), out.shape
    assert jnp.max(jnp.abs(out - ref)) < 2e-3, "mismatch vs reference"
    print("KERNEL_OK")
</pallas_src>

<mosaic_0001>
module attributes {stable_mosaic.version = 11 : i64} {
  func.func @kernel(%arg0: i32, %arg1: memref<1x16x16x4xf32, #tpu.memory_space<vmem>>, %arg2: memref<9x4x4xbf16, #tpu.memory_space<vmem>>, %arg3: memref<1x4xf32, #tpu.memory_space<vmem>>, %arg4: memref<1x4xf32, #tpu.memory_space<vmem>>, %arg5: memref<9x4x4xbf16, #tpu.memory_space<vmem>>, %arg6: memref<1x4xf32, #tpu.memory_space<vmem>>, %arg7: memref<1x4xf32, #tpu.memory_space<vmem>>, %arg8: memref<1x16x16x4xf32, #tpu.memory_space<vmem>>, %arg9: memref<18x18x4xf32, #tpu.memory_space<vmem>>, %arg10: memref<18x18x4xf32, #tpu.memory_space<vmem>>) attributes {dimension_semantics = [#tpu.dimension_semantics<parallel>], iteration_bounds = array<i64: 2>, scalar_prefetch = 0 : i64, scratch_operands = 2 : i64, tpu.core_type = #tpu.core_type<tc>, window_params = [{transform_indices = @transform_0, window_bounds = array<i64: 1, 16, 16, 4>}, {pipeline_mode = #tpu.pipeline_mode<synchronous>, transform_indices = @transform_1, window_bounds = array<i64: 9, 4, 4>}, {pipeline_mode = #tpu.pipeline_mode<synchronous>, transform_indices = @transform_2, window_bounds = array<i64: 1, 4>}, {pipeline_mode = #tpu.pipeline_mode<synchronous>, transform_indices = @transform_3, window_bounds = array<i64: 1, 4>}, {pipeline_mode = #tpu.pipeline_mode<synchronous>, transform_indices = @transform_4, window_bounds = array<i64: 9, 4, 4>}, {pipeline_mode = #tpu.pipeline_mode<synchronous>, transform_indices = @transform_5, window_bounds = array<i64: 1, 4>}, {pipeline_mode = #tpu.pipeline_mode<synchronous>, transform_indices = @transform_6, window_bounds = array<i64: 1, 4>}, {transform_indices = @transform_7, window_bounds = array<i64: 1, 16, 16, 4>}]} {
    %c0 = arith.constant 0 : index
    %c0_0 = arith.constant 0 : index
    %c0_1 = arith.constant 0 : index
    %c0_2 = arith.constant 0 : index
    %0 = vector.load %arg1[%c0, %c0_0, %c0_1, %c0_2] : memref<1x16x16x4xf32, #tpu.memory_space<vmem>>, vector<1x16x16x4xf32>
    %1 = vector.shape_cast %0 : vector<1x16x16x4xf32> to vector<16x16x4xf32>
    %c1 = arith.constant 1 : index
    %c1_3 = arith.constant 1 : index
    %c0_4 = arith.constant 0 : index
    %2 = vector.load %arg9[%c1, %c1_3, %c0_4] : memref<18x18x4xf32, #tpu.memory_space<vmem>>, vector<16x16x4xf32>
    tpu.vector_store %arg9[%c1, %c1_3, %c0_4], %1 {strides = array<i32>} : memref<18x18x4xf32, #tpu.memory_space<vmem>>, vector<16x16x4xf32>,
    %cst = arith.constant 0.000000e+00 : f32
    %3 = vector.broadcast %cst : f32 to vector<1x18x4xf32>
    %cst_5 = arith.constant 0.000000e+00 : f32
    %4 = vector.broadcast %cst_5 : f32 to vector<18x1x4xf32>
    %c0_6 = arith.constant 0 : index
    %c0_7 = arith.constant 0 : index
    %c0_8 = arith.constant 0 : index
    %5 = vector.load %arg9[%c0_6, %c0_7, %c0_8] : memref<18x18x4xf32, #tpu.memory_space<vmem>>, vector<1x18x4xf32>
    tpu.vector_store %arg9[%c0_6, %c0_7, %c0_8], %3 {strides = array<i32>} : memref<18x18x4xf32, #tpu.memory_space<vmem>>, vector<1x18x4xf32>,
    %c17 = arith.constant 17 : index
    %c0_9 = arith.constant 0 : index
    %c0_10 = arith.constant 0 : index
    %6 = vector.load %arg9[%c17, %c0_9, %c0_10] : memref<18x18x4xf32, #tpu.memory_space<vmem>>, vector<1x18x4xf32>
    tpu.vector_store %arg9[%c17, %c0_9, %c0_10], %3 {strides = array<i32>} : memref<18x18x4xf32, #tpu.memory_space<vmem>>, vector<1x18x4xf32>,
    %c0_11 = arith.constant 0 : index
    %c0_12 = arith.constant 0 : index
    %c0_13 = arith.constant 0 : index
    %7 = vector.load %arg9[%c0_11, %c0_12, %c0_13] : memref<18x18x4xf32, #tpu.memory_space<vmem>>, vector<18x1x4xf32>
    tpu.vector_store %arg9[%c0_11, %c0_12, %c0_13], %4 {strides = array<i32>} : memref<18x18x4xf32, #tpu.memory_space<vmem>>, vector<18x1x4xf32>,
    %c0_14 = arith.constant 0 : index
    %c17_15 = arith.constant 17 : index
    %c0_16 = arith.constant 0 : index
    %8 = vector.load %arg9[%c0_14, %c17_15, %c0_16] : memref<18x18x4xf32, #tpu.memory_space<vmem>>, vector<18x1x4xf32>
    tpu.vector_store %arg9[%c0_14, %c17_15, %c0_16], %4 {strides = array<i32>} : memref<18x18x4xf32, #tpu.memory_space<vmem>>, vector<18x1x4xf32>,
    %c0_17 = arith.constant 0 : index
    %c0_18 = arith.constant 0 : index
    %c0_19 = arith.constant 0 : index
    %9 = vector.load %arg10[%c0_17, %c0_18, %c0_19] : memref<18x18x4xf32, #tpu.memory_space<vmem>>, vector<1x18x4xf32>
    tpu.vector_store %arg10[%c0_17, %c0_18, %c0_19], %3 {strides = array<i32>} : memref<18x18x4xf32, #tpu.memory_space<vmem>>, vector<1x18x4xf32>,
    %c17_20 = arith.constant 17 : index
    %c0_21 = arith.constant 0 : index
    %c0_22 = arith.constant 0 : index
    %10 = vector.load %arg10[%c17_20, %c0_21, %c0_22] : memref<18x18x4xf32, #tpu.memory_space<vmem>>, vector<1x18x4xf32>
    tpu.vector_store %arg10[%c17_20, %c0_21, %c0_22], %3 {strides = array<i32>} : memref<18x18x4xf32, #tpu.memory_space<vmem>>, vector<1x18x4xf32>,
    %c0_23 = arith.constant 0 : index
    %c0_24 = arith.constant 0 : index
    %c0_25 = arith.constant 0 : index
    %11 = vector.load %arg10[%c0_23, %c0_24, %c0_25] : memref<18x18x4xf32, #tpu.memory_space<vmem>>, vector<18x1x4xf32>
    tpu.vector_store %arg10[%c0_23, %c0_24, %c0_25], %4 {strides = array<i32>} : memref<18x18x4xf32, #tpu.memory_space<vmem>>, vector<18x1x4xf32>,
    %c0_26 = arith.constant 0 : index
    %c17_27 = arith.constant 17 : index
    %c0_28 = arith.constant 0 : index
    %12 = vector.load %arg10[%c0_26, %c17_27, %c0_28] : memref<18x18x4xf32, #tpu.memory_space<vmem>>, vector<18x1x4xf32>
    tpu.vector_store %arg10[%c0_26, %c17_27, %c0_28], %4 {strides = array<i32>} : memref<18x18x4xf32, #tpu.memory_space<vmem>>, vector<18x1x4xf32>,
    %c0_29 = arith.constant 0 : index
    %c0_30 = arith.constant 0 : index
    %13 = vector.load %arg3[%c0_29, %c0_30] : memref<1x4xf32, #tpu.memory_space<vmem>>, vector<1x4xf32>
    %14 = vector.shape_cast %13 : vector<1x4xf32> to vector<4xf32>
    %15 = vector.shape_cast %14 : vector<4xf32> to vector<1x4xf32>
    %16 = vector.broadcast %15 : vector<1x4xf32> to vector<256x4xf32>
    %c0_31 = arith.constant 0 : index
    %c0_32 = arith.constant 0 : index
    %17 = vector.load %arg4[%c0_31, %c0_32] : memref<1x4xf32, #tpu.memory_space<vmem>>, vector<1x4xf32>
    %18 = vector.shape_cast %17 : vector<1x4xf32> to vector<4xf32>
    %19 = vector.shape_cast %18 : vector<4xf32> to vector<1x4xf32>
    %20 = vector.broadcast %19 : vector<1x4xf32> to vector<256x4xf32>
    %c0_33 = arith.constant 0 : index
    %c0_34 = arith.constant 0 : index
    %21 = vector.load %arg6[%c0_33, %c0_34] : memref<1x4xf32, #tpu.memory_space<vmem>>, vector<1x4xf32>
    %22 = vector.shape_cast %21 : vector<1x4xf32> to vector<4xf32>
    %23 = vector.shape_cast %22 : vector<4xf32> to vector<1x4xf32>
    %24 = vector.broadcast %23 : vector<1x4xf32> to vector<256x4xf32>
    %c0_35 = arith.constant 0 : index
    %c0_36 = arith.constant 0 : index
    %25 = vector.load %arg7[%c0_35, %c0_36] : memref<1x4xf32, #tpu.memory_space<vmem>>, vector<1x4xf32>
    %26 = vector.shape_cast %25 : vector<1x4xf32> to vector<4xf32>
    %27 = vector.shape_cast %26 : vector<4xf32> to vector<1x4xf32>
    %28 = vector.broadcast %27 : vector<1x4xf32> to vector<256x4xf32>
    %cst_37 = arith.constant 0.000000e+00 : f32
    %29 = vector.broadcast %cst_37 : f32 to vector<256x4xf32>
    %c0_38 = arith.constant 0 : index
    %c0_39 = arith.constant 0 : index
    %c0_40 = arith.constant 0 : index
    %30 = vector.load %arg9[%c0_38, %c0_39, %c0_40] : memref<18x18x4xf32, #tpu.memory_space<vmem>>, vector<16x16x4xf32>
    %31 = vector.shape_cast %30 : vector<16x16x4xf32> to vector<256x4xf32>
    %32 = arith.truncf %31 : vector<256x4xf32> to vector<256x4xbf16>
    %c0_41 = arith.constant 0 : index
    %c0_42 = arith.constant 0 : index
    %c0_43 = arith.constant 0 : index
    %33 = vector.load %arg2[%c0_41, %c0_42, %c0_43] : memref<9x4x4xbf16, #tpu.memory_space<vmem>>, vector<1x4x4xbf16>
    %34 = vector.shape_cast %33 : vector<1x4x4xbf16> to vector<4x4xbf16>
    %cst_44 = arith.constant dense<0.000000e+00> : vector<256x4xf32>
    %35 = tpu.matmul %32, %34, %cst_44 {dimension_numbers = #tpu.dot_dimension_numbers<[1], [0], [0], [1], [0, 0, 1, 1], [], []>} : vector<256x4xbf16>, vector<4x4xbf16>, vector<256x4xf32> -> vector<256x4xf32>
    %36 = arith.addf %29, %35 : vector<256x4xf32>
    %c0_45 = arith.constant 0 : index
    %c1_46 = arith.constant 1 : index
    %c0_47 = arith.constant 0 : index
    %37 = vector.load %arg9[%c0_45, %c1_46, %c0_47] : memref<18x18x4xf32, #tpu.memory_space<vmem>>, vector<16x16x4xf32>
    %38 = vector.shape_cast %37 : vector<16x16x4xf32> to vector<256x4xf32>
    %39 = arith.truncf %38 : vector<256x4xf32> to vector<256x4xbf16>
    %c1_48 = arith.constant 1 : index
    %c0_49 = arith.constant 0 : index
    %c0_50 = arith.constant 0 : index
    %40 = vector.load %arg2[%c1_48, %c0_49, %c0_50] : memref<9x4x4xbf16, #tpu.memory_space<vmem>>, vector<1x4x4xbf16>
    %41 = vector.shape_cast %40 : vector<1x4x4xbf16> to vector<4x4xbf16>
    %cst_51 = arith.constant dense<0.000000e+00> : vector<256x4xf32>
    %42 = tpu.matmul %39, %41, %cst_51 {dimension_numbers = #tpu.dot_dimension_numbers<[1], [0], [0], [1], [0, 0, 1, 1], [], []>} : vector<256x4xbf16>, vector<4x4xbf16>, vector<256x4xf32> -> vector<256x4xf32>
    %43 = arith.addf %36, %42 : vector<256x4xf32>
    %c0_52 = arith.constant 0 : index
    %c2 = arith.constant 2 : index
    %c0_53 = arith.constant 0 : index
    %44 = vector.load %arg9[%c0_52, %c2, %c0_53] : memref<18x18x4xf32, #tpu.memory_space<vmem>>, vector<16x16x4xf32>
    %45 = vector.shape_cast %44 : vector<16x16x4xf32> to vector<256x4xf32>
    %46 = arith.truncf %45 : vector<256x4xf32> to vector<256x4xbf16>
    %c2_54 = arith.constant 2 : index
    %c0_55 = arith.constant 0 : index
    %c0_56 = arith.constant 0 : index
    %47 = vector.load %arg2[%c2_54, %c0_55, %c0_56] : memref<9x4x4xbf16, #tpu.memory_space<vmem>>, vector<1x4x4xbf16>
    %48 = vector.shape_cast %47 : vector<1x4x4xbf16> to vector<4x4xbf16>
    %cst_57 = arith.constant dense<0.000000e+00> : vector<256x4xf32>
    %49 = tpu.matmul %46, %48, %cst_57 {dimension_numbers = #tpu.dot_dimension_numbers<[1], [0], [0], [1], [0, 0, 1, 1], [], []>} : vector<256x4xbf16>, vector<4x4xbf16>, vector<256x4xf32> -> vector<256x4xf32>
    %50 = arith.addf %43, %49 : vector<256x4xf32>
    %c1_58 = arith.constant 1 : index
    %c0_59 = arith.constant 0 : index
    %c0_60 = arith.constant 0 : index
    %51 = vector.load %arg9[%c1_58, %c0_59, %c0_60] : memref<18x18x4xf32, #tpu.memory_space<vmem>>, vector<16x16x4xf32>
    %52 = vector.shape_cast %51 : vector<16x16x4xf32> to vector<256x4xf32>
    %53 = arith.truncf %52 : vector<256x4xf32> to vector<256x4xbf16>
    %c3 = arith.constant 3 : index
    %c0_61 = arith.constant 0 : index
    %c0_62 = arith.constant 0 : index
    %54 = vector.load %arg2[%c3, %c0_61, %c0_62] : memref<9x4x4xbf16, #tpu.memory_space<vmem>>, vector<1x4x4xbf16>
    %55 = vector.shape_cast %54 : vector<1x4x4xbf16> to vector<4x4xbf16>
    %cst_63 = arith.constant dense<0.000000e+00> : vector<256x4xf32>
    %56 = tpu.matmul %53, %55, %cst_63 {dimension_numbers = #tpu.dot_dimension_numbers<[1], [0], [0], [1], [0, 0, 1, 1], [], []>} : vector<256x4xbf16>, vector<4x4xbf16>, vector<256x4xf32> -> vector<256x4xf32>
    %57 = arith.addf %50, %56 : vector<256x4xf32>
    %c1_64 = arith.constant 1 : index
    %c1_65 = arith.constant 1 : index
    %c0_66 = arith.constant 0 : index
    %58 = vector.load %arg9[%c1_64, %c1_65, %c0_66] : memref<18x18x4xf32, #tpu.memory_space<vmem>>, vector<16x16x4xf32>
    %59 = vector.shape_cast %58 : vector<16x16x4xf32> to vector<256x4xf32>
    %60 = arith.truncf %59 : vector<256x4xf32> to vector<256x4xbf16>
    %c4 = arith.constant 4 : index
    %c0_67 = arith.constant 0 : index
    %c0_68 = arith.constant 0 : index
    %61 = vector.load %arg2[%c4, %c0_67, %c0_68] : memref<9x4x4xbf16, #tpu.memory_space<vmem>>, vector<1x4x4xbf16>
    %62 = vector.shape_cast %61 : vector<1x4x4xbf16> to vector<4x4xbf16>
    %cst_69 = arith.constant dense<0.000000e+00> : vector<256x4xf32>
    %63 = tpu.matmul %60, %62, %cst_69 {dimension_numbers = #tpu.dot_dimension_numbers<[1], [0], [0], [1], [0, 0, 1, 1], [], []>} : vector<256x4xbf16>, vector<4x4xbf16>, vector<256x4xf32> -> vector<256x4xf32>
    %64 = arith.addf %57, %63 : vector<256x4xf32>
    %c1_70 = arith.constant 1 : index
    %c2_71 = arith.constant 2 : index
    %c0_72 = arith.constant 0 : index
    %65 = vector.load %arg9[%c1_70, %c2_71, %c0_72] : memref<18x18x4xf32, #tpu.memory_space<vmem>>, vector<16x16x4xf32>
    %66 = vector.shape_cast %65 : vector<16x16x4xf32> to vector<256x4xf32>
    %67 = arith.truncf %66 : vector<256x4xf32> to vector<256x4xbf16>
    %c5 = arith.constant 5 : index
    %c0_73 = arith.constant 0 : index
    %c0_74 = arith.constant 0 : index
    %68 = vector.load %arg2[%c5, %c0_73, %c0_74] : memref<9x4x4xbf16, #tpu.memory_space<vmem>>, vector<1x4x4xbf16>
    %69 = vector.shape_cast %68 : vector<1x4x4xbf16> to vector<4x4xbf16>
    %cst_75 = arith.constant dense<0.000000e+00> : vector<256x4xf32>
    %70 = tpu.matmul %67, %69, %cst_75 {dimension_numbers = #tpu.dot_dimension_numbers<[1], [0], [0], [1], [0, 0, 1, 1], [], []>} : vector<256x4xbf16>, vector<4x4xbf16>, vector<256x4xf32> -> vector<256x4xf32>
    %71 = arith.addf %64, %70 : vector<256x4xf32>
    %c2_76 = arith.constant 2 : index
    %c0_77 = arith.constant 0 : index
    %c0_78 = arith.constant 0 : index
    %72 = vector.load %arg9[%c2_76, %c0_77, %c0_78] : memref<18x18x4xf32, #tpu.memory_space<vmem>>, vector<16x16x4xf32>
    %73 = vector.shape_cast %72 : vector<16x16x4xf32> to vector<256x4xf32>
    %74 = arith.truncf %73 : vector<256x4xf32> to vector<256x4xbf16>
    %c6 = arith.constant 6 : index
    %c0_79 = arith.constant 0 : index
    %c0_80 = arith.constant 0 : index
    %75 = vector.load %arg2[%c6, %c0_79, %c0_80] : memref<9x4x4xbf16, #tpu.memory_space<vmem>>, vector<1x4x4xbf16>
    %76 = vector.shape_cast %75 : vector<1x4x4xbf16> to vector<4x4xbf16>
    %cst_81 = arith.constant dense<0.000000e+00> : vector<256x4xf32>
    %77 = tpu.matmul %74, %76, %cst_81 {dimension_numbers = #tpu.dot_dimension_numbers<[1], [0], [0], [1], [0, 0, 1, 1], [], []>} : vector<256x4xbf16>, vector<4x4xbf16>, vector<256x4xf32> -> vector<256x4xf32>
    %78 = arith.addf %71, %77 : vector<256x4xf32>
    %c2_82 = arith.constant 2 : index
    %c1_83 = arith.constant 1 : index
    %c0_84 = arith.constant 0 : index
    %79 = vector.load %arg9[%c2_82, %c1_83, %c0_84] : memref<18x18x4xf32, #tpu.memory_space<vmem>>, vector<16x16x4xf32>
    %80 = vector.shape_cast %79 : vector<16x16x4xf32> to vector<256x4xf32>
    %81 = arith.truncf %80 : vector<256x4xf32> to vector<256x4xbf16>
    %c7 = arith.constant 7 : index
    %c0_85 = arith.constant 0 : index
    %c0_86 = arith.constant 0 : index
    %82 = vector.load %arg2[%c7, %c0_85, %c0_86] : memref<9x4x4xbf16, #tpu.memory_space<vmem>>, vector<1x4x4xbf16>
    %83 = vector.shape_cast %82 : vector<1x4x4xbf16> to vector<4x4xbf16>
    %cst_87 = arith.constant dense<0.000000e+00> : vector<256x4xf32>
    %84 = tpu.matmul %81, %83, %cst_87 {dimension_numbers = #tpu.dot_dimension_numbers<[1], [0], [0], [1], [0, 0, 1, 1], [], []>} : vector<256x4xbf16>, vector<4x4xbf16>, vector<256x4xf32> -> vector<256x4xf32>
    %85 = arith.addf %78, %84 : vector<256x4xf32>
    %c2_88 = arith.constant 2 : index
    %c2_89 = arith.constant 2 : index
    %c0_90 = arith.constant 0 : index
    %86 = vector.load %arg9[%c2_88, %c2_89, %c0_90] : memref<18x18x4xf32, #tpu.memory_space<vmem>>, vector<16x16x4xf32>
    %87 = vector.shape_cast %86 : vector<16x16x4xf32> to vector<256x4xf32>
    %88 = arith.truncf %87 : vector<256x4xf32> to vector<256x4xbf16>
    %c8 = arith.constant 8 : index
    %c0_91 = arith.constant 0 : index
    %c0_92 = arith.constant 0 : index
    %89 = vector.load %arg2[%c8, %c0_91, %c0_92] : memref<9x4x4xbf16, #tpu.memory_space<vmem>>, vector<1x4x4xbf16>
    %90 = vector.shape_cast %89 : vector<1x4x4xbf16> to vector<4x4xbf16>
    %cst_93 = arith.constant dense<0.000000e+00> : vector<256x4xf32>
    %91 = tpu.matmul %88, %90, %cst_93 {dimension_numbers = #tpu.dot_dimension_numbers<[1], [0], [0], [1], [0, 0, 1, 1], [], []>} : vector<256x4xbf16>, vector<4x4xbf16>, vector<256x4xf32> -> vector<256x4xf32>
    %92 = arith.addf %85, %91 : vector<256x4xf32>
    %93 = arith.mulf %92, %16 : vector<256x4xf32>
    %94 = arith.addf %93, %20 : vector<256x4xf32>
    %cst_94 = arith.constant 0.000000e+00 : f32
    %cst_95 = arith.constant 2.000000e+01 : f32
    %95 = vector.broadcast %cst_94 : f32 to vector<256x4xf32>
    %96 = arith.maximumf %95, %94 : vector<256x4xf32>
    %97 = vector.broadcast %cst_95 : f32 to vector<256x4xf32>
    %98 = arith.minimumf %97, %96 : vector<256x4xf32>
    %99 = vector.shape_cast %98 : vector<256x4xf32> to vector<16x16x4xf32>
    %c1_96 = arith.constant 1 : index
    %c1_97 = arith.constant 1 : index
    %c0_98 = arith.constant 0 : index
    %100 = vector.load %arg10[%c1_96, %c1_97, %c0_98] : memref<18x18x4xf32, #tpu.memory_space<vmem>>, vector<16x16x4xf32>
    tpu.vector_store %arg10[%c1_96, %c1_97, %c0_98], %99 {strides = array<i32>} : memref<18x18x4xf32, #tpu.memory_space<vmem>>, vector<16x16x4xf32>,
    %cst_99 = arith.constant 0.000000e+00 : f32
    %101 = vector.broadcast %cst_99 : f32 to vector<256x4xf32>
    %c0_100 = arith.constant 0 : index
    %c0_101 = arith.constant 0 : index
    %c0_102 = arith.constant 0 : index
    %102 = vector.load %arg10[%c0_100, %c0_101, %c0_102] : memref<18x18x4xf32, #tpu.memory_space<vmem>>, vector<16x16x4xf32>
    %103 = vector.shape_cast %102 : vector<16x16x4xf32> to vector<256x4xf32>
    %104 = arith.truncf %103 : vector<256x4xf32> to vector<256x4xbf16>
    %c0_103 = arith.constant 0 : index
    %c0_104 = arith.constant 0 : index
    %c0_105 = arith.constant 0 : index
    %105 = vector.load %arg5[%c0_103, %c0_104, %c0_105] : memref<9x4x4xbf16, #tpu.memory_space<vmem>>, vector<1x4x4xbf16>
    %106 = vector.shape_cast %105 : vector<1x4x4xbf16> to vector<4x4xbf16>
    %cst_106 = arith.constant dense<0.000000e+00> : vector<256x4xf32>
    %107 = tpu.matmul %104, %106, %cst_106 {dimension_numbers = #tpu.dot_dimension_numbers<[1], [0], [0], [1], [0, 0, 1, 1], [], []>} : vector<256x4xbf16>, vector<4x4xbf16>, vector<256x4xf32> -> vector<256x4xf32>
    %108 = arith.addf %101, %107 : vector<256x4xf32>
    %c0_107 = arith.constant 0 : index
    %c1_108 = arith.constant 1 : index
    %c0_109 = arith.constant 0 : index
    %109 = vector.load %arg10[%c0_107, %c1_108, %c0_109] : memref<18x18x4xf32, #tpu.memory_space<vmem>>, vector<16x16x4xf32>
    %110 = vector.shape_cast %109 : vector<16x16x4xf32> to vector<256x4xf32>
    %111 = arith.truncf %110 : vector<256x4xf32> to vector<256x4xbf16>
    %c1_110 = arith.constant 1 : index
    %c0_111 = arith.constant 0 : index
    %c0_112 = arith.constant 0 : index
    %112 = vector.load %arg5[%c1_110, %c0_111, %c0_112] : memref<9x4x4xbf16, #tpu.memory_space<vmem>>, vector<1x4x4xbf16>
    %113 = vector.shape_cast %112 : vector<1x4x4xbf16> to vector<4x4xbf16>
    %cst_113 = arith.constant dense<0.000000e+00> : vector<256x4xf32>
    %114 = tpu.matmul %111, %113, %cst_113 {dimension_numbers = #tpu.dot_dimension_numbers<[1], [0], [0], [1], [0, 0, 1, 1], [], []>} : vector<256x4xbf16>, vector<4x4xbf16>, vector<256x4xf32> -> vector<256x4xf32>
    %115 = arith.addf %108, %114 : vector<256x4xf32>
    %c0_114 = arith.constant 0 : index
    %c2_115 = arith.constant 2 : index
    %c0_116 = arith.constant 0 : index
    %116 = vector.load %arg10[%c0_114, %c2_115, %c0_116] : memref<18x18x4xf32, #tpu.memory_space<vmem>>, vector<16x16x4xf32>
    %117 = vector.shape_cast %116 : vector<16x16x4xf32> to vector<256x4xf32>
    %118 = arith.truncf %117 : vector<256x4xf32> to vector<256x4xbf16>
    %c2_117 = arith.constant 2 : index
    %c0_118 = arith.constant 0 : index
    %c0_119 = arith.constant 0 : index
    %119 = vector.load %arg5[%c2_117, %c0_118, %c0_119] : memref<9x4x4xbf16, #tpu.memory_space<vmem>>, vector<1x4x4xbf16>
    %120 = vector.shape_cast %119 : vector<1x4x4xbf16> to vector<4x4xbf16>
    %cst_120 = arith.constant dense<0.000000e+00> : vector<256x4xf32>
    %121 = tpu.matmul %118, %120, %cst_120 {dimension_numbers = #tpu.dot_dimension_numbers<[1], [0], [0], [1], [0, 0, 1, 1], [], []>} : vector<256x4xbf16>, vector<4x4xbf16>, vector<256x4xf32> -> vector<256x4xf32>
    %122 = arith.addf %115, %121 : vector<256x4xf32>
    %c1_121 = arith.constant 1 : index
    %c0_122 = arith.constant 0 : index
    %c0_123 = arith.constant 0 : index
    %123 = vector.load %arg10[%c1_121, %c0_122, %c0_123] : memref<18x18x4xf32, #tpu.memory_space<vmem>>, vector<16x16x4xf32>
    %124 = vector.shape_cast %123 : vector<16x16x4xf32> to vector<256x4xf32>
    %125 = arith.truncf %124 : vector<256x4xf32> to vector<256x4xbf16>
    %c3_124 = arith.constant 3 : index
    %c0_125 = arith.constant 0 : index
    %c0_126 = arith.constant 0 : index
    %126 = vector.load %arg5[%c3_124, %c0_125, %c0_126] : memref<9x4x4xbf16, #tpu.memory_space<vmem>>, vector<1x4x4xbf16>
    %127 = vector.shape_cast %126 : vector<1x4x4xbf16> to vector<4x4xbf16>
    %cst_127 = arith.constant dense<0.000000e+00> : vector<256x4xf32>
    %128 = tpu.matmul %125, %127, %cst_127 {dimension_numbers = #tpu.dot_dimension_numbers<[1], [0], [0], [1], [0, 0, 1, 1], [], []>} : vector<256x4xbf16>, vector<4x4xbf16>, vector<256x4xf32> -> vector<256x4xf32>
    %129 = arith.addf %122, %128 : vector<256x4xf32>
    %c1_128 = arith.constant 1 : index
    %c1_129 = arith.constant 1 : index
    %c0_130 = arith.constant 0 : index
    %130 = vector.load %arg10[%c1_128, %c1_129, %c0_130] : memref<18x18x4xf32, #tpu.memory_space<vmem>>, vector<16x16x4xf32>
    %131 = vector.shape_cast %130 : vector<16x16x4xf32> to vector<256x4xf32>
    %132 = arith.truncf %131 : vector<256x4xf32> to vector<256x4xbf16>
    %c4_131 = arith.constant 4 : index
    %c0_132 = arith.constant 0 : index
    %c0_133 = arith.constant 0 : index
    %133 = vector.load %arg5[%c4_131, %c0_132, %c0_133] : memref<9x4x4xbf16, #tpu.memory_space<vmem>>, vector<1x4x4xbf16>
    %134 = vector.shape_cast %133 : vector<1x4x4xbf16> to vector<4x4xbf16>
    %cst_134 = arith.constant dense<0.000000e+00> : vector<256x4xf32>
    %135 = tpu.matmul %132, %134, %cst_134 {dimension_numbers = #tpu.dot_dimension_numbers<[1], [0], [0], [1], [0, 0, 1, 1], [], []>} : vector<256x4xbf16>, vector<4x4xbf16>, vector<256x4xf32> -> vector<256x4xf32>
    %136 = arith.addf %129, %135 : vector<256x4xf32>
    %c1_135 = arith.constant 1 : index
    %c2_136 = arith.constant 2 : index
    %c0_137 = arith.constant 0 : index
    %137 = vector.load %arg10[%c1_135, %c2_136, %c0_137] : memref<18x18x4xf32, #tpu.memory_space<vmem>>, vector<16x16x4xf32>
    %138 = vector.shape_cast %137 : vector<16x16x4xf32> to vector<256x4xf32>
    %139 = arith.truncf %138 : vector<256x4xf32> to vector<256x4xbf16>
    %c5_138 = arith.constant 5 : index
    %c0_139 = arith.constant 0 : index
    %c0_140 = arith.constant 0 : index
    %140 = vector.load %arg5[%c5_138, %c0_139, %c0_140] : memref<9x4x4xbf16, #tpu.memory_space<vmem>>, vector<1x4x4xbf16>
    %141 = vector.shape_cast %140 : vector<1x4x4xbf16> to vector<4x4xbf16>
    %cst_141 = arith.constant dense<0.000000e+00> : vector<256x4xf32>
    %142 = tpu.matmul %139, %141, %cst_141 {dimension_numbers = #tpu.dot_dimension_numbers<[1], [0], [0], [1], [0, 0, 1, 1], [], []>} : vector<256x4xbf16>, vector<4x4xbf16>, vector<256x4xf32> -> vector<256x4xf32>
    %143 = arith.addf %136, %142 : vector<256x4xf32>
    %c2_142 = arith.constant 2 : index
    %c0_143 = arith.constant 0 : index
    %c0_144 = arith.constant 0 : index
    %144 = vector.load %arg10[%c2_142, %c0_143, %c0_144] : memref<18x18x4xf32, #tpu.memory_space<vmem>>, vector<16x16x4xf32>
    %145 = vector.shape_cast %144 : vector<16x16x4xf32> to vector<256x4xf32>
    %146 = arith.truncf %145 : vector<256x4xf32> to vector<256x4xbf16>
    %c6_145 = arith.constant 6 : index
    %c0_146 = arith.constant 0 : index
    %c0_147 = arith.constant 0 : index
    %147 = vector.load %arg5[%c6_145, %c0_146, %c0_147] : memref<9x4x4xbf16, #tpu.memory_space<vmem>>, vector<1x4x4xbf16>
    %148 = vector.shape_cast %147 : vector<1x4x4xbf16> to vector<4x4xbf16>
    %cst_148 = arith.constant dense<0.000000e+00> : vector<256x4xf32>
    %149 = tpu.matmul %146, %148, %cst_148 {dimension_numbers = #tpu.dot_dimension_numbers<[1], [0], [0], [1], [0, 0, 1, 1], [], []>} : vector<256x4xbf16>, vector<4x4xbf16>, vector<256x4xf32> -> vector<256x4xf32>
    %150 = arith.addf %143, %149 : vector<256x4xf32>
    %c2_149 = arith.constant 2 : index
    %c1_150 = arith.constant 1 : index
    %c0_151 = arith.constant 0 : index
    %151 = vector.load %arg10[%c2_149, %c1_150, %c0_151] : memref<18x18x4xf32, #tpu.memory_space<vmem>>, vector<16x16x4xf32>
    %152 = vector.shape_cast %151 : vector<16x16x4xf32> to vector<256x4xf32>
    %153 = arith.truncf %152 : vector<256x4xf32> to vector<256x4xbf16>
    %c7_152 = arith.constant 7 : index
    %c0_153 = arith.constant 0 : index
    %c0_154 = arith.constant 0 : index
    %154 = vector.load %arg5[%c7_152, %c0_153, %c0_154] : memref<9x4x4xbf16, #tpu.memory_space<vmem>>, vector<1x4x4xbf16>
    %155 = vector.shape_cast %154 : vector<1x4x4xbf16> to vector<4x4xbf16>
    %cst_155 = arith.constant dense<0.000000e+00> : vector<256x4xf32>
    %156 = tpu.matmul %153, %155, %cst_155 {dimension_numbers = #tpu.dot_dimension_numbers<[1], [0], [0], [1], [0, 0, 1, 1], [], []>} : vector<256x4xbf16>, vector<4x4xbf16>, vector<256x4xf32> -> vector<256x4xf32>
    %157 = arith.addf %150, %156 : vector<256x4xf32>
    %c2_156 = arith.constant 2 : index
    %c2_157 = arith.constant 2 : index
    %c0_158 = arith.constant 0 : index
    %158 = vector.load %arg10[%c2_156, %c2_157, %c0_158] : memref<18x18x4xf32, #tpu.memory_space<vmem>>, vector<16x16x4xf32>
    %159 = vector.shape_cast %158 : vector<16x16x4xf32> to vector<256x4xf32>
    %160 = arith.truncf %159 : vector<256x4xf32> to vector<256x4xbf16>
    %c8_159 = arith.constant 8 : index
    %c0_160 = arith.constant 0 : index
    %c0_161 = arith.constant 0 : index
    %161 = vector.load %arg5[%c8_159, %c0_160, %c0_161] : memref<9x4x4xbf16, #tpu.memory_space<vmem>>, vector<1x4x4xbf16>
    %162 = vector.shape_cast %161 : vector<1x4x4xbf16> to vector<4x4xbf16>
    %cst_162 = arith.constant dense<0.000000e+00> : vector<256x4xf32>
    %163 = tpu.matmul %160, %162, %cst_162 {dimension_numbers = #tpu.dot_dimension_numbers<[1], [0], [0], [1], [0, 0, 1, 1], [], []>} : vector<256x4xbf16>, vector<4x4xbf16>, vector<256x4xf32> -> vector<256x4xf32>
    %164 = arith.addf %157, %163 : vector<256x4xf32>
    %c0_163 = arith.constant 0 : index
    %c0_164 = arith.constant 0 : index
    %c0_165 = arith.constant 0 : index
    %c0_166 = arith.constant 0 : index
    %165 = vector.load %arg1[%c0_163, %c0_164, %c0_165, %c0_166] : memref<1x16x16x4xf32, #tpu.memory_space<vmem>>, vector<1x16x16x4xf32>
    %166 = vector.shape_cast %165 : vector<1x16x16x4xf32> to vector<16x16x4xf32>
    %167 = vector.shape_cast %166 : vector<16x16x4xf32> to vector<256x4xf32>
    %168 = arith.mulf %164, %24 : vector<256x4xf32>
    %169 = arith.addf %168, %28 : vector<256x4xf32>
    %170 = arith.addf %169, %167 : vector<256x4xf32>
    %cst_167 = arith.constant 0.000000e+00 : f32
    %cst_168 = arith.constant 2.000000e+01 : f32
    %171 = vector.broadcast %cst_167 : f32 to vector<256x4xf32>
    %172 = arith.maximumf %171, %170 : vector<256x4xf32>
    %173 = vector.broadcast %cst_168 : f32 to vector<256x4xf32>
    %174 = arith.minimumf %173, %172 : vector<256x4xf32>
    %175 = vector.shape_cast %174 : vector<256x4xf32> to vector<16x16x4xf32>
    %c0_169 = arith.constant 0 : index
    %c0_170 = arith.constant 0 : index
    %c0_171 = arith.constant 0 : index
    %c0_172 = arith.constant 0 : index
    %176 = vector.load %arg8[%c0_169, %c0_170, %c0_171, %c0_172] : memref<1x16x16x4xf32, #tpu.memory_space<vmem>>, vector<1x16x16x4xf32>
    %177 = vector.shape_cast %176 : vector<1x16x16x4xf32> to vector<16x16x4xf32>
    %178 = vector.shape_cast %175 : vector<16x16x4xf32> to vector<1x16x16x4xf32>
    tpu.vector_store %arg8[%c0_169, %c0_170, %c0_171, %c0_172], %178 {strides = array<i32>} : memref<1x16x16x4xf32, #tpu.memory_space<vmem>>, vector<1x16x16x4xf32>,
    return
  }
  func.func @transform_0(%arg0: i32) -> (i32, i32, i32, i32) {
    %c0_i32 = arith.constant 0 : i32
    %c0_i32_0 = arith.constant 0 : i32
    %c0_i32_1 = arith.constant 0 : i32
    %c0_i32_2 = arith.constant 0 : i32
    return %arg0, %c0_i32, %c0_i32_0, %c0_i32_1 : i32, i32, i32, i32
  }
  func.func @transform_1(%arg0: i32) -> (i32, i32, i32) {
    %c0_i32 = arith.constant 0 : i32
    %c0_i32_0 = arith.constant 0 : i32
    %c0_i32_1 = arith.constant 0 : i32
    %c0_i32_2 = arith.constant 0 : i32
    return %c0_i32, %c0_i32_0, %c0_i32_1 : i32, i32, i32
  }
  func.func @transform_2(%arg0: i32) -> (i32, i32) {
    %c0_i32 = arith.constant 0 : i32
    %c0_i32_0 = arith.constant 0 : i32
    %c0_i32_1 = arith.constant 0 : i32
    return %c0_i32, %c0_i32_0 : i32, i32
  }
  func.func @transform_3(%arg0: i32) -> (i32, i32) {
    %c0_i32 = arith.constant 0 : i32
    %c0_i32_0 = arith.constant 0 : i32
    %c0_i32_1 = arith.constant 0 : i32
    return %c0_i32, %c0_i32_0 : i32, i32
  }
  func.func @transform_4(%arg0: i32) -> (i32, i32, i32) {
    %c0_i32 = arith.constant 0 : i32
    %c0_i32_0 = arith.constant 0 : i32
    %c0_i32_1 = arith.constant 0 : i32
    %c0_i32_2 = arith.constant 0 : i32
    return %c0_i32, %c0_i32_0, %c0_i32_1 : i32, i32, i32
  }
  func.func @transform_5(%arg0: i32) -> (i32, i32) {
    %c0_i32 = arith.constant 0 : i32
    %c0_i32_0 = arith.constant 0 : i32
    %c0_i32_1 = arith.constant 0 : i32
    return %c0_i32, %c0_i32_0 : i32, i32
  }
  func.func @transform_6(%arg0: i32) -> (i32, i32) {
    %c0_i32 = arith.constant 0 : i32
    %c0_i32_0 = arith.constant 0 : i32
    %c0_i32_1 = arith.constant 0 : i32
    return %c0_i32, %c0_i32_0 : i32, i32
  }
  func.func @transform_7(%arg0: i32) -> (i32, i32, i32, i32) {
    %c0_i32 = arith.constant 0 : i32
    %c0_i32_0 = arith.constant 0 : i32
    %c0_i32_1 = arith.constant 0 : i32
    %c0_i32_2 = arith.constant 0 : i32
    return %arg0, %c0_i32, %c0_i32_0, %c0_i32_1 : i32, i32, i32, i32
  }
}

</mosaic_0001>

<bundles_post_ra>
// kernel: tpu_custom_call.1
= control target key start
LH: loop header
LB: loop body
LE: loop exit
PB: predicated region body
PF: predicated region fallthrough
CT: control target
= control target key end

     0   :  { %s7382_s24 = smov 0   ;;  %s10080_s0 = inlined_call_operand.vmem [shape: f32[2,16,16,4], index: 0, kind: input, shape index: {}]   ;;  %s10081_s1 = inlined_call_operand.vmem [shape: bf16[9,4,4], index: 1, kind: input, shape index: {}]   ;;  %s10082_s2 = inlined_call_operand.vmem [shape: f32[1,4], index: 2, kind: input, shape index: {}]   ;;  %s10083_s3 = inlined_call_operand.vmem [shape: f32[1,4], index: 3, kind: input, shape index: {}]   ;;  %s10084_s4 = inlined_call_operand.vmem [shape: bf16[9,4,4], index: 4, kind: input, shape index: {}]   ;;  %s10085_s5 = inlined_call_operand.vmem [shape: f32[1,4], index: 5, kind: input, shape index: {}]   ;;  %s10086_s6 = inlined_call_operand.vmem [shape: f32[1,4], index: 6, kind: input, shape index: {}]   ;;  %s10087_s7 = inlined_call_operand.vmem [shape: f32[2,16,16,4], index: 7, kind: output, shape index: {}]  }
   0x1 LB: > { %s6067_s25 = sadd.s32 4294967295, %s7339_s24   ;;  %p6071_p0 = scmp.ge.s32.totalorder %s7339_s24, 1  ;;  %s7339_s24 = sphi %s7382_s24, %s17_s24  }
   0x2   : > { %p237_p1 = scmp.lt.s32.totalorder %s7339_s24, 3 }
   0x4   : > { %p238_p2 = pnand %p6071_p0, %p237_p1 }
   0x6   : > { %241 = sbr.rel (%p238_p2) target bundleno = 1065 (0x429), region = 48 }
   0xb   : > { %v6080_v0 = vld [vmem:[%s10081_s1 + $0x2] sm:$0x3]  ;;  %vm609_vm0 = vcmask 1041408   ;;  %v510_v1 = vld [vmem:[%s10081_s1] sm:$0x3]  ;;  %vm313_vm1 = vcmask 31744  }
   0xc   : > { %7306 = vmatprep.subr.msk.bf16.mxu0 %vm609_vm0, %v6080_v0  ;;  %v611_v2 = vsel %vm609_vm0, %v6080_v0, 0  ;;  %7307 = vmatprep.subr.msk.bf16.mxu1 %vm609_vm0, %v510_v1  ;;  %v823_v3 = vsel %vm609_vm0, %v510_v1, 0  ;;  %vm348_vm2 = vcmask 25600   ;;  %v7403_v4 = vld [vmem:[%s10081_s1 + $0x4] sm:$0x3]  ;;  %v7341_v5 = vmov 0.0  }
   0xd   : > { %6695 = vmatpush3.bf16.msra.mxu0 %v611_v2  ;;  %6729 = vmatpush3.bf16.msra.mxu1 %v823_v3  ;;  %346 = vst.msk [vmem:[#allocation2] sm:$0xff] %vm313_vm1, %v7341_v5  ;;  %347 = vst.msk [vmem:[#allocation2 + $0x8] sm:$0xff] %vm313_vm1, %v7341_v5  ;;  %vm354_vm3 = vcmask 24576   ;;  %p7427_p3 = scmp.lt.s32.totalorder %s6067_s25, 1  ;;  %v7434_v6 = vld [vmem:[%s10081_s1 + $0x6] sm:$0x3] }
   0xe   : > { %349 = vst.msk [vmem:[#allocation2 + $0x10] sm:$0x3] %vm348_vm2, %v7341_v5  ;;  %353 = vst.msk [vmem:[#allocation2 + $0x1a8] sm:$0x3] %vm348_vm2, %v7341_v5  ;;  %7308 = vmatprep.subr.msk.bf16.mxu0 %vm609_vm0, %v7403_v4  ;;  %7309 = vmatprep.subr.msk.bf16.mxu1 %vm609_vm0, %v7434_v6  ;;  %v1085_v38 = vsel %vm609_vm0, %v7403_v4, 0  ;;  %v1379_v46 = vsel %vm609_vm0, %v7434_v6, 0 }
   0xf   : > { %397 = vst.msk [vmem:[#allocation3 + $0x1a8] sm:$0x3] %vm348_vm2, %v7341_v5  ;;  %393 = vst.msk [vmem:[#allocation3 + $0x10] sm:$0x3] %vm348_vm2, %v7341_v5  ;;  %s10348_s25 = smov (!%p7427_p3, %s6067_s25), 1 }
  0x10   : > { %351 = vst.msk [vmem:[#allocation2 + $0x198] sm:$0xff] %vm313_vm1, %v7341_v5  ;;  %352 = vst.msk [vmem:[#allocation2 + $0x1a0] sm:$0xff] %vm313_vm1, %v7341_v5  ;;  %s6386_s12 = sshll.u32 %s10348_s25, 8  ;;  %v7657_v47 = vld [vmem:[%s10081_s1 + $0x8] sm:$0x3] }
  0x11   : > { %391 = vst.msk [vmem:[#allocation3] sm:$0xff] %vm313_vm1, %v7341_v5  ;;  %392 = vst.msk [vmem:[#allocation3 + $0x8] sm:$0xff] %vm313_vm1, %v7341_v5  ;;  %s7596_s15 = scalar_lea.vmem %s10080_s0, %s6386_s12  ;;  %s9839_s16 = scalar_lea.vmem %s10087_s7, %s6386_s12 }
  0x12   : > { %395 = vst.msk [vmem:[#allocation3 + $0x198] sm:$0xff] %vm313_vm1, %v7341_v5  ;;  %396 = vst.msk [vmem:[#allocation3 + $0x1a0] sm:$0xff] %vm313_vm1, %v7341_v5  ;;  %v280_v7 = vld [vmem:[%s7596_s15] sm:$0xff]  ;;  %v281_v8 = vld [vmem:[%s7596_s15 + $0x8] sm:$0xff] }
  0x13   : > { %373 = vst.msk [vmem:[#allocation2 + $0x11] sm:$0x1] %vm354_vm3, %v7341_v5  ;;  %390 = vst.msk [vmem:[#allocation2 + $0x1a9] sm:$0x1] %vm354_vm3, %v7341_v5  ;;  %v282_v9 = vld [vmem:[%s7596_s15 + $0x10] sm:$0xff]  ;;  %v283_v15 = vld [vmem:[%s7596_s15 + $0x18] sm:$0xff] }
  0x14   : > { %433 = vst.msk [vmem:[#allocation3 + $0x1a9] sm:$0x1] %vm354_vm3, %v7341_v5  ;;  %355 = vst.msk [vmem:[#allocation2] sm:$0x1] %vm354_vm3, %v7341_v5  ;;  %v511_v10 = vld [vmem:[#allocation2 + $0x1] sm:$0xff]  ;;  %v286_v19 = vld [vmem:[%s7596_s15 + $0x30] sm:$0xff] }
  0x15   : > { %356 = vst.msk [vmem:[#allocation2 + $0x18] sm:$0x1] %vm354_vm3, %v7341_v5  ;;  %357 = vst.msk [vmem:[#allocation2 + $0x30] sm:$0x1] %vm354_vm3, %v7341_v5  ;;  %v512_v11 = vld [vmem:[#allocation2 + $0x9] sm:$0xff]  ;;  %v284_v16 = vld [vmem:[%s7596_s15 + $0x20] sm:$0xff] }
  0x16   : > { %358 = vst.msk [vmem:[#allocation2 + $0x48] sm:$0x1] %vm354_vm3, %v7341_v5  ;;  %359 = vst.msk [vmem:[#allocation2 + $0x60] sm:$0x1] %vm354_vm3, %v7341_v5  ;;  %v463_v12 = vld [vmem:[#allocation2 + $0x8] sm:$0xff]  ;;  %v543_v13 = vpack.c.bf16 %v512_v11, %v511_v10  ;;  %v287_v20 = vld [vmem:[%s7596_s15 + $0x38] sm:$0xff] }
  0x17   : > { %360 = vst.msk [vmem:[#allocation2 + $0x78] sm:$0x1] %vm354_vm3, %v7341_v5  ;;  %361 = vst.msk [vmem:[#allocation2 + $0x90] sm:$0x1] %vm354_vm3, %v7341_v5  ;;  %v285_v18 = vld [vmem:[%s7596_s15 + $0x28] sm:$0xff]  ;;  %v288_v21 = vld [vmem:[%s7596_s15 + $0x40] sm:$0xff] }
  0x18   : > { %362 = vst.msk [vmem:[#allocation2 + $0xa8] sm:$0x1] %vm354_vm3, %v7341_v5  ;;  %363 = vst.msk [vmem:[#allocation2 + $0xc0] sm:$0x1] %vm354_vm3, %v7341_v5  ;;  %6696 = vmatprep.mubr.msk.bf16.mxu0 %vm313_vm1, %v543_v13  ;;  %v289_v22 = vld [vmem:[%s7596_s15 + $0x48] sm:$0xff]  ;;  %v290_v23 = vld [vmem:[%s7596_s15 + $0x50] sm:$0xff] }
  0x19   : > { %364 = vst.msk [vmem:[#allocation2 + $0xd8] sm:$0x1] %vm354_vm3, %v7341_v5  ;;  %365 = vst.msk [vmem:[#allocation2 + $0xf0] sm:$0x1] %vm354_vm3, %v7341_v5  ;;  %v291_v24 = vld [vmem:[%s7596_s15 + $0x58] sm:$0xff]  ;;  %v292_v25 = vld [vmem:[%s7596_s15 + $0x60] sm:$0xff] }
  0x1a   : > { %366 = vst.msk [vmem:[#allocation2 + $0x108] sm:$0x1] %vm354_vm3, %v7341_v5  ;;  %367 = vst.msk [vmem:[#allocation2 + $0x120] sm:$0x1] %vm354_vm3, %v7341_v5  ;;  %v293_v26 = vld [vmem:[%s7596_s15 + $0x68] sm:$0xff]  ;;  %v294_v27 = vld [vmem:[%s7596_s15 + $0x70] sm:$0xff] }
  0x1b   : > { %368 = vst.msk [vmem:[#allocation2 + $0x138] sm:$0x1] %vm354_vm3, %v7341_v5  ;;  %369 = vst.msk [vmem:[#allocation2 + $0x150] sm:$0x1] %vm354_vm3, %v7341_v5  ;;  %v462_v14 = vld [vmem:[#allocation2] sm:$0xff]  ;;  %v295_v28 = vld [vmem:[%s7596_s15 + $0x78] sm:$0xff] }
  0x1c   : > { %370 = vst.msk [vmem:[#allocation2 + $0x168] sm:$0x1] %vm354_vm3, %v7341_v5  ;;  %371 = vst.msk [vmem:[#allocation2 + $0x180] sm:$0x1] %vm354_vm3, %v7341_v5  ;;  %v494_v17 = vpack.c.bf16 %v463_v12, %v462_v14  ;;  %v296_v29 = vld [vmem:[%s7596_s15 + $0x80] sm:$0xff]  ;;  %v297_v30 = vld [vmem:[%s7596_s15 + $0x88] sm:$0xff] }
  0x1d   : > { %374 = vst.msk [vmem:[#allocation2 + $0x29] sm:$0x1] %vm354_vm3, %v7341_v5  ;;  %375 = vst.msk [vmem:[#allocation2 + $0x41] sm:$0x1] %vm354_vm3, %v7341_v5  ;;  %v298_v31 = vld [vmem:[%s7596_s15 + $0x90] sm:$0xff]  ;;  %v299_v32 = vld [vmem:[%s7596_s15 + $0x98] sm:$0xff] }
  0x1e   : > { %376 = vst.msk [vmem:[#allocation2 + $0x59] sm:$0x1] %vm354_vm3, %v7341_v5  ;;  %377 = vst.msk [vmem:[#allocation2 + $0x71] sm:$0x1] %vm354_vm3, %v7341_v5  ;;  %6730 = vmatprep.mubr.msk.bf16.mxu1 %vm313_vm1, %v494_v17  ;;  %v300_v4 = vld [vmem:[%s7596_s15 + $0xa0] sm:$0xff]  ;;  %v302_v6 = vld [vmem:[%s7596_s15 + $0xb0] sm:$0xff] }
  0x1f   : > { %378 = vst.msk [vmem:[#allocation2 + $0x89] sm:$0x1] %vm354_vm3, %v7341_v5  ;;  %379 = vst.msk [vmem:[#allocation2 + $0xa1] sm:$0x1] %vm354_vm3, %v7341_v5  ;;  %v305_v10 = vld [vmem:[%s7596_s15 + $0xc8] sm:$0xff]  ;;  %v306_v11 = vld [vmem:[%s7596_s15 + $0xd0] sm:$0xff] }
  0x20   : > { %380 = vst.msk [vmem:[#allocation2 + $0xb9] sm:$0x1] %vm354_vm3, %v7341_v5  ;;  %381 = vst.msk [vmem:[#allocation2 + $0xd1] sm:$0x1] %vm354_vm3, %v7341_v5  ;;  %v307_v12 = vld [vmem:[%s7596_s15 + $0xd8] sm:$0xff] }
  0x21   : > { %382 = vst.msk [vmem:[#allocation2 + $0xe9] sm:$0x1] %vm354_vm3, %v7341_v5  ;;  %383 = vst.msk [vmem:[#allocation2 + $0x101] sm:$0x1] %vm354_vm3, %v7341_v5 }
  0x22   : > { %384 = vst.msk [vmem:[#allocation2 + $0x119] sm:$0x1] %vm354_vm3, %v7341_v5  ;;  %385 = vst.msk [vmem:[#allocation2 + $0x131] sm:$0x1] %vm354_vm3, %v7341_v5 }
  0x23   : > { %386 = vst.msk [vmem:[#allocation2 + $0x149] sm:$0x1] %vm354_vm3, %v7341_v5  ;;  %387 = vst.msk [vmem:[#allocation2 + $0x161] sm:$0x1] %vm354_vm3, %v7341_v5 }
  0x24   : > { %388 = vst.msk [vmem:[#allocation2 + $0x179] sm:$0x1] %vm354_vm3, %v7341_v5  ;;  %389 = vst.msk [vmem:[#allocation2 + $0x191] sm:$0x1] %vm354_vm3, %v7341_v5 }
  0x25   : > { %399 = vst.msk [vmem:[#allocation3 + $0x18] sm:$0x1] %vm354_vm3, %v7341_v5  ;;  %400 = vst.msk [vmem:[#allocation3 + $0x30] sm:$0x1] %vm354_vm3, %v7341_v5 }
  0x26   : > { %401 = vst.msk [vmem:[#allocation3 + $0x48] sm:$0x1] %vm354_vm3, %v7341_v5  ;;  %402 = vst.msk [vmem:[#allocation3 + $0x60] sm:$0x1] %vm354_vm3, %v7341_v5 }
  0x27   : > { %403 = vst.msk [vmem:[#allocation3 + $0x78] sm:$0x1] %vm354_vm3, %v7341_v5  ;;  %404 = vst.msk [vmem:[#allocation3 + $0x90] sm:$0x1] %vm354_vm3, %v7341_v5 }
  0x28   : > { %405 = vst.msk [vmem:[#allocation3 + $0xa8] sm:$0x1] %vm354_vm3, %v7341_v5  ;;  %406 = vst.msk [vmem:[#allocation3 + $0xc0] sm:$0x1] %vm354_vm3, %v7341_v5 }
  0x29   : > { %407 = vst.msk [vmem:[#allocation3 + $0xd8] sm:$0x1] %vm354_vm3, %v7341_v5  ;;  %408 = vst.msk [vmem:[#allocation3 + $0xf0] sm:$0x1] %vm354_vm3, %v7341_v5 }
  0x2a   : > { %409 = vst.msk [vmem:[#allocation3 + $0x108] sm:$0x1] %vm354_vm3, %v7341_v5  ;;  %410 = vst.msk [vmem:[#allocation3 + $0x120] sm:$0x1] %vm354_vm3, %v7341_v5 }
  0x2b   : > { %411 = vst.msk [vmem:[#allocation3 + $0x138] sm:$0x1] %vm354_vm3, %v7341_v5  ;;  %412 = vst.msk [vmem:[#allocation3 + $0x150] sm:$0x1] %vm354_vm3, %v7341_v5 }
  0x2c   : > { %413 = vst.msk [vmem:[#allocation3 + $0x168] sm:$0x1] %vm354_vm3, %v7341_v5  ;;  %414 = vst.msk [vmem:[#allocation3 + $0x180] sm:$0x1] %vm354_vm3, %v7341_v5 }
  0x2d   : > { %417 = vst.msk [vmem:[#allocation3 + $0x29] sm:$0x1] %vm354_vm3, %v7341_v5  ;;  %418 = vst.msk [vmem:[#allocation3 + $0x41] sm:$0x1] %vm354_vm3, %v7341_v5 }
  0x2e   : > { %419 = vst.msk [vmem:[#allocation3 + $0x59] sm:$0x1] %vm354_vm3, %v7341_v5  ;;  %420 = vst.msk [vmem:[#allocation3 + $0x71] sm:$0x1] %vm354_vm3, %v7341_v5 }
  0x2f   : > { %421 = vst.msk [vmem:[#allocation3 + $0x89] sm:$0x1] %vm354_vm3, %v7341_v5  ;;  %422 = vst.msk [vmem:[#allocation3 + $0xa1] sm:$0x1] %vm354_vm3, %v7341_v5 }
  0x30   : > { %423 = vst.msk [vmem:[#allocation3 + $0xb9] sm:$0x1] %vm354_vm3, %v7341_v5  ;;  %424 = vst.msk [vmem:[#allocation3 + $0xd1] sm:$0x1] %vm354_vm3, %v7341_v5 }
  0x31   : > { %425 = vst.msk [vmem:[#allocation3 + $0xe9] sm:$0x1] %vm354_vm3, %v7341_v5  ;;  %426 = vst.msk [vmem:[#allocation3 + $0x101] sm:$0x1] %vm354_vm3, %v7341_v5 }
  0x32   : > { %427 = vst.msk [vmem:[#allocation3 + $0x119] sm:$0x1] %vm354_vm3, %v7341_v5  ;;  %428 = vst.msk [vmem:[#allocation3 + $0x131] sm:$0x1] %vm354_vm3, %v7341_v5 }
  0x33   : > { %429 = vst.msk [vmem:[#allocation3 + $0x149] sm:$0x1] %vm354_vm3, %v7341_v5  ;;  %430 = vst.msk [vmem:[#allocation3 + $0x161] sm:$0x1] %vm354_vm3, %v7341_v5 }
  0x34   : > { %431 = vst.msk [vmem:[#allocation3 + $0x179] sm:$0x1] %vm354_vm3, %v7341_v5  ;;  %432 = vst.msk [vmem:[#allocation3 + $0x191] sm:$0x1] %vm354_vm3, %v7341_v5 }
  0x35   : > { %372 = vst.msk [vmem:[#allocation2 + $0x198] sm:$0x1] %vm354_vm3, %v7341_v5  ;;  %398 = vst.msk [vmem:[#allocation3] sm:$0x1] %vm354_vm3, %v7341_v5 }
  0x36   : > { %415 = vst.msk [vmem:[#allocation3 + $0x198] sm:$0x1] %vm354_vm3, %v7341_v5  ;;  %416 = vst.msk [vmem:[#allocation3 + $0x11] sm:$0x1] %vm354_vm3, %v7341_v5  ;;  %v301_v5 = vld [vmem:[%s7596_s15 + $0xa8] sm:$0xff] }
  0x37   : > { %314 = vst.msk [vmem:[#allocation2 + $0x19] sm:$0xff] %vm313_vm1, %v280_v7  ;;  %315 = vst.msk [vmem:[#allocation2 + $0x21] sm:$0xff] %vm313_vm1, %v281_v8  ;;  %v303_v7 = vld [vmem:[%s7596_s15 + $0xb8] sm:$0xff]  ;;  %v304_v8 = vld [vmem:[%s7596_s15 + $0xc0] sm:$0xff] }
  0x38   : > { %316 = vst.msk [vmem:[#allocation2 + $0x31] sm:$0xff] %vm313_vm1, %v282_v9  ;;  %317 = vst.msk [vmem:[#allocation2 + $0x39] sm:$0xff] %vm313_vm1, %v283_v15  ;;  %v308_v15 = vld [vmem:[%s7596_s15 + $0xe0] sm:$0xff] }
  0x39   : > { %318 = vst.msk [vmem:[#allocation2 + $0x49] sm:$0xff] %vm313_vm1, %v284_v16  ;;  %319 = vst.msk [vmem:[#allocation2 + $0x51] sm:$0xff] %vm313_vm1, %v285_v18  ;;  %v309_v16 = vld [vmem:[%s7596_s15 + $0xe8] sm:$0xff] }
  0x3a   : > { %320 = vst.msk [vmem:[#allocation2 + $0x61] sm:$0xff] %vm313_vm1, %v286_v19  ;;  %321 = vst.msk [vmem:[#allocation2 + $0x69] sm:$0xff] %vm313_vm1, %v287_v20 }
  0x3b   : > { %322 = vst.msk [vmem:[#allocation2 + $0x79] sm:$0xff] %vm313_vm1, %v288_v21  ;;  %323 = vst.msk [vmem:[#allocation2 + $0x81] sm:$0xff] %vm313_vm1, %v289_v22 }
  0x3c   : > { %324 = vst.msk [vmem:[#allocation2 + $0x91] sm:$0xff] %vm313_vm1, %v290_v23  ;;  %325 = vst.msk [vmem:[#allocation2 + $0x99] sm:$0xff] %vm313_vm1, %v291_v24 }
  0x3d   : > { %326 = vst.msk [vmem:[#allocation2 + $0xa9] sm:$0xff] %vm313_vm1, %v292_v25  ;;  %327 = vst.msk [vmem:[#allocation2 + $0xb1] sm:$0xff] %vm313_vm1, %v293_v26 }
  0x3e   : > { %328 = vst.msk [vmem:[#allocation2 + $0xc1] sm:$0xff] %vm313_vm1, %v294_v27  ;;  %329 = vst.msk [vmem:[#allocation2 + $0xc9] sm:$0xff] %vm313_vm1, %v295_v28  ;;  %v513_v33 = vld [vmem:[#allocation2 + $0x19] sm:$0xff]  ;;  %v514_v34 = vld [vmem:[#allocation2 + $0x21] sm:$0xff] }
  0x3f   : > { %330 = vst.msk [vmem:[#allocation2 + $0xd9] sm:$0xff] %vm313_vm1, %v296_v29  ;;  %v464_v35 = vld [vmem:[#allocation2 + $0x18] sm:$0xff]  ;;  %331 = vst.msk [vmem:[#allocation2 + $0xe1] sm:$0xff] %vm313_vm1, %v297_v30  ;;  %v7640_v36 = vpack.c.bf16 %v514_v34, %v513_v33  ;;  %v465_v37 = vld [vmem:[#allocation2 + $0x20] sm:$0xff] }
  0x40   : > { %332 = vst.msk [vmem:[#allocation2 + $0xf1] sm:$0xff] %vm313_vm1, %v298_v31  ;;  %333 = vst.msk [vmem:[#allocation2 + $0xf9] sm:$0xff] %vm313_vm1, %v299_v32  ;;  %v515_v39 = vld [vmem:[#allocation2 + $0x31] sm:$0xff]  ;;  %v7644_v41 = vpack.c.bf16 %v465_v37, %v464_v35  ;;  %v516_v42 = vld [vmem:[#allocation2 + $0x39] sm:$0xff] }
  0x41   : > { %v466_v40 = vld [vmem:[#allocation2 + $0x30] sm:$0xff]  ;;  %v467_v43 = vld [vmem:[#allocation2 + $0x38] sm:$0xff]  ;;  %6697 = vmatmul.mubr.msk.bf16.vlgmr.msra.gmra.mxu0 %vm313_vm1, %v7640_v36  ;;  %v7648_v44 = vpack.c.bf16 %v516_v42, %v515_v39  ;;  %v468_v50 = vld [vmem:[#allocation2 + $0x48] sm:$0xff]  ;;  %334 = vst.msk [vmem:[#allocation2 + $0x109] sm:$0xff] %vm313_vm1, %v300_v4 }
  0x42   : > { %v7650_v45 = vpack.c.bf16 %v467_v43, %v466_v40  ;;  %6731 = vmatmul.mubr.msk.bf16.vlgmr.msra.gmra.mxu1 %vm313_vm1, %v7644_v41  ;;  %6763 = vmatpush3.bf16.msra.mxu0 %v1085_v38  ;;  %v517_v48 = vld [vmem:[#allocation2 + $0x49] sm:$0xff]  ;;  %v518_v49 = vld [vmem:[#allocation2 + $0x51] sm:$0xff]  ;;  %v519_v52 = vld [vmem:[#allocation2 + $0x61] sm:$0xff]  ;;  %335 = vst.msk [vmem:[#allocation2 + $0x111] sm:$0xff] %vm313_vm1, %v301_v5 }
  0x43   : > { %6700 = vmatprep.mubr.msk.bf16.mxu0 %vm313_vm1, %v7648_v44  ;;  %v469_v51 = vld [vmem:[#allocation2 + $0x50] sm:$0xff]  ;;  %v470_v54 = vld [vmem:[#allocation2 + $0x60] sm:$0xff]  ;;  %v471_v55 = vld [vmem:[#allocation2 + $0x68] sm:$0xff]  ;;  %6797 = vmatpush3.bf16.msra.mxu1 %v1379_v46  ;;  %v7667_v56 = vpack.c.bf16 %v518_v49, %v517_v48  ;;  %336 = vst.msk [vmem:[#allocation2 + $0x121] sm:$0xff] %vm313_vm1, %v302_v6 }
  0x44   : > { %6734 = vmatprep.mubr.msk.bf16.mxu1 %vm313_vm1, %v7650_v45  ;;  %v520_v53 = vld [vmem:[#allocation2 + $0x69] sm:$0xff]  ;;  %7310 = vmatprep.subr.msk.bf16.mxu0 %vm609_vm0, %v7657_v47  ;;  %v7669_v57 = vpack.c.bf16 %v469_v51, %v468_v50  ;;  %v7673_v59 = vpack.c.bf16 %v471_v55, %v470_v54  ;;  %v521_v60 = vld [vmem:[#allocation2 + $0x79] sm:$0xff]  ;;  %v522_v61 = vld [vmem:[#allocation2 + $0x81] sm:$0xff]  ;;  %337 = vst.msk [vmem:[#allocation2 + $0x129] sm:$0xff] %vm313_vm1, %v303_v7 }
  0x45   : > { %v7671_v58 = vpack.c.bf16 %v520_v53, %v519_v52  ;;  %v472_v62 = vld [vmem:[#allocation2 + $0x78] sm:$0xff]  ;;  %v473_v63 = vld [vmem:[#allocation2 + $0x80] sm:$0xff]  ;;  %v474_v2 = vld [vmem:[#allocation2 + $0x90] sm:$0xff]  ;;  %v7690_v9 = vpack.c.bf16 %v522_v61, %v521_v60  ;;  %338 = vst.msk [vmem:[#allocation2 + $0x139] sm:$0xff] %vm313_vm1, %v304_v8 }
  0x46   : > { %v523_v0 = vld [vmem:[#allocation2 + $0x91] sm:$0xff]  ;;  %v524_v1 = vld [vmem:[#allocation2 + $0x99] sm:$0xff]  ;;  %v7698_v13 = vpack.c.bf16 %v473_v63, %v472_v62  ;;  %339 = vst.msk [vmem:[#allocation2 + $0x141] sm:$0xff] %vm313_vm1, %v305_v10  ;;  %340 = vst.msk [vmem:[#allocation2 + $0x151] sm:$0xff] %vm313_vm1, %v306_v11 }
  0x47   : > { %v475_v3 = vld [vmem:[#allocation2 + $0x98] sm:$0xff]  ;;  %v7700_v14 = vpack.c.bf16 %v524_v1, %v523_v0  ;;  %341 = vst.msk [vmem:[#allocation2 + $0x159] sm:$0xff] %vm313_vm1, %v307_v12  ;;  %342 = vst.msk [vmem:[#allocation2 + $0x169] sm:$0xff] %vm313_vm1, %v308_v15  ;;  %v525_v18 = vld [vmem:[#allocation2 + $0xa9] sm:$0xff] }
  0x48   : > { %v7707_v17 = vpack.c.bf16 %v475_v3, %v474_v2  ;;  %343 = vst.msk [vmem:[#allocation2 + $0x171] sm:$0xff] %vm313_vm1, %v309_v16  ;;  %v526_v19 = vld [vmem:[#allocation2 + $0xb1] sm:$0xff]  ;;  %v476_v20 = vld [vmem:[#allocation2 + $0xa8] sm:$0xff]  ;;  %v478_v24 = vld [vmem:[#allocation2 + $0xc0] sm:$0xff] }
  0x49   : > { %6701 = vmatmul.mubr.msk.bf16.gmra.mxu0 %vm313_vm1, %v7667_v56  ;;  %v477_v21 = vld [vmem:[#allocation2 + $0xb0] sm:$0xff]  ;;  %v527_v22 = vld [vmem:[#allocation2 + $0xc1] sm:$0xff]  ;;  %v7719_v26 = vpack.c.bf16 %v526_v19, %v525_v18  ;;  %v529_v30 = vld [vmem:[#allocation2 + $0xd9] sm:$0xff] }
  0x4a   : > { %6735 = vmatmul.mubr.msk.bf16.gmra.mxu1 %vm313_vm1, %v7669_v57  ;;  %6704 = vmatprep.mubr.msk.bf16.mxu0 %vm313_vm1, %v7671_v58  ;;  %v528_v23 = vld [vmem:[#allocation2 + $0xc9] sm:$0xff]  ;;  %v7721_v27 = vpack.c.bf16 %v477_v21, %v476_v20  ;;  %v530_v31 = vld [vmem:[#allocation2 + $0xe1] sm:$0xff]  ;;  %v480_v32 = vld [vmem:[#allocation2 + $0xd8] sm:$0xff] }
  0x4b   : > { %6738 = vmatprep.mubr.msk.bf16.mxu1 %vm313_vm1, %v7673_v59  ;;  %v479_v25 = vld [vmem:[#allocation2 + $0xc8] sm:$0xff]  ;;  %v7723_v28 = vpack.c.bf16 %v528_v23, %v527_v22  ;;  %v481_v33 = vld [vmem:[#allocation2 + $0xe0] sm:$0xff]  ;;  %v531_v34 = vld [vmem:[#allocation2 + $0xf1] sm:$0xff]  ;;  %v7735_v39 = vpack.c.bf16 %v530_v31, %v529_v30 }
  0x4c   : > { %v7725_v29 = vpack.c.bf16 %v479_v25, %v478_v24  ;;  %v532_v35 = vld [vmem:[#allocation2 + $0xf9] sm:$0xff]  ;;  %v482_v37 = vld [vmem:[#allocation2 + $0xf0] sm:$0xff]  ;;  %v7737_v40 = vpack.c.bf16 %v481_v33, %v480_v32  ;;  %v6164_v49 = vld [vmem:[%s10081_s1 + $0xa] sm:$0x3] }
  0x4d   : > { %v483_v38 = vld [vmem:[#allocation2 + $0xf8] sm:$0xff]  ;;  %v7739_v42 = vpack.c.bf16 %v532_v35, %v531_v34  ;;  %v310_v46 = vld [vmem:[%s7596_s15 + $0xf0] sm:$0xff]  ;;  %7311 = vmatprep.subr.msk.bf16.mxu1 %vm609_vm0, %v6164_v49  ;;  %v484_v52 = vld [vmem:[#allocation2 + $0x108] sm:$0xff] }
  0x4e   : > { %v7741_v43 = vpack.c.bf16 %v483_v38, %v482_v37  ;;  %v311_v48 = vld [vmem:[%s7596_s15 + $0xf8] sm:$0xff]  ;;  %344 = vst.msk [vmem:[#allocation2 + $0x181] sm:$0xff] %vm313_vm1, %v310_v46  ;;  %v533_v50 = vld [vmem:[#allocation2 + $0x109] sm:$0xff]  ;;  %v535_v54 = vld [vmem:[#allocation2 + $0x121] sm:$0xff]  ;;  %v1673_v37 = vsel %vm609_vm0, %v7657_v47, 0  ;;  %v1967_v46 = vsel %vm609_vm0, %v6164_v49, 0 }
  0x4f   : > { %345 = vst.msk [vmem:[#allocation2 + $0x189] sm:$0xff] %vm313_vm1, %v311_v48  ;;  %v534_v51 = vld [vmem:[#allocation2 + $0x111] sm:$0xff]  ;;  %v536_v55 = vld [vmem:[#allocation2 + $0x129] sm:$0xff]  ;;  %v486_v60 = vld [vmem:[#allocation2 + $0x120] sm:$0xff] }
  0x50   : > { %v485_v53 = vld [vmem:[#allocation2 + $0x110] sm:$0xff]  ;;  %v487_v61 = vld [vmem:[#allocation2 + $0x128] sm:$0xff]  ;;  %v7759_v62 = vpack.c.bf16 %v534_v51, %v533_v50  ;;  %v7763_v0 = vpack.c.bf16 %v536_v55, %v535_v54  ;;  %v537_v2 = vld [vmem:[#allocation2 + $0x139] sm:$0xff] }
  0x51   : > { %6705 = vmatmul.mubr.msk.bf16.gmra.mxu0 %vm313_vm1, %v7690_v9  ;;  %v7761_v63 = vpack.c.bf16 %v485_v53, %v484_v52  ;;  %v7765_v1 = vpack.c.bf16 %v487_v61, %v486_v60  ;;  %v538_v3 = vld [vmem:[#allocation2 + $0x141] sm:$0xff]  ;;  %v488_v4 = vld [vmem:[#allocation2 + $0x138] sm:$0xff]  ;;  %v490_v8 = vld [vmem:[#allocation2 + $0x150] sm:$0xff] }
  0x52   : > { %6739 = vmatmul.mubr.msk.bf16.gmra.mxu1 %vm313_vm1, %v7698_v13  ;;  %6708 = vmatprep.mubr.msk.bf16.mxu0 %vm313_vm1, %v7700_v14  ;;  %v489_v5 = vld [vmem:[#allocation2 + $0x140] sm:$0xff]  ;;  %v539_v6 = vld [vmem:[#allocation2 + $0x151] sm:$0xff]  ;;  %v7775_v11 = vpack.c.bf16 %v538_v3, %v537_v2  ;;  %v541_v18 = vld [vmem:[#allocation2 + $0x169] sm:$0xff] }
  0x53   : > { %6742 = vmatprep.mubr.msk.bf16.mxu1 %vm313_vm1, %v7707_v17  ;;  %v540_v7 = vld [vmem:[#allocation2 + $0x159] sm:$0xff]  ;;  %v7777_v12 = vpack.c.bf16 %v489_v5, %v488_v4  ;;  %v542_v19 = vld [vmem:[#allocation2 + $0x171] sm:$0xff]  ;;  %v986_v20 = vld [vmem:[#allocation2 + $0x2] sm:$0xff] }
  0x54   : > { %v491_v10 = vld [vmem:[#allocation2 + $0x158] sm:$0xff]  ;;  %v7779_v15 = vpack.c.bf16 %v540_v7, %v539_v6  ;;  %v492_v21 = vld [vmem:[#allocation2 + $0x168] sm:$0xff]  ;;  %v493_v22 = vld [vmem:[#allocation2 + $0x170] sm:$0xff]  ;;  %v7791_v24 = vpack.c.bf16 %v542_v19, %v541_v18 }
  0x55   : > { %v7781_v16 = vpack.c.bf16 %v491_v10, %v490_v8  ;;  %v987_v23 = vld [vmem:[#allocation2 + $0xa] sm:$0xff]  ;;  %v7793_v25 = vpack.c.bf16 %v493_v22, %v492_v21  ;;  %v988_v31 = vld [vmem:[#allocation2 + $0x1a] sm:$0xff]  ;;  %v989_v32 = vld [vmem:[#allocation2 + $0x22] sm:$0xff] }
  0x56   : > { %v1018_v30 = vpack.c.bf16 %v987_v23, %v986_v20  ;;  %v990_v33 = vld [vmem:[#allocation2 + $0x32] sm:$0xff]  ;;  %v991_v34 = vld [vmem:[#allocation2 + $0x3a] sm:$0xff]  ;;  %v7802_v35 = vpack.c.bf16 %v989_v32, %v988_v31  ;;  %v7814_v48 = vld [vmem:[%s10081_s1 + $0xc] sm:$0x3] }
  0x57   : > { %v7806_v38 = vpack.c.bf16 %v991_v34, %v990_v33  ;;  %v993_v50 = vld [vmem:[#allocation2 + $0x52] sm:$0xff]  ;;  %v7821_v47 = vld [vmem:[%s10081_s1 + $0xe] sm:$0x3]  ;;  %v994_v49 = vld [vmem:[#allocation2 + $0x62] sm:$0xff] }
  0x58   : > { %v995_v51 = vld [vmem:[#allocation2 + $0x6a] sm:$0xff]  ;;  %v996_v54 = vld [vmem:[#allocation2 + $0x7a] sm:$0xff]  ;;  %v997_v55 = vld [vmem:[#allocation2 + $0x82] sm:$0xff] }
  0x59   : > { %6709 = vmatmul.mubr.msk.bf16.gmra.mxu0 %vm313_vm1, %v7719_v26  ;;  %v7833_v53 = vpack.c.bf16 %v995_v51, %v994_v49  ;;  %v998_v60 = vld [vmem:[#allocation2 + $0x92] sm:$0xff]  ;;  %v999_v61 = vld [vmem:[#allocation2 + $0x9a] sm:$0xff]  ;;  %v7843_v2 = vpack.c.bf16 %v997_v55, %v996_v54  ;;  %v1000_v4 = vld [vmem:[#allocation2 + $0xaa] sm:$0xff] }
  0x5a   : > { %6743 = vmatmul.mubr.msk.bf16.gmra.mxu1 %vm313_vm1, %v7721_v27  ;;  %6712 = vmatprep.mubr.msk.bf16.mxu0 %vm313_vm1, %v7723_v28  ;;  %v7845_v3 = vpack.c.bf16 %v999_v61, %v998_v60  ;;  %v1001_v5 = vld [vmem:[#allocation2 + $0xb2] sm:$0xff]  ;;  %v1002_v6 = vld [vmem:[#allocation2 + $0xc2] sm:$0xff]  ;;  %v1003_v7 = vld [vmem:[#allocation2 + $0xca] sm:$0xff] }
  0x5b   : > { %6746 = vmatprep.mubr.msk.bf16.mxu1 %vm313_vm1, %v7725_v29  ;;  %v7855_v8 = vpack.c.bf16 %v1001_v5, %v1000_v4  ;;  %v7857_v10 = vpack.c.bf16 %v1003_v7, %v1002_v6  ;;  %v1004_v18 = vld [vmem:[#allocation2 + $0xda] sm:$0xff]  ;;  %v1005_v19 = vld [vmem:[#allocation2 + $0xe2] sm:$0xff]  ;;  %v1006_v20 = vld [vmem:[#allocation2 + $0xf2] sm:$0xff]  ;;  %v2262_v7 = vsel %vm609_vm0, %v7814_v48, 0 }
  0x5c   : > { %v1007_v21 = vld [vmem:[#allocation2 + $0xfa] sm:$0xff]  ;;  %v7867_v22 = vpack.c.bf16 %v1005_v19, %v1004_v18  ;;  %v1009_v31 = vld [vmem:[#allocation2 + $0x112] sm:$0xff]  ;;  %v1010_v32 = vld [vmem:[#allocation2 + $0x122] sm:$0xff]  ;;  %v2556_v18 = vsel %vm609_vm0, %v7821_v47, 0 }
  0x5d   : > { %v1028_v23 = vpack.c.bf16 %v1007_v21, %v1006_v20  ;;  %v1011_v33 = vld [vmem:[#allocation2 + $0x12a] sm:$0xff]  ;;  %v1015_v49 = vld [vmem:[#allocation2 + $0x15a] sm:$0xff]  ;;  %v1017_v60 = vld [vmem:[#allocation2 + $0x172] sm:$0xff] }
  0x5e   : > { %v1016_v55 = vld [vmem:[#allocation2 + $0x16a] sm:$0xff]  ;;  %v1310_v61 = vld [vmem:[#allocation2 + $0x180] sm:$0xff] }
  0x5f   : > { %v1311_v4 = vld [vmem:[#allocation2 + $0x188] sm:$0xff]  ;;  %v1033_v5 = vpack.c.bf16 %v1017_v60, %v1016_v55  ;;  %v6215_v19 = vld [vmem:[%s10081_s1 + $0x10] sm:$0x3] }
  0x60   : > { %v7888_v6 = vpack.c.bf16 %v1311_v4, %v1310_v61 }
  0x61   : > { %6713 = vmatmul.mubr.msk.bf16.gmra.mxu0 %vm313_vm1, %v7735_v39 }
  0x62   : > { %6747 = vmatmul.mubr.msk.bf16.gmra.mxu1 %vm313_vm1, %v7737_v40  ;;  %6716 = vmatprep.mubr.msk.bf16.mxu0 %vm313_vm1, %v7739_v42 }
  0x63   : > { %6750 = vmatprep.mubr.msk.bf16.mxu1 %vm313_vm1, %v7741_v43 }
  0x69   : > { %6717 = vmatmul.mubr.msk.bf16.gmra.mxu0 %vm313_vm1, %v7759_v62 }
  0x6a   : > { %6751 = vmatmul.mubr.msk.bf16.gmra.mxu1 %vm313_vm1, %v7761_v63  ;;  %6720 = vmatprep.mubr.msk.bf16.mxu0 %vm313_vm1, %v7763_v0 }
  0x6b   : > { %6754 = vmatprep.mubr.msk.bf16.mxu1 %vm313_vm1, %v7765_v1 }
  0x71   : > { %6721 = vmatmul.mubr.msk.bf16.gmra.mxu0 %vm313_vm1, %v7775_v11 }
  0x72   : > { %6755 = vmatmul.mubr.msk.bf16.gmra.mxu1 %vm313_vm1, %v7777_v12  ;;  %6724 = vmatprep.mubr.msk.bf16.mxu0 %vm313_vm1, %v7779_v15 }
  0x73   : > { %6758 = vmatprep.mubr.msk.bf16.mxu1 %vm313_vm1, %v7781_v16 }
  0x79   : > { %6725 = vmatmul.mubr.msk.bf16.gmra.mxu0 %vm313_vm1, %v7791_v24 }
  0x7a   : > { %6759 = vmatmul.mubr.msk.bf16.gmra.mxu1 %vm313_vm1, %v7793_v25  ;;  %6764 = vmatprep.mubr.msk.bf16.mxu0 %vm313_vm1, %v1018_v30  ;;  %v1008_v30 = vld [vmem:[#allocation2 + $0x10a] sm:$0xff] }
  0x7b   : > { %6798 = vmatprep.mubr.msk.bf16.mxu1 %vm313_vm1, %v7644_v41  ;;  %v992_v41 = vld [vmem:[#allocation2 + $0x4a] sm:$0xff]  ;;  %v1029_v34 = vpack.c.bf16 %v1009_v31, %v1008_v30 }
  0x7c   : > { %v7829_v52 = vpack.c.bf16 %v993_v50, %v992_v41  ;;  %v1013_v41 = vld [vmem:[#allocation2 + $0x142] sm:$0xff]  ;;  %v1014_v50 = vld [vmem:[#allocation2 + $0x152] sm:$0xff] }
  0x7d   : > { %v1032_v54 = vpack.c.bf16 %v1015_v49, %v1014_v50 }
  0x81   : > { %6765 = vmatmul.mubr.msk.bf16.vlgmr.msra.gmra.mxu0 %vm313_vm1, %v7802_v35 }
  0x82   : > { %6831 = vmatpush3.bf16.msra.mxu0 %v1673_v37  ;;  %6799 = vmatmul.mubr.msk.bf16.vlgmr.msra.gmra.mxu1 %vm313_vm1, %v7650_v45  ;;  %v1030_v37 = vpack.c.bf16 %v1011_v33, %v1010_v32 }
  0x83   : > { %6768 = vmatprep.mubr.msk.bf16.mxu0 %vm313_vm1, %v7806_v38  ;;  %6802 = vmatprep.mubr.msk.bf16.mxu1 %vm313_vm1, %v7669_v57 }
  0x84   : > { %6865 = vmatpush3.bf16.msra.mxu1 %v1967_v46  ;;  %7312 = vmatprep.subr.msk.bf16.mxu0 %vm609_vm0, %v7814_v48  ;;  %v1012_v46 = vld [vmem:[#allocation2 + $0x13a] sm:$0xff]  ;;  %v1898_v48 = vld [vmem:[#allocation2 + $0x182] sm:$0xff] }
  0x85   : > { %7313 = vmatprep.subr.msk.bf16.mxu1 %vm609_vm0, %v7821_v47  ;;  %v1031_v51 = vpack.c.bf16 %v1013_v41, %v1012_v46  ;;  %v1899_v47 = vld [vmem:[#allocation2 + $0x18a] sm:$0xff] }
  0x86   : > { %v7957_v21 = vpack.c.bf16 %v1899_v47, %v1898_v48 }
  0x89   : > { %6769 = vmatmul.mubr.msk.bf16.gmra.mxu0 %vm313_vm1, %v7829_v52 }
  0x8a   : > { %6803 = vmatmul.mubr.msk.bf16.gmra.mxu1 %vm313_vm1, %v7673_v59  ;;  %6772 = vmatprep.mubr.msk.bf16.mxu0 %vm313_vm1, %v7833_v53 }
  0x8b   : > { %6806 = vmatprep.mubr.msk.bf16.mxu1 %vm313_vm1, %v7698_v13 }
  0x91   : > { %6773 = vmatmul.mubr.msk.bf16.gmra.mxu0 %vm313_vm1, %v7843_v2 }
  0x92   : > { %6807 = vmatmul.mubr.msk.bf16.gmra.mxu1 %vm313_vm1, %v7707_v17  ;;  %6776 = vmatprep.mubr.msk.bf16.mxu0 %vm313_vm1, %v7845_v3 }
  0x93   : > { %6810 = vmatprep.mubr.msk.bf16.mxu1 %vm313_vm1, %v7721_v27 }
  0x99   : > { %6777 = vmatmul.mubr.msk.bf16.gmra.mxu0 %vm313_vm1, %v7855_v8 }
  0x9a   : > { %6811 = vmatmul.mubr.msk.bf16.gmra.mxu1 %vm313_vm1, %v7725_v29  ;;  %6780 = vmatprep.mubr.msk.bf16.mxu0 %vm313_vm1, %v7857_v10 }
  0x9b   : > { %6814 = vmatprep.mubr.msk.bf16.mxu1 %vm313_vm1, %v7737_v40 }
  0xa1   : > { %6781 = vmatmul.mubr.msk.bf16.gmra.mxu0 %vm313_vm1, %v7867_v22 }
  0xa2   : > { %6815 = vmatmul.mubr.msk.bf16.gmra.mxu1 %vm313_vm1, %v7741_v43  ;;  %6784 = vmatprep.mubr.msk.bf16.mxu0 %vm313_vm1, %v1028_v23 }
  0xa3   : > { %6818 = vmatprep.mubr.msk.bf16.mxu1 %vm313_vm1, %v7761_v63 }
  0xa9   : > { %6785 = vmatmul.mubr.msk.bf16.gmra.mxu0 %vm313_vm1, %v1029_v34 }
  0xaa   : > { %6819 = vmatmul.mubr.msk.bf16.gmra.mxu1 %vm313_vm1, %v7765_v1  ;;  %6788 = vmatprep.mubr.msk.bf16.mxu0 %vm313_vm1, %v1030_v37 }
  0xab   : > { %6822 = vmatprep.mubr.msk.bf16.mxu1 %vm313_vm1, %v7777_v12 }
  0xb1   : > { %6789 = vmatmul.mubr.msk.bf16.gmra.mxu0 %vm313_vm1, %v1031_v51 }
  0xb2   : > { %6823 = vmatmul.mubr.msk.bf16.gmra.mxu1 %vm313_vm1, %v7781_v16  ;;  %6792 = vmatprep.mubr.msk.bf16.mxu0 %vm313_vm1, %v1032_v54 }
  0xb3   : > { %6826 = vmatprep.mubr.msk.bf16.mxu1 %vm313_vm1, %v7793_v25 }
  0xb9   : > { %6793 = vmatmul.mubr.msk.bf16.gmra.mxu0 %vm313_vm1, %v1033_v5 }
  0xba   : > { %6827 = vmatmul.mubr.msk.bf16.gmra.mxu1 %vm313_vm1, %v7888_v6  ;;  %6832 = vmatprep.mubr.msk.bf16.mxu0 %vm313_vm1, %v7640_v36  ;;  %v1604_v36 = vld [vmem:[#allocation2 + $0x181] sm:$0xff] }
  0xbb   : > { %6866 = vmatprep.mubr.msk.bf16.mxu1 %vm313_vm1, %v7802_v35  ;;  %v1605_v35 = vld [vmem:[#allocation2 + $0x189] sm:$0xff] }
  0xbc   : > { %v7955_v20 = vpack.c.bf16 %v1605_v35, %v1604_v36 }
  0xc1   : > { %6833 = vmatmul.mubr.msk.bf16.vlgmr.msra.gmra.mxu0 %vm313_vm1, %v7648_v44 }
  0xc2   : > { %6899 = vmatpush3.bf16.msra.mxu0 %v2262_v7  ;;  %6867 = vmatmul.mubr.msk.bf16.vlgmr.msra.gmra.mxu1 %vm313_vm1, %v7806_v38 }
  0xc3   : > { %6836 = vmatprep.mubr.msk.bf16.mxu0 %vm313_vm1, %v7667_v56  ;;  %6870 = vmatprep.mubr.msk.bf16.mxu1 %vm313_vm1, %v7829_v52 }
  0xc4   : > { %6933 = vmatpush3.bf16.msra.mxu1 %v2556_v18  ;;  %7314 = vmatprep.subr.msk.bf16.mxu0 %vm609_vm0, %v6215_v19 }
  0xc9   : > { %6837 = vmatmul.mubr.msk.bf16.gmra.mxu0 %vm313_vm1, %v7671_v58 }
  0xca   : > { %6871 = vmatmul.mubr.msk.bf16.gmra.mxu1 %vm313_vm1, %v7833_v53  ;;  %6840 = vmatprep.mubr.msk.bf16.mxu0 %vm313_vm1, %v7690_v9 }
  0xcb   : > { %6874 = vmatprep.mubr.msk.bf16.mxu1 %vm313_vm1, %v7843_v2 }
  0xd1   : > { %6841 = vmatmul.mubr.msk.bf16.gmra.mxu0 %vm313_vm1, %v7700_v14 }
  0xd2   : > { %6875 = vmatmul.mubr.msk.bf16.gmra.mxu1 %vm313_vm1, %v7845_v3  ;;  %6844 = vmatprep.mubr.msk.bf16.mxu0 %vm313_vm1, %v7719_v26 }
  0xd3   : > { %6878 = vmatprep.mubr.msk.bf16.mxu1 %vm313_vm1, %v7855_v8 }
  0xd9   : > { %6845 = vmatmul.mubr.msk.bf16.gmra.mxu0 %vm313_vm1, %v7723_v28 }
  0xda   : > { %6879 = vmatmul.mubr.msk.bf16.gmra.mxu1 %vm313_vm1, %v7857_v10  ;;  %6848 = vmatprep.mubr.msk.bf16.mxu0 %vm313_vm1, %v7735_v39 }
  0xdb   : > { %6882 = vmatprep.mubr.msk.bf16.mxu1 %vm313_vm1, %v7867_v22 }
  0xe1   : > { %6849 = vmatmul.mubr.msk.bf16.gmra.mxu0 %vm313_vm1, %v7739_v42 }
  0xe2   : > { %6883 = vmatmul.mubr.msk.bf16.gmra.mxu1 %vm313_vm1, %v1028_v23  ;;  %6852 = vmatprep.mubr.msk.bf16.mxu0 %vm313_vm1, %v7759_v62  ;;  %v2850_v23 = vsel %vm609_vm0, %v6215_v19, 0 }
  0xe3   : > { %6886 = vmatprep.mubr.msk.bf16.mxu1 %vm313_vm1, %v1029_v34 }
  0xe9   : > { %6853 = vmatmul.mubr.msk.bf16.gmra.mxu0 %vm313_vm1, %v7763_v0 }
  0xea   : > { %6887 = vmatmul.mubr.msk.bf16.gmra.mxu1 %vm313_vm1, %v1030_v37  ;;  %6856 = vmatprep.mubr.msk.bf16.mxu0 %vm313_vm1, %v7775_v11 }
  0xeb   : > { %6890 = vmatprep.mubr.msk.bf16.mxu1 %vm313_vm1, %v1031_v51 }
  0xf1   : > { %6857 = vmatmul.mubr.msk.bf16.gmra.mxu0 %vm313_vm1, %v7779_v15 }
  0xf2   : > { %6891 = vmatmul.mubr.msk.bf16.gmra.mxu1 %vm313_vm1, %v1032_v54  ;;  %6860 = vmatprep.mubr.msk.bf16.mxu0 %vm313_vm1, %v7791_v24 }
  0xf3   : > { %6894 = vmatprep.mubr.msk.bf16.mxu1 %vm313_vm1, %v1033_v5 }
  0xf9   : > { %6861 = vmatmul.mubr.msk.bf16.gmra.mxu0 %vm313_vm1, %v7955_v20 }
  0xfa   : > { %6895 = vmatmul.mubr.msk.bf16.gmra.mxu1 %vm313_vm1, %v7957_v21  ;;  %6900 = vmatprep.mubr.msk.bf16.mxu0 %vm313_vm1, %v7650_v45 }
  0xfb   : > { %6934 = vmatprep.mubr.msk.bf16.mxu1 %vm313_vm1, %v7648_v44 }
 0x101   : > { %v6698_v30 = vpop.f32.mrf.mxu0  ;;  %6901 = vmatmul.mubr.msk.bf16.vlgmr.msra.gmra.mxu0 %vm313_vm1, %v7669_v57 }
 0x102   : > { %v6732_v31 = vpop.f32.mrf.mxu1  ;;  %6967 = vmatpush3.bf16.msra.mxu0 %v2850_v23  ;;  %6935 = vmatmul.mubr.msk.bf16.vlgmr.msra.gmra.mxu1 %vm313_vm1, %v7667_v56 }
 0x103   : > { %v7972_v32 = vadd.f32 %v6732_v31, %v6698_v30  ;;  %v647_v33 = vpop.f32.mrf.mxu0  ;;  %6904 = vmatprep.mubr.msk.bf16.mxu0 %vm313_vm1, %v7673_v59  ;;  %6938 = vmatprep.mubr.msk.bf16.mxu1 %vm313_vm1, %v7671_v58 }
 0x104   : > { %v859_v44 = vpop.f32.mrf.mxu1 }
 0x105   : > { %v7978_v45 = vadd.f32 %v859_v44, %v647_v33  ;;  %v6699_v34 = vpop.f32.mrf.mxu0 }
 0x106   : > { %v6733_v37 = vpop.f32.mrf.mxu1 }
 0x107   : > { %v7980_v57 = vadd.f32 %v6733_v37, %v6699_v34  ;;  %v650_v46 = vpop.f32.mrf.mxu0 }
 0x108   : > { %v862_v41 = vpop.f32.mrf.mxu1 }
 0x109   : > { %v7982_v50 = vadd.f32 %v862_v41, %v650_v46  ;;  %v6702_v56 = vpop.f32.mrf.mxu0  ;;  %6905 = vmatmul.mubr.msk.bf16.gmra.mxu0 %vm313_vm1, %v7698_v13 }
 0x10a   : > { %v6736_v49 = vpop.f32.mrf.mxu1  ;;  %6939 = vmatmul.mubr.msk.bf16.gmra.mxu1 %vm313_vm1, %v7690_v9  ;;  %6908 = vmatprep.mubr.msk.bf16.mxu0 %vm313_vm1, %v7707_v17 }
 0x10b   : > { %v7990_v58 = vadd.f32 %v6736_v49, %v6702_v56  ;;  %v663_v59 = vpop.f32.mrf.mxu0  ;;  %6942 = vmatprep.mubr.msk.bf16.mxu1 %vm313_vm1, %v7700_v14 }
 0x10c   : > { %v875_v51 = vpop.f32.mrf.mxu1 }
 0x10d   : > { %v7994_v54 = vadd.f32 %v875_v51, %v663_v59  ;;  %v6703_v55 = vpop.f32.mrf.mxu0 }
 0x10e   : > { %v6737_v60 = vpop.f32.mrf.mxu1 }
 0x10f   : > { %v7996_v61 = vadd.f32 %v6737_v60, %v6703_v55  ;;  %v666_v13 = vpop.f32.mrf.mxu0 }
 0x110   : > { %v878_v4 = vpop.f32.mrf.mxu1 }
 0x111   : > { %v7998_v5 = vadd.f32 %v878_v4, %v666_v13  ;;  %v6706_v9 = vpop.f32.mrf.mxu0  ;;  %6909 = vmatmul.mubr.msk.bf16.gmra.mxu0 %vm313_vm1, %v7721_v27 }
 0x112   : > { %v6740_v17 = vpop.f32.mrf.mxu1  ;;  %6943 = vmatmul.mubr.msk.bf16.gmra.mxu1 %vm313_vm1, %v7719_v26  ;;  %6912 = vmatprep.mubr.msk.bf16.mxu0 %vm313_vm1, %v7725_v29 }
 0x113   : > { %v8006_v14 = vadd.f32 %v6740_v17, %v6706_v9  ;;  %v679_v7 = vpop.f32.mrf.mxu0  ;;  %6946 = vmatprep.mubr.msk.bf16.mxu1 %vm313_vm1, %v7723_v28 }
 0x114   : > { %v891_v18 = vpop.f32.mrf.mxu1 }
 0x115   : > { %v8010_v19 = vadd.f32 %v891_v18, %v679_v7  ;;  %v6707_v36 = vpop.f32.mrf.mxu0 }
 0x116   : > { %v6741_v35 = vpop.f32.mrf.mxu1 }
 0x117   : > { %v8012_v48 = vadd.f32 %v6741_v35, %v6707_v36  ;;  %v682_v27 = vpop.f32.mrf.mxu0 }
 0x118   : > { %v894_v47 = vpop.f32.mrf.mxu1 }
 0x119   : > { %v8014_v23 = vadd.f32 %v894_v47, %v682_v27  ;;  %v6710_v26 = vpop.f32.mrf.mxu0  ;;  %6913 = vmatmul.mubr.msk.bf16.gmra.mxu0 %vm313_vm1, %v7737_v40  ;;  %v2194_v27 = vld [vmem:[#allocation2 + $0x1a0] sm:$0xff] }
 0x11a   : > { %v6744_v29 = vpop.f32.mrf.mxu1  ;;  %6947 = vmatmul.mubr.msk.bf16.gmra.mxu1 %vm313_vm1, %v7735_v39  ;;  %6916 = vmatprep.mubr.msk.bf16.mxu0 %vm313_vm1, %v7741_v43 }
 0x11b   : > { %v8022_v28 = vadd.f32 %v6744_v29, %v6710_v26  ;;  %v695_v30 = vpop.f32.mrf.mxu0  ;;  %6950 = vmatprep.mubr.msk.bf16.mxu1 %vm313_vm1, %v7739_v42  ;;  %v2487_v29 = vld [vmem:[#allocation2 + $0x199] sm:$0xff] }
 0x11c   : > { %v907_v31 = vpop.f32.mrf.mxu1 }
 0x11d   : > { %v8026_v33 = vadd.f32 %v907_v31, %v695_v30  ;;  %v6711_v44 = vpop.f32.mrf.mxu0  ;;  %v2488_v30 = vld [vmem:[#allocation2 + $0x1a1] sm:$0xff] }
 0x11e   : > { %v6745_v34 = vpop.f32.mrf.mxu1 }
 0x11f   : > { %v8028_v37 = vadd.f32 %v6745_v34, %v6711_v44  ;;  %v698_v40 = vpop.f32.mrf.mxu0 }
 0x120   : > { %v910_v46 = vpop.f32.mrf.mxu1 }
 0x121   : > { %v8030_v41 = vadd.f32 %v910_v46, %v698_v40  ;;  %v6714_v39 = vpop.f32.mrf.mxu0  ;;  %6917 = vmatmul.mubr.msk.bf16.gmra.mxu0 %vm313_vm1, %v7761_v63 }
 0x122   : > { %v6748_v43 = vpop.f32.mrf.mxu1  ;;  %6951 = vmatmul.mubr.msk.bf16.gmra.mxu1 %vm313_vm1, %v7759_v62  ;;  %6920 = vmatprep.mubr.msk.bf16.mxu0 %vm313_vm1, %v7765_v1 }
 0x123   : > { %v8038_v42 = vadd.f32 %v6748_v43, %v6714_v39  ;;  %v711_v56 = vpop.f32.mrf.mxu0  ;;  %6954 = vmatprep.mubr.msk.bf16.mxu1 %vm313_vm1, %v7763_v0 }
 0x124   : > { %v923_v49 = vpop.f32.mrf.mxu1 }
 0x125   : > { %v8042_v59 = vadd.f32 %v923_v49, %v711_v56  ;;  %v6715_v51 = vpop.f32.mrf.mxu0 }
 0x126   : > { %v6749_v55 = vpop.f32.mrf.mxu1 }
 0x127   : > { %v8044_v60 = vadd.f32 %v6749_v55, %v6715_v51  ;;  %v8046_v63 = vpop.f32.mrf.mxu0 }
 0x128   : > { %v8048_v13 = vpop.f32.mrf.mxu1 }
 0x129   : > { %v6718_v62 = vpop.f32.mrf.mxu0  ;;  %6921 = vmatmul.mubr.msk.bf16.gmra.mxu0 %vm313_vm1, %v7777_v12 }
 0x12a   : > { %v6752_v1 = vpop.f32.mrf.mxu1  ;;  %6955 = vmatmul.mubr.msk.bf16.gmra.mxu1 %vm313_vm1, %v7775_v11  ;;  %6924 = vmatprep.mubr.msk.bf16.mxu0 %vm313_vm1, %v7781_v16 }
 0x12b   : > { %v8056_v0 = vadd.f32 %v6752_v1, %v6718_v62  ;;  %v727_v4 = vpop.f32.mrf.mxu0  ;;  %6958 = vmatprep.mubr.msk.bf16.mxu1 %vm313_vm1, %v7779_v15  ;;  %v2193_v15 = vld [vmem:[#allocation2 + $0x198] sm:$0xff] }
 0x12c   : > { %v939_v9 = vpop.f32.mrf.mxu1  ;;  %v2210_v34 = vpack.c.bf16 %v2194_v27, %v2193_v15 }
 0x12d   : > { %v8060_v17 = vadd.f32 %v939_v9, %v727_v4  ;;  %v6719_v7 = vpop.f32.mrf.mxu0 }
 0x12e   : > { %v6753_v18 = vpop.f32.mrf.mxu1 }
 0x12f   : > { %v8062_v36 = vadd.f32 %v6753_v18, %v6719_v7  ;;  %v8064_v12 = vpop.f32.mrf.mxu0 }
 0x130   : > { %v8066_v35 = vpop.f32.mrf.mxu1 }
 0x131   : > { %v6722_v11 = vpop.f32.mrf.mxu0  ;;  %6925 = vmatmul.mubr.msk.bf16.gmra.mxu0 %vm313_vm1, %v7793_v25 }
 0x132   : > { %v6756_v16 = vpop.f32.mrf.mxu1  ;;  %6959 = vmatmul.mubr.msk.bf16.gmra.mxu1 %vm313_vm1, %v7791_v24  ;;  %6928 = vmatprep.mubr.msk.bf16.mxu0 %vm313_vm1, %v7888_v6  ;;  %v2504_v24 = vpack.c.bf16 %v2488_v30, %v2487_v29 }
 0x133   : > { %v8074_v47 = vadd.f32 %v6756_v16, %v6722_v11  ;;  %v743_v26 = vpop.f32.mrf.mxu0  ;;  %6962 = vmatprep.mubr.msk.bf16.mxu1 %vm313_vm1, %v7955_v20 }
 0x134   : > { %v955_v31 = vpop.f32.mrf.mxu1 }
 0x135   : > { %v8078_v44 = vadd.f32 %v955_v31, %v743_v26  ;;  %v6723_v25 = vpop.f32.mrf.mxu0 }
 0x136   : > { %v6757_v40 = vpop.f32.mrf.mxu1 }
 0x137   : > { %v8080_v46 = vadd.f32 %v6757_v40, %v6723_v25  ;;  %v8082_v6 = vpop.f32.mrf.mxu0 }
 0x138   : > { %v8084_v39 = vpop.f32.mrf.mxu1 }
 0x139   : > { %v6726_v43 = vpop.f32.mrf.mxu0  ;;  %6929 = vmatmul.mubr.msk.bf16.gmra.mxu0 %vm313_vm1, %v2210_v34 }
 0x13a   : > { %v6760_v56 = vpop.f32.mrf.mxu1  ;;  %6963 = vmatmul.mubr.msk.bf16.gmra.mxu1 %vm313_vm1, %v2504_v24  ;;  %6968 = vmatprep.mubr.msk.bf16.mxu0 %vm313_vm1, %v7806_v38 }
 0x13b   : > { %v8090_v20 = vadd.f32 %v6760_v56, %v6726_v43  ;;  %v759_v49 = vpop.f32.mrf.mxu0 }
 0x13c   : > { %v971_v51 = vpop.f32.mrf.mxu1 }
 0x13d   : > { %v8092_v55 = vadd.f32 %v971_v51, %v759_v49  ;;  %v6727_v62 = vpop.f32.mrf.mxu0 }
 0x13e   : > { %v6761_v1 = vpop.f32.mrf.mxu1 }
 0x13f   : > { %v8094_v4 = vadd.f32 %v6761_v1, %v6727_v62  ;;  %v8096_v9 = vpop.f32.mrf.mxu0 }
 0x140   : > { %v8098_v7 = vpop.f32.mrf.mxu1 }
 0x141   : > { %v6766_v18 = vpop.f32.mrf.mxu0  ;;  %6969 = vmatmul.mubr.msk.bf16.vlgmr.msra.gmra.mxu0 %vm313_vm1, %v7829_v52 }
 0x142   : > { %v1250_v38 = vadd.f32 %v6766_v18, %v7972_v32  ;;  %v6800_v11 = vpop.f32.mrf.mxu1  ;;  %6972 = vmatprep.mubr.msk.bf16.mxu0 %vm313_vm1, %v7833_v53 }
 0x143   : > { %v1121_v16 = vpop.f32.mrf.mxu0 }
 0x144   : > { %v1248_v15 = vadd.f32 %v1121_v16, %v7978_v45  ;;  %v8106_v27 = vadd.f32 %v6800_v11, %v1250_v38  ;;  %v1415_v26 = vpop.f32.mrf.mxu1  ;;  %v2767_v16 = vld [vmem:[#allocation2 + $0xf2] sm:$0xff] }
 0x145   : > { %v6767_v29 = vpop.f32.mrf.mxu0 }
 0x146   : > { %v1251_v30 = vadd.f32 %v6767_v29, %v7980_v57  ;;  %v8109_v31 = vadd.f32 %v1415_v26, %v1248_v15  ;;  %v6801_v25 = vpop.f32.mrf.mxu1  ;;  %v2768_v15 = vld [vmem:[#allocation2 + $0xfa] sm:$0xff] }
 0x147   : > { %v1124_v34 = vpop.f32.mrf.mxu0 }
 0x148   : > { %v8112_v52 = vadd.f32 %v1124_v34, %v7982_v50  ;;  %v8114_v32 = vadd.f32 %v6801_v25, %v1251_v30  ;;  %v8116_v40 = vpop.f32.mrf.mxu1 }
 0x149   : > { %v6770_v53 = vpop.f32.mrf.mxu0  ;;  %6973 = vmatmul.mubr.msk.bf16.gmra.mxu0 %vm313_vm1, %v7843_v2 }
 0x14a   : > { %v1254_v45 = vadd.f32 %v6770_v53, %v7990_v58  ;;  %v6804_v24 = vpop.f32.mrf.mxu1  ;;  %6976 = vmatprep.mubr.msk.bf16.mxu0 %vm313_vm1, %v7845_v3  ;;  %v2791_v53 = vpack.c.bf16 %v2768_v15, %v2767_v16 }
 0x14b   : > { %v1137_v57 = vpop.f32.mrf.mxu0 }
 0x14c   : > { %v1252_v43 = vadd.f32 %v1137_v57, %v7994_v54  ;;  %v8124_v56 = vadd.f32 %v6804_v24, %v1254_v45  ;;  %v1431_v50 = vpop.f32.mrf.mxu1 }
 0x14d   : > { %v6771_v49 = vpop.f32.mrf.mxu0 }
 0x14e   : > { %v1255_v51 = vadd.f32 %v6771_v49, %v7996_v61  ;;  %v8127_v62 = vadd.f32 %v1431_v50, %v1252_v43  ;;  %v6805_v1 = vpop.f32.mrf.mxu1  ;;  %v2770_v50 = vld [vmem:[#allocation2 + $0x112] sm:$0xff] }
 0x14f   : > { %v1140_v18 = vpop.f32.mrf.mxu0 }
 0x150   : > { %v8130_v2 = vadd.f32 %v1140_v18, %v7998_v5  ;;  %v8132_v58 = vadd.f32 %v6805_v1, %v1255_v51  ;;  %v8134_v38 = vpop.f32.mrf.mxu1  ;;  %v2771_v51 = vld [vmem:[#allocation2 + $0x122] sm:$0xff]  ;;  %v2772_v1 = vld [vmem:[#allocation2 + $0x12a] sm:$0xff] }
 0x151   : > { %v6774_v3 = vpop.f32.mrf.mxu0  ;;  %6977 = vmatmul.mubr.msk.bf16.gmra.mxu0 %vm313_vm1, %v7855_v8 }
 0x152   : > { %v1258_v54 = vadd.f32 %v6774_v3, %v8006_v14  ;;  %v6808_v11 = vpop.f32.mrf.mxu1  ;;  %6980 = vmatprep.mubr.msk.bf16.mxu0 %vm313_vm1, %v7857_v10 }
 0x153   : > { %v1153_v61 = vpop.f32.mrf.mxu0 }
 0x154   : > { %v1256_v5 = vadd.f32 %v1153_v61, %v8010_v19  ;;  %v8142_v26 = vadd.f32 %v6808_v11, %v1258_v54  ;;  %v1447_v29 = vpop.f32.mrf.mxu1  ;;  %v6232_v54 = vld [vmem:[%s10084_s4 + $0x2] sm:$0x3] }
 0x155   : > { %v6775_v30 = vpop.f32.mrf.mxu0  ;;  %7315 = vmatprep.subr.msk.bf16.mxu1 %vm609_vm0, %v6232_v54 }
 0x156   : > { %v1259_v25 = vadd.f32 %v6775_v30, %v8012_v48  ;;  %v8145_v34 = vadd.f32 %v1447_v29, %v1256_v5  ;;  %v6809_v8 = vpop.f32.mrf.mxu1  ;;  %v2769_v48 = vld [vmem:[#allocation2 + $0x10a] sm:$0xff]  ;;  %v2793_v5 = vpack.c.bf16 %v2772_v1, %v2771_v51 }
 0x157   : > { %v1156_v14 = vpop.f32.mrf.mxu0  ;;  %v2792_v11 = vpack.c.bf16 %v2770_v50, %v2769_v48  ;;  %v2776_v48 = vld [vmem:[#allocation2 + $0x15a] sm:$0xff] }
 0x158   : > { %v8148_v45 = vadd.f32 %v1156_v14, %v8014_v23  ;;  %v8150_v10 = vadd.f32 %v6809_v8, %v1259_v25  ;;  %v8152_v24 = vpop.f32.mrf.mxu1 }
 0x159   : > { %v6778_v57 = vpop.f32.mrf.mxu0  ;;  %6981 = vmatmul.mubr.msk.bf16.gmra.mxu0 %vm313_vm1, %v7867_v22 }
 0x15a   : > { %v1262_v19 = vadd.f32 %v6778_v57, %v8022_v28  ;;  %v6812_v43 = vpop.f32.mrf.mxu1  ;;  %6984 = vmatprep.mubr.msk.bf16.mxu0 %vm313_vm1, %v2791_v53  ;;  %v3354_v28 = vsel %vm609_vm0, %v6232_v54, 0  ;;  %v2774_v57 = vld [vmem:[#allocation2 + $0x142] sm:$0xff] }
 0x15b   : > { %v1169_v49 = vpop.f32.mrf.mxu0  ;;  %7001 = vmatpush3.bf16.msra.mxu1 %v3354_v28 }
 0x15c   : > { %v1260_v23 = vadd.f32 %v1169_v49, %v8026_v33  ;;  %v8159_v18 = vadd.f32 %v6812_v43, %v1262_v19  ;;  %v1463_v3 = vpop.f32.mrf.mxu1  ;;  %v2775_v43 = vld [vmem:[#allocation2 + $0x152] sm:$0xff] }
 0x15d   : > { %v6779_v22 = vpop.f32.mrf.mxu0  ;;  %v2795_v54 = vpack.c.bf16 %v2776_v48, %v2775_v43 }
 0x15e   : > { %v1263_v61 = vadd.f32 %v6779_v22, %v8028_v37  ;;  %v8167_v16 = vadd.f32 %v1463_v3, %v1260_v23  ;;  %v6813_v15 = vpop.f32.mrf.mxu1  ;;  %v2773_v37 = vld [vmem:[#allocation2 + $0x13a] sm:$0xff] }
 0x15f   : > { %v1172_v33 = vpop.f32.mrf.mxu0  ;;  %v2794_v1 = vpack.c.bf16 %v2774_v57, %v2773_v37 }
 0x160   : > { %v8170_v29 = vadd.f32 %v1172_v33, %v8030_v41  ;;  %v8172_v30 = vadd.f32 %v6813_v15, %v1263_v61  ;;  %v8174_v25 = vpop.f32.mrf.mxu1 }
 0x161   : > { %v6782_v8 = vpop.f32.mrf.mxu0  ;;  %6985 = vmatmul.mubr.msk.bf16.gmra.mxu0 %vm313_vm1, %v2792_v11 }
 0x162   : > { %v1266_v53 = vadd.f32 %v6782_v8, %v8038_v42  ;;  %v6816_v14 = vpop.f32.mrf.mxu1  ;;  %6988 = vmatprep.mubr.msk.bf16.mxu0 %vm313_vm1, %v2793_v5  ;;  %v2777_v5 = vld [vmem:[#allocation2 + $0x16a] sm:$0xff] }
 0x163   : > { %v1185_v19 = vpop.f32.mrf.mxu0 }
 0x164   : > { %v1264_v41 = vadd.f32 %v1185_v19, %v8042_v59  ;;  %v8180_v50 = vadd.f32 %v6816_v14, %v1266_v53  ;;  %v1479_v49 = vpop.f32.mrf.mxu1 }
 0x165   : > { %v6783_v51 = vpop.f32.mrf.mxu0 }
 0x166   : > { %v1267_v23 = vadd.f32 %v6783_v51, %v8044_v60  ;;  %v8183_v3 = vadd.f32 %v1479_v49, %v1264_v41  ;;  %v6817_v42 = vpop.f32.mrf.mxu1  ;;  %v2778_v60 = vld [vmem:[#allocation2 + $0x172] sm:$0xff] }
 0x167   : > { %v8185_v22 = vpop.f32.mrf.mxu0  ;;  %v2796_v57 = vpack.c.bf16 %v2778_v60, %v2777_v5 }
 0x168   : > { %v8187_v11 = vadd.f32 %v6817_v42, %v1267_v23  ;;  %v8189_v28 = vpop.f32.mrf.mxu1  ;;  %v2781_v23 = vld [vmem:[#allocation2 + $0x19a] sm:$0xff] }
 0x169   : > { %v6786_v61 = vpop.f32.mrf.mxu0  ;;  %6989 = vmatmul.mubr.msk.bf16.gmra.mxu0 %vm313_vm1, %v2794_v1 }
 0x16a   : > { %v1270_v59 = vadd.f32 %v6786_v61, %v8056_v0  ;;  %v6820_v15 = vpop.f32.mrf.mxu1  ;;  %6992 = vmatprep.mubr.msk.bf16.mxu0 %vm313_vm1, %v2795_v54 }
 0x16b   : > { %v1201_v33 = vpop.f32.mrf.mxu0 }
 0x16c   : > { %v1268_v8 = vadd.f32 %v1201_v33, %v8060_v17  ;;  %v8195_v53 = vadd.f32 %v6820_v15, %v1270_v59  ;;  %v1495_v14 = vpop.f32.mrf.mxu1 }
 0x16d   : > { %v6787_v37 = vpop.f32.mrf.mxu0 }
 0x16e   : > { %v1271_v19 = vadd.f32 %v6787_v37, %v8062_v36  ;;  %v8198_v43 = vadd.f32 %v1495_v14, %v1268_v8  ;;  %v6821_v48 = vpop.f32.mrf.mxu1  ;;  %v2782_v36 = vld [vmem:[#allocation2 + $0x1a2] sm:$0xff] }
 0x16f   : > { %v8200_v41 = vpop.f32.mrf.mxu0  ;;  %v2798_v5 = vpack.c.bf16 %v2782_v36, %v2781_v23 }
 0x170   : > { %v8202_v0 = vadd.f32 %v6821_v48, %v1271_v19  ;;  %v8204_v49 = vpop.f32.mrf.mxu1 }
 0x171   : > { %v6790_v51 = vpop.f32.mrf.mxu0  ;;  %6993 = vmatmul.mubr.msk.bf16.gmra.mxu0 %vm313_vm1, %v2796_v57 }
 0x172   : > { %v1274_v17 = vadd.f32 %v6790_v51, %v8074_v47  ;;  %v6824_v1 = vpop.f32.mrf.mxu1  ;;  %6996 = vmatprep.mubr.msk.bf16.mxu0 %vm313_vm1, %v7957_v21 }
 0x173   : > { %v1217_v42 = vpop.f32.mrf.mxu0 }
 0x174   : > { %v1272_v54 = vadd.f32 %v1217_v42, %v8078_v44  ;;  %v8211_v61 = vadd.f32 %v6824_v1, %v1274_v17  ;;  %v1511_v59 = vpop.f32.mrf.mxu1 }
 0x175   : > { %v6791_v15 = vpop.f32.mrf.mxu0 }
 0x176   : > { %v1275_v60 = vadd.f32 %v6791_v15, %v8080_v46  ;;  %v8214_v33 = vadd.f32 %v1511_v59, %v1272_v54  ;;  %v6825_v8 = vpop.f32.mrf.mxu1 }
 0x177   : > { %v8216_v47 = vpop.f32.mrf.mxu0 }
 0x178   : > { %v8218_v14 = vadd.f32 %v6825_v8, %v1275_v60  ;;  %v8220_v21 = vpop.f32.mrf.mxu1 }
 0x179   : > { %v6794_v37 = vpop.f32.mrf.mxu0  ;;  %6997 = vmatmul.mubr.msk.bf16.gmra.mxu0 %vm313_vm1, %v2798_v5 }
 0x17a   : > { %v1278_v44 = vadd.f32 %v6794_v37, %v8090_v20  ;;  %v6828_v57 = vpop.f32.mrf.mxu1 }
 0x17b   : > { %v1233_v19 = vpop.f32.mrf.mxu0 }
 0x17c   : > { %v1276_v48 = vadd.f32 %v1233_v19, %v8092_v55  ;;  %v8225_v51 = vadd.f32 %v6828_v57, %v1278_v44  ;;  %v1527_v46 = vpop.f32.mrf.mxu1 }
 0x17d   : > { %v6795_v17 = vpop.f32.mrf.mxu0 }
 0x17e   : > { %v1279_v1 = vadd.f32 %v6795_v17, %v8094_v4  ;;  %v8228_v23 = vadd.f32 %v1527_v46, %v1276_v48  ;;  %v6829_v36 = vpop.f32.mrf.mxu1 }
 0x17f   : > { %v8230_v42 = vpop.f32.mrf.mxu0 }
 0x180   : > { %v8232_v54 = vadd.f32 %v6829_v36, %v1279_v1  ;;  %v8234_v59 = vpop.f32.mrf.mxu1 }
 0x181   : > { %v6834_v20 = vpop.f32.mrf.mxu0 }
 0x182   : > { %v8237_v15 = vadd.f32 %v6834_v20, %v8106_v27  ;;  %v8239_v55 = vpop.f32.mrf.mxu1 }
 0x183   : > { %v1709_v5 = vpop.f32.mrf.mxu0 }
 0x184   : > { %v8242_v60 = vadd.f32 %v1709_v5, %v8109_v31  ;;  %v8244_v4 = vpop.f32.mrf.mxu1 }
 0x185   : > { %v6835_v8 = vpop.f32.mrf.mxu0 }
 0x186   : > { %v8247_v37 = vadd.f32 %v6835_v8, %v8114_v32  ;;  %v8249_v44 = vpop.f32.mrf.mxu1 }
 0x187   : > { %v8251_v57 = vpop.f32.mrf.mxu0 }
 0x188   : > { %v8253_v19 = vpop.f32.mrf.mxu1 }
 0x189   : > { %v6838_v27 = vpop.f32.mrf.mxu0 }
 0x18a   : > { %v8256_v48 = vadd.f32 %v6838_v27, %v8124_v56  ;;  %v8258_v46 = vpop.f32.mrf.mxu1 }
 0x18b   : > { %10091 = vst [vmem:[#allocation4_spill] sm:$0xff] %v8258_v46  ;;  %v1725_v31 = vpop.f32.mrf.mxu0 }
 0x18c   : > { %v8261_v17 = vadd.f32 %v1725_v31, %v8127_v62  ;;  %v8263_v1 = vpop.f32.mrf.mxu1 }
 0x18d   : > { %10093 = vst [vmem:[#allocation6_spill] sm:$0xff] %v8263_v1  ;;  %v6839_v32 = vpop.f32.mrf.mxu0 }
 0x18e   : > { %10092 = vst [vmem:[#allocation5_spill] sm:$0xff] %v8261_v17  ;;  %v8266_v36 = vadd.f32 %v6839_v32, %v8132_v58  ;;  %v8268_v20 = vpop.f32.mrf.mxu1 }
 0x18f   : > { %10095 = vst [vmem:[#allocation8_spill] sm:$0xff] %v8268_v20  ;;  %v8270_v5 = vpop.f32.mrf.mxu0 }
 0x190   : > { %10094 = vst [vmem:[#allocation7_spill] sm:$0xff] %v8266_v36  ;;  %v8272_v8 = vpop.f32.mrf.mxu1 }
 0x191   : > { %10096 = vst [vmem:[#allocation9_spill] sm:$0xff] %v8272_v8  ;;  %v6842_v56 = vpop.f32.mrf.mxu0 }
 0x192   : > { %v8275_v27 = vadd.f32 %v6842_v56, %v8142_v26  ;;  %v8277_v46 = vpop.f32.mrf.mxu1  ;;  %v3254_v26 = vld [vmem:[%s10084_s4] sm:$0x3] }
 0x193   : > { %10098 = vst [vmem:[#allocation11_spill] sm:$0xff] %v8277_v46  ;;  %v1741_v62 = vpop.f32.mrf.mxu0  ;;  %7316 = vmatprep.subr.msk.bf16.mxu0 %vm609_vm0, %v3254_v26 }
 0x194   : > { %10097 = vst [vmem:[#allocation10_spill] sm:$0xff] %v8275_v27  ;;  %v8280_v31 = vadd.f32 %v1741_v62, %v8145_v34  ;;  %v8282_v1 = vpop.f32.mrf.mxu1  ;;  %v3566_v34 = vsel %vm609_vm0, %v3254_v26, 0  ;;  %v3255_v62 = vld [vmem:[#allocation3 + $0x1] sm:$0xff] }
 0x195   : > { %10100 = vst [vmem:[#allocation13_spill] sm:$0xff] %v8282_v1  ;;  %v6843_v58 = vpop.f32.mrf.mxu0  ;;  %v3256_v1 = vld [vmem:[#allocation3 + $0x9] sm:$0xff]  ;;  %7035 = vmatpush3.bf16.msra.mxu0 %v3566_v34 }
 0x196   : > { %10099 = vst [vmem:[#allocation12_spill] sm:$0xff] %v8280_v31  ;;  %v8285_v32 = vadd.f32 %v6843_v58, %v8150_v10  ;;  %v8287_v20 = vpop.f32.mrf.mxu1  ;;  %v3206_v31 = vld [vmem:[#allocation3] sm:$0xff] }
 0x197   : > { %10102 = vst [vmem:[#allocation15_spill] sm:$0xff] %v8287_v20  ;;  %v8289_v36 = vpop.f32.mrf.mxu0  ;;  %v3287_v20 = vpack.c.bf16 %v3256_v1, %v3255_v62 }
 0x198   : > { %10101 = vst [vmem:[#allocation14_spill] sm:$0xff] %v8285_v32  ;;  %v8291_v8 = vpop.f32.mrf.mxu1 }
 0x199   : > { %10103 = vst [vmem:[#allocation16_spill] sm:$0xff] %v8291_v8  ;;  %v6846_v56 = vpop.f32.mrf.mxu0  ;;  %v3207_v8 = vld [vmem:[#allocation3 + $0x8] sm:$0xff]  ;;  %7002 = vmatprep.mubr.msk.bf16.mxu1 %vm313_vm1, %v3287_v20 }
 0x19a   : > { %v8299_v10 = vadd.f32 %v6846_v56, %v8159_v18  ;;  %v8301_v58 = vpop.f32.mrf.mxu1  ;;  %v3238_v46 = vpack.c.bf16 %v3207_v8, %v3206_v31 }
 0x19b   : > { %v1757_v32 = vpop.f32.mrf.mxu0 }
 0x19c   : > { %v8304_v27 = vadd.f32 %v1757_v32, %v8167_v16  ;;  %v8306_v17 = vpop.f32.mrf.mxu1  ;;  %7036 = vmatprep.mubr.msk.bf16.mxu0 %vm313_vm1, %v3238_v46 }
 0x19d   : > { %v6847_v26 = vpop.f32.mrf.mxu0 }
 0x19e   : > { %v8311_v18 = vadd.f32 %v6847_v26, %v8172_v30  ;;  %v8313_v56 = vpop.f32.mrf.mxu1 }
 0x19f   : > { %v8315_v34 = vpop.f32.mrf.mxu0 }
 0x1a0   : > { %v8317_v1 = vpop.f32.mrf.mxu1 }
 0x1a1   : > { %10104 = vst [vmem:[#allocation17_spill] sm:$0xff] %v8317_v1  ;;  %v6850_v8 = vpop.f32.mrf.mxu0  ;;  %v8337_v1 = vld [vmem:[%s10084_s4 + $0x4] sm:$0x3] }
 0x1a2   : > { %v8320_v16 = vadd.f32 %v6850_v8, %v8180_v50  ;;  %v8322_v31 = vpop.f32.mrf.mxu1  ;;  %10110 = vst [vmem:[#allocation23_spill] sm:$0xff] %v8337_v1  ;;  %7317 = vmatprep.subr.msk.bf16.mxu1 %vm609_vm0, %v8337_v1 }
 0x1a3   : > { %10105 = vst [vmem:[#allocation18_spill] sm:$0xff] %v8322_v31  ;;  %v1773_v32 = vpop.f32.mrf.mxu0 }
 0x1a4   : > { %v8325_v20 = vadd.f32 %v1773_v32, %v8183_v3  ;;  %v8327_v46 = vpop.f32.mrf.mxu1 }
 0x1a5   : > { %10107 = vst [vmem:[#allocation20_spill] sm:$0xff] %v8327_v46  ;;  %v6851_v30 = vpop.f32.mrf.mxu0 }
 0x1a6   : > { %10106 = vst [vmem:[#allocation19_spill] sm:$0xff] %v8325_v20  ;;  %v8330_v62 = vadd.f32 %v6851_v30, %v8187_v11  ;;  %v8332_v26 = vpop.f32.mrf.mxu1 }
 0x1a7   : > { %10109 = vst [vmem:[#allocation22_spill] sm:$0xff] %v8332_v26  ;;  %v8339_v50 = vpop.f32.mrf.mxu0 }
 0x1a8   : > { %10108 = vst [vmem:[#allocation21_spill] sm:$0xff] %v8330_v62  ;;  %v8343_v3 = vpop.f32.mrf.mxu1 }
 0x1a9   : > { %10111 = vst [vmem:[#allocation24_spill] sm:$0xff] %v8343_v3  ;;  %v6854_v8 = vpop.f32.mrf.mxu0 }
 0x1aa   : > { %v8346_v32 = vadd.f32 %v6854_v8, %v8195_v53  ;;  %v8348_v11 = vpop.f32.mrf.mxu1 }
 0x1ab   : > { %10112 = vst [vmem:[#allocation25_spill] sm:$0xff] %v8348_v11  ;;  %v1789_v30 = vpop.f32.mrf.mxu0 }
 0x1ac   : > { %v8351_v26 = vadd.f32 %v1789_v30, %v8198_v43  ;;  %v8353_v62 = vpop.f32.mrf.mxu1 }
 0x1ad   : > { %10113 = vst [vmem:[#allocation26_spill] sm:$0xff] %v8353_v62  ;;  %v6855_v46 = vpop.f32.mrf.mxu0 }
 0x1ae   : > { %v8356_v20 = vadd.f32 %v6855_v46, %v8202_v0  ;;  %v8358_v31 = vpop.f32.mrf.mxu1 }
 0x1af   : > { %10115 = vst [vmem:[#allocation28_spill] sm:$0xff] %v8358_v31  ;;  %v8360_v1 = vpop.f32.mrf.mxu0 }
 0x1b0   : > { %10114 = vst [vmem:[#allocation27_spill] sm:$0xff] %v8356_v20  ;;  %v8362_v3 = vpop.f32.mrf.mxu1 }
 0x1b1   : > { %10116 = vst [vmem:[#allocation29_spill] sm:$0xff] %v8362_v3  ;;  %v6858_v53 = vpop.f32.mrf.mxu0 }
 0x1b2   : > { %v8365_v8 = vadd.f32 %v6858_v53, %v8211_v61  ;;  %v8367_v11 = vpop.f32.mrf.mxu1 }
 0x1b3   : > { %10118 = vst [vmem:[#allocation31_spill] sm:$0xff] %v8367_v11  ;;  %v1805_v43 = vpop.f32.mrf.mxu0 }
 0x1b4   : > { %10117 = vst [vmem:[#allocation30_spill] sm:$0xff] %v8365_v8  ;;  %v8370_v30 = vadd.f32 %v1805_v43, %v8214_v33  ;;  %v8372_v62 = vpop.f32.mrf.mxu1 }
 0x1b5   : > { %10120 = vst [vmem:[#allocation33_spill] sm:$0xff] %v8372_v62  ;;  %v6859_v0 = vpop.f32.mrf.mxu0 }
 0x1b6   : > { %10119 = vst [vmem:[#allocation32_spill] sm:$0xff] %v8370_v30  ;;  %v8375_v46 = vadd.f32 %v6859_v0, %v8218_v14  ;;  %v8377_v31 = vpop.f32.mrf.mxu1 }
 0x1b7   : > { %10122 = vst [vmem:[#allocation35_spill] sm:$0xff] %v8377_v31  ;;  %v8379_v20 = vpop.f32.mrf.mxu0 }
 0x1b8   : > { %10121 = vst [vmem:[#allocation34_spill] sm:$0xff] %v8375_v46  ;;  %10123 = vst [vmem:[#allocation36_spill] sm:$0xff] %v8379_v20  ;;  %v8381_v3 = vpop.f32.mrf.mxu1 }
 0x1b9   : > { %10124 = vst [vmem:[#allocation37_spill] sm:$0xff] %v8381_v3  ;;  %v6862_v61 = vpop.f32.mrf.mxu0 }
 0x1ba   : > { %v8384_v53 = vadd.f32 %v6862_v61, %v8225_v51  ;;  %v8386_v11 = vpop.f32.mrf.mxu1 }
 0x1bb   : > { %10126 = vst [vmem:[#allocation39_spill] sm:$0xff] %v8386_v11  ;;  %v1821_v33 = vpop.f32.mrf.mxu0 }
 0x1bc   : > { %10125 = vst [vmem:[#allocation38_spill] sm:$0xff] %v8384_v53  ;;  %v8389_v43 = vadd.f32 %v1821_v33, %v8228_v23  ;;  %v8391_v62 = vpop.f32.mrf.mxu1 }
 0x1bd   : > { %10128 = vst [vmem:[#allocation41_spill] sm:$0xff] %v8391_v62  ;;  %v6863_v14 = vpop.f32.mrf.mxu0 }
 0x1be   : > { %10127 = vst [vmem:[#allocation40_spill] sm:$0xff] %v8389_v43  ;;  %v8394_v0 = vadd.f32 %v6863_v14, %v8232_v54  ;;  %v8396_v31 = vpop.f32.mrf.mxu1 }
 0x1bf   : > { %10130 = vst [vmem:[#allocation43_spill] sm:$0xff] %v8396_v31  ;;  %v8398_v46 = vpop.f32.mrf.mxu0 }
 0x1c0   : > { %10129 = vst [vmem:[#allocation42_spill] sm:$0xff] %v8394_v0  ;;  %10131 = vst [vmem:[#allocation44_spill] sm:$0xff] %v8398_v46  ;;  %v8400_v3 = vpop.f32.mrf.mxu1 }
 0x1c1   : > { %10132 = vst [vmem:[#allocation45_spill] sm:$0xff] %v8400_v3  ;;  %v8402_v51 = vpop.f32.mrf.mxu0 }
 0x1c2   : > { %v8404_v61 = vpop.f32.mrf.mxu1 }
 0x1c3   : > { %v8406_v11 = vpop.f32.mrf.mxu0 }
 0x1c4   : > { %v8408_v23 = vpop.f32.mrf.mxu1 }
 0x1c5   : > { %v8410_v33 = vpop.f32.mrf.mxu0 }
 0x1c6   : > { %v8412_v62 = vpop.f32.mrf.mxu1 }
 0x1c7   : > { %10133 = vst [vmem:[#allocation46_spill] sm:$0xff] %v8412_v62  ;;  %v8414_v54 = vpop.f32.mrf.mxu0 }
 0x1c8   : > { %v8418_v31 = vpop.f32.mrf.mxu1 }
 0x1c9   : > { %v8416_v14 = vpop.f32.mrf.mxu0  ;;  %10135 = vst [vmem:[#allocation48_spill] sm:$0xff] %v8418_v31  ;;  %v8441_v31 = vld [vmem:[%s10084_s4 + $0x6] sm:$0x3] }
 0x1ca   : > { %10134 = vst [vmem:[#allocation47_spill] sm:$0xff] %v8416_v14  ;;  %v8424_v46 = vpop.f32.mrf.mxu1  ;;  %10145 = vst [vmem:[#allocation58_spill] sm:$0xff] %v8441_v31  ;;  %7318 = vmatprep.subr.msk.bf16.mxu0 %vm609_vm0, %v8441_v31 }
 0x1cb   : > { %v8420_v0 = vpop.f32.mrf.mxu0  ;;  %10138 = vst [vmem:[#allocation51_spill] sm:$0xff] %v8424_v46 }
 0x1cc   : > { %10136 = vst [vmem:[#allocation49_spill] sm:$0xff] %v8420_v0  ;;  %v8430_v30 = vpop.f32.mrf.mxu1 }
 0x1cd   : > { %v8422_v3 = vpop.f32.mrf.mxu0  ;;  %10141 = vst [vmem:[#allocation54_spill] sm:$0xff] %v8430_v30 }
 0x1ce   : > { %10137 = vst [vmem:[#allocation50_spill] sm:$0xff] %v8422_v3  ;;  %v8436_v20 = vpop.f32.mrf.mxu1 }
 0x1cf   : > { %v8426_v43 = vpop.f32.mrf.mxu0  ;;  %10144 = vst [vmem:[#allocation57_spill] sm:$0xff] %v8436_v20 }
 0x1d0   : > { %10139 = vst [vmem:[#allocation52_spill] sm:$0xff] %v8426_v43 }
 0x1d1   : > { %v8428_v53 = vpop.f32.mrf.mxu0 }
 0x1d2   : > { %10140 = vst [vmem:[#allocation53_spill] sm:$0xff] %v8428_v53  ;;  %v8449_v53 = vpop.f32.mrf.mxu1 }
 0x1d3   : > { %v8432_v8 = vpop.f32.mrf.mxu0  ;;  %10148 = vst [vmem:[#allocation61_spill] sm:$0xff] %v8449_v53 }
 0x1d4   : > { %10142 = vst [vmem:[#allocation55_spill] sm:$0xff] %v8432_v8 }
 0x1d5   : > { %v8434_v62 = vpop.f32.mrf.mxu0 }
 0x1d6   : > { %10143 = vst [vmem:[#allocation56_spill] sm:$0xff] %v8434_v62  ;;  %v8455_v62 = vpop.f32.mrf.mxu1 }
 0x1d7   : > { %v8443_v3 = vpop.f32.mrf.mxu0  ;;  %10151 = vst [vmem:[#allocation64_spill] sm:$0xff] %v8455_v62 }
 0x1d8   : > { %10146 = vst [vmem:[#allocation59_spill] sm:$0xff] %v8443_v3  ;;  %v8461_v0 = vpop.f32.mrf.mxu1 }
 0x1d9   : > { %v8447_v43 = vpop.f32.mrf.mxu0  ;;  %10154 = vst [vmem:[#allocation67_spill] sm:$0xff] %v8461_v0 }
 0x1da   : > { %10147 = vst [vmem:[#allocation60_spill] sm:$0xff] %v8447_v43  ;;  %v8467_v31 = vpop.f32.mrf.mxu1 }
 0x1db   : > { %v8451_v30 = vpop.f32.mrf.mxu0 }
 0x1dc   : > { %10149 = vst [vmem:[#allocation62_spill] sm:$0xff] %v8451_v30  ;;  %v8473_v30 = vpop.f32.mrf.mxu1 }
 0x1dd   : > { %v8453_v8 = vpop.f32.mrf.mxu0 }
 0x1de   : > { %10150 = vst [vmem:[#allocation63_spill] sm:$0xff] %v8453_v8 }
 0x1df   : > { %v8457_v20 = vpop.f32.mrf.mxu0 }
 0x1e0   : > { %10152 = vst [vmem:[#allocation65_spill] sm:$0xff] %v8457_v20  ;;  %v8479_v20 = vpop.f32.mrf.mxu1 }
 0x1e1   : > { %v8459_v46 = vpop.f32.mrf.mxu0 }
 0x1e2   : > { %10153 = vst [vmem:[#allocation66_spill] sm:$0xff] %v8459_v46 }
 0x1e3   : > { %v8463_v3 = vpop.f32.mrf.mxu0 }
 0x1e4   : > { %10155 = vst [vmem:[#allocation68_spill] sm:$0xff] %v8463_v3  ;;  %v8485_v3 = vpop.f32.mrf.mxu1 }
 0x1e5   : > { %v8465_v14 = vpop.f32.mrf.mxu0  ;;  %10163 = vst [vmem:[#allocation76_spill] sm:$0xff] %v8485_v3 }
 0x1e6   : > { %10156 = vst [vmem:[#allocation69_spill] sm:$0xff] %v8465_v14  ;;  %v927_v14 = vadd.f32 %v8048_v13, %v8046_v63 }
 0x1e7   : > { %v8469_v43 = vpop.f32.mrf.mxu0 }
 0x1e8   : > { %10157 = vst [vmem:[#allocation70_spill] sm:$0xff] %v8469_v43 }
 0x1e9   : > { %v8471_v53 = vpop.f32.mrf.mxu0 }
 0x1ea   : > { %10158 = vst [vmem:[#allocation71_spill] sm:$0xff] %v8471_v53  ;;  %v943_v53 = vadd.f32 %v8066_v35, %v8064_v12  ;;  %v1547_v12 = vadd.f32 %v8134_v38, %v8130_v2 }
 0x1eb   : > { %v8475_v8 = vpop.f32.mrf.mxu0 }
 0x1ec   : > { %10159 = vst [vmem:[#allocation72_spill] sm:$0xff] %v8475_v8  ;;  %v959_v8 = vadd.f32 %v8084_v39, %v8082_v6  ;;  %v1269_v63 = vadd.f32 %v8200_v41, %v943_v53  ;;  %v2132_v41 = vadd.f32 %v8239_v55, %v8237_v15  ;;  %v10166_v15 = vld [vmem:[#allocation5_spill] sm:$0xff]  ;;  %v10167_v55 = vld [vmem:[#allocation6_spill] sm:$0xff] }
 0x1ed   : > { %v8477_v62 = vpop.f32.mrf.mxu0 }
 0x1ee   : > { %10160 = vst [vmem:[#allocation73_spill] sm:$0xff] %v8477_v62  ;;  %v975_v62 = vadd.f32 %v8098_v7, %v8096_v9  ;;  %v1273_v13 = vadd.f32 %v8216_v47, %v959_v8  ;;  %v1551_v9 = vadd.f32 %v8152_v24, %v8148_v45  ;;  %v1555_v7 = vadd.f32 %v8174_v25, %v8170_v29 }
 0x1ef   : > { %v8481_v46 = vpop.f32.mrf.mxu0  ;;  %v1563_v2 = vadd.f32 %v8204_v49, %v1269_v63  ;;  %v2130_v24 = vadd.f32 %v8244_v4, %v8242_v60  ;;  %v2133_v29 = vadd.f32 %v8249_v44, %v8247_v37  ;;  %v10165_v49 = vld [vmem:[#allocation4_spill] sm:$0xff]  ;;  %v10170_v4 = vld [vmem:[#allocation9_spill] sm:$0xff]  ;;  %v10171_v37 = vld [vmem:[#allocation10_spill] sm:$0xff] }
 0x1f0   : > { %10161 = vst [vmem:[#allocation74_spill] sm:$0xff] %v8481_v46  ;;  %v1543_v46 = vadd.f32 %v8116_v40, %v8112_v52  ;;  %v1277_v35 = vadd.f32 %v8230_v42, %v975_v62  ;;  %v1841_v40 = vadd.f32 %v8270_v5, %v1547_v12  ;;  %v1567_v38 = vadd.f32 %v8220_v21, %v1273_v13  ;;  %v10168_v5 = vld [vmem:[#allocation7_spill] sm:$0xff]  ;;  %v10169_v62 = vld [vmem:[#allocation8_spill] sm:$0xff] }
 0x1f1   : > { %v8483_v0 = vpop.f32.mrf.mxu0  ;;  %v1845_v47 = vadd.f32 %v8289_v36, %v1551_v9  ;;  %v2136_v21 = vadd.f32 %v10165_v49, %v8256_v48  ;;  %v1849_v36 = vadd.f32 %v8315_v34, %v1555_v7  ;;  %v2137_v60 = vadd.f32 %v10169_v62, %v10168_v5  ;;  %v10172_v44 = vld [vmem:[#allocation11_spill] sm:$0xff]  ;;  %v10173_v48 = vld [vmem:[#allocation12_spill] sm:$0xff]  ;;  %v10175_v34 = vld [vmem:[#allocation14_spill] sm:$0xff] }
 0x1f2   : > { %10162 = vst [vmem:[#allocation75_spill] sm:$0xff] %v8483_v0  ;;  %v1265_v0 = vadd.f32 %v8185_v22, %v927_v14  ;;  %v1837_v6 = vadd.f32 %v8251_v57, %v1543_v46  ;;  %v8528_v45 = vadd.f32 %v8234_v59, %v1277_v35  ;;  %v2134_v57 = vadd.f32 %v10167_v55, %v10166_v15  ;;  %v10176_v63 = vld [vmem:[#allocation15_spill] sm:$0xff]  ;;  %v10177_v13 = vld [vmem:[#allocation16_spill] sm:$0xff] }
 0x1f3   : > { %v8489_v43 = vpop.f32.mrf.mxu0  ;;  %v2427_v59 = vadd.f32 %v8402_v51, %v2132_v41  ;;  %v2135_v8 = vadd.f32 %v10170_v4, %v1841_v40  ;;  %v8559_v51 = vadd.f32 %v10176_v63, %v10175_v34  ;;  %v8562_v12 = vadd.f32 %v10177_v13, %v1845_v47  ;;  %v10179_v41 = vld [vmem:[#allocation17_spill] sm:$0xff]  ;;  %v10180_v47 = vld [vmem:[#allocation18_spill] sm:$0xff] }
 0x1f4   : > { %10164 = vst [vmem:[#allocation77_spill] sm:$0xff] %v8489_v43  ;;  %v8504_v43 = vpop.f32.mrf.mxu1  ;;  %v1559_v52 = vadd.f32 %v8189_v28, %v1265_v0  ;;  %v2131_v25 = vadd.f32 %v8253_v19, %v1837_v6  ;;  %v8548_v19 = vadd.f32 %v10172_v44, %v10171_v37  ;;  %v10174_v0 = vld [vmem:[#allocation13_spill] sm:$0xff]  ;;  %v2425_v35 = vadd.f32 %v8406_v11, %v2130_v24  ;;  %v10188_v37 = vld [vmem:[#allocation26_spill] sm:$0xff] }
 0x1f5   : > { %v8500_v3 = vpop.f32.mrf.mxu0  ;;  %v8555_v14 = vadd.f32 %v10174_v0, %v10173_v48  ;;  %v8573_v9 = vadd.f32 %v8306_v17, %v8304_v27  ;;  %v8577_v7 = vadd.f32 %v8313_v56, %v8311_v18  ;;  %v8583_v11 = vadd.f32 %v10179_v41, %v1849_v36  ;;  %v10181_v27 = vld [vmem:[#allocation19_spill] sm:$0xff]  ;;  %v10183_v18 = vld [vmem:[#allocation21_spill] sm:$0xff]  ;;  %v10184_v56 = vld [vmem:[#allocation22_spill] sm:$0xff] }
 0x1f6   : > { %v8525_v42 = vpop.f32.mrf.mxu1  ;;  %v1853_v46 = vadd.f32 %v8339_v50, %v1559_v52  ;;  %v8569_v50 = vadd.f32 %v8301_v58, %v8299_v10  ;;  %v1857_v52 = vadd.f32 %v8360_v1, %v1563_v2  ;;  %v8587_v24 = vadd.f32 %v10180_v47, %v8320_v16  ;;  %v10182_v58 = vld [vmem:[#allocation20_spill] sm:$0xff]  ;;  %v10191_v34 = vld [vmem:[#allocation29_spill] sm:$0xff] }
 0x1f7   : > { %v8510_v39 = vpop.f32.mrf.mxu0  ;;  %v2721_v10 = vadd.f32 %v8404_v61, %v2427_v59  ;;  %v2428_v17 = vadd.f32 %v8410_v33, %v2133_v29  ;;  %v8593_v49 = vadd.f32 %v10182_v58, %v10181_v27  ;;  %v8597_v1 = vadd.f32 %v10184_v56, %v10183_v18  ;;  %v10185_v2 = vld [vmem:[#allocation24_spill] sm:$0xff]  ;;  %v10186_v61 = vld [vmem:[#allocation23_spill] sm:$0xff]  ;;  %v10187_v29 = vld [vmem:[#allocation25_spill] sm:$0xff] }
 0x1f8   : > { %v8565_v6 = vpop.f32.mrf.mxu1  ;;  %v8600_v15 = vadd.f32 %v10185_v2, %v1853_v46  ;;  %v8605_v16 = vld [vmem:[%s10082_s2] ss:$0 sm:$0xff]  ;;  %v8609_v33 = vsel %vm609_vm0, %v10186_v61, 0  ;;  %v8613_v36 = vadd.f32 %v10187_v29, %v8346_v32  ;;  %v2719_v59 = vadd.f32 %v8408_v23, %v2425_v35  ;;  %v10189_v46 = vld [vmem:[#allocation27_spill] sm:$0xff]  ;;  %v10201_v29 = vld [vmem:[#allocation49_spill] sm:$0xff] }
 0x1f9   : > { %v8518_v22 = vpop.f32.mrf.mxu0  ;;  %v2426_v5 = vadd.f32 %v8414_v54, %v2131_v25  ;;  %v8621_v44 = vadd.f32 %v10188_v37, %v8351_v26  ;;  %v10190_v48 = vld [vmem:[#allocation28_spill] sm:$0xff]  ;;  %v8628_v63 = vadd.f32 %v10191_v34, %v1857_v52  ;;  %v10193_v25 = vld [vmem:[#allocation30_spill] sm:$0xff]  ;;  %v10194_v35 = vld [vmem:[#allocation31_spill] sm:$0xff]  ;;  %v2429_v37 = vadd.f32 %v10201_v29, %v2134_v57 }
 0x1fa   : > { %v8617_v62 = vpop.f32.mrf.mxu1  ;;  %v8625_v0 = vadd.f32 %v10190_v48, %v10189_v46  ;;  %v10192_v32 = vld [vmem:[#allocation36_spill] sm:$0xff]  ;;  %v8638_v41 = vadd.f32 %v10194_v35, %v10193_v25  ;;  %v10195_v26 = vld [vmem:[#allocation46_spill] sm:$0xff]  ;;  %v10197_v52 = vld [vmem:[#allocation33_spill] sm:$0xff] }
 0x1fb   : > { %v8535_v28 = vpop.f32.mrf.mxu0  ;;  %v1861_v13 = vadd.f32 %v10192_v32, %v1567_v38  ;;  %v8634_v23 = vld [vmem:[%s10083_s3] ss:$0 sm:$0xff]  ;;  %v2722_v47 = vadd.f32 %v10195_v26, %v2428_v17  ;;  %v10198_v38 = vld [vmem:[#allocation34_spill] sm:$0xff]  ;;  %v10199_v56 = vld [vmem:[#allocation35_spill] sm:$0xff] }
 0x1fc   : > { %v10196_v58 = vld [vmem:[#allocation32_spill] sm:$0xff]  ;;  %v8648_v2 = vadd.f32 %v10199_v56, %v10198_v38  ;;  %v8653_v32 = vpop.f32.mrf.mxu1  ;;  %v10204_v35 = vld [vmem:[#allocation38_spill] sm:$0xff]  ;;  %v10205_v26 = vld [vmem:[#allocation39_spill] sm:$0xff] }
 0x1fd   : > { %v8551_v53 = vpop.f32.mrf.mxu0  ;;  %v8644_v18 = vadd.f32 %v10197_v52, %v10196_v58  ;;  %v10202_v48 = vld [vmem:[#allocation48_spill] sm:$0xff]  ;;  %v8662_v58 = vadd.f32 %v10205_v26, %v10204_v35  ;;  %v10207_v52 = vld [vmem:[#allocation41_spill] sm:$0xff]  ;;  %v10208_v38 = vld [vmem:[#allocation50_spill] sm:$0xff] }
 0x1fe   : > { %v2720_v34 = vadd.f32 %v10202_v48, %v2426_v5  ;;  %v2432_v5 = vadd.f32 %v10208_v38, %v2137_v60  ;;  %v10212_v26 = vld [vmem:[#allocation52_spill] sm:$0xff] }
 0x1ff   : > { %v8580_v40 = vpop.f32.mrf.mxu0 }
 0x200   : > { %10178 = vst [vmem:[#allocation4_spill] sm:$0xff] %v8580_v40  ;;  %v8678_v40 = vpop.f32.mrf.mxu1 }
 0x201   : > { %v6970_v55 = vpop.f32.mrf.mxu0 }
 0x202   : > { %v3015_v4 = vadd.f32 %v6970_v55, %v2721_v10  ;;  %v10200_v55 = vld [vmem:[#allocation47_spill] sm:$0xff] }
 0x203   : > { %v2886_v54 = vpop.f32.mrf.mxu0  ;;  %v2431_v61 = vadd.f32 %v10200_v55, %v2136_v21  ;;  %v10206_v21 = vld [vmem:[#allocation40_spill] sm:$0xff] }
 0x204   : > { %v3047_v10 = vmul.f32 %v8605_v16, %v3015_v4  ;;  %v3013_v27 = vadd.f32 %v2886_v54, %v2719_v59  ;;  %v10203_v54 = vld [vmem:[#allocation37_spill] sm:$0xff]  ;;  %v8666_v57 = vadd.f32 %v10207_v52, %v10206_v21  ;;  %v2430_v21 = vadd.f32 %v10212_v26, %v2135_v8  ;;  %v10217_v26 = vld [vmem:[#allocation43_spill] sm:$0xff] }
 0x205   : > { %v6971_v46 = vpop.f32.mrf.mxu0  ;;  %v8658_v25 = vadd.f32 %v10203_v54, %v1861_v13  ;;  %v10209_v13 = vld [vmem:[#allocation44_spill] sm:$0xff]  ;;  %v10211_v54 = vld [vmem:[#allocation54_spill] sm:$0xff] }
 0x206   : > { %v3079_v17 = vadd.f32 %v8634_v23, %v3047_v10  ;;  %v3045_v59 = vmul.f32 %v8605_v16, %v3013_v27  ;;  %v3016_v4 = vadd.f32 %v6971_v46, %v2722_v47  ;;  %v8673_v29 = vadd.f32 %v10209_v13, %v8528_v45  ;;  %v10210_v46 = vld [vmem:[#allocation51_spill] sm:$0xff]  ;;  %v10214_v45 = vld [vmem:[#allocation53_spill] sm:$0xff] }
 0x207   : > { %v2889_v56 = vpop.f32.mrf.mxu0  ;;  %v2725_v48 = vadd.f32 %v10210_v46, %v2431_v61  ;;  %v2723_v35 = vadd.f32 %v10211_v54, %v2429_v37  ;;  %v10215_v61 = vld [vmem:[#allocation55_spill] sm:$0xff] }
 0x208   : > { %v3111_v55 = vmax.f32 %v3079_v17, 0.0  ;;  %v3077_v10 = vadd.f32 %v8634_v23, %v3045_v59  ;;  %v3048_v27 = vmul.f32 %v8605_v16, %v3016_v4  ;;  %v3014_v47 = vadd.f32 %v2889_v56, %v2720_v34  ;;  %v10213_v34 = vld [vmem:[#allocation57_spill] sm:$0xff] }
 0x209   : > { %v6974_v52 = vpop.f32.mrf.mxu0  ;;  %v2726_v38 = vadd.f32 %v10213_v34, %v2432_v5  ;;  %v2435_v56 = vadd.f32 %v10214_v45, %v8548_v19  ;;  %v2433_v13 = vadd.f32 %v10215_v61, %v8555_v14  ;;  %v10218_v5 = vld [vmem:[#allocation61_spill] sm:$0xff]  ;;  %v10219_v19 = vld [vmem:[#allocation56_spill] sm:$0xff] }
 0x20a   : > { %v3143_v60 = vmin.f32 %v3111_v55, 20.0  ;;  %v3109_v17 = vmax.f32 %v3077_v10, 0.0  ;;  %v3080_v59 = vadd.f32 %v8634_v23, %v3048_v27  ;;  %v3046_v4 = vmul.f32 %v8605_v16, %v3014_v47  ;;  %v10216_v27 = vld [vmem:[#allocation42_spill] sm:$0xff] }
 0x20b   : > { %v3019_v37 = vadd.f32 %v6974_v52, %v2725_v48  ;;  %v2902_v46 = vpop.f32.mrf.mxu0  ;;  %v8691_v47 = vadd.f32 %v10217_v26, %v10216_v27  ;;  %v2724_v34 = vadd.f32 %v10218_v5, %v2430_v21  ;;  %v2436_v45 = vadd.f32 %v10219_v19, %v8559_v51  ;;  %v8697_v52 = vpop.f32.mrf.mxu1  ;;  %v10222_v51 = vld [vmem:[#allocation58_spill] sm:$0xff] }
 0x20c   : > { %3176 = vst.msk [vmem:[#allocation3 + $0x31] sm:$0xff] %vm313_vm1, %v3143_v60  ;;  %v3141_v8 = vmin.f32 %v3109_v17, 20.0  ;;  %v3112_v54 = vmax.f32 %v3080_v59, 0.0  ;;  %v3078_v55 = vadd.f32 %v8634_v23, %v3046_v4  ;;  %v3017_v10 = vadd.f32 %v2902_v46, %v2723_v35  ;;  %v10220_v4 = vld [vmem:[#allocation64_spill] sm:$0xff]  ;;  %v10221_v46 = vld [vmem:[#allocation67_spill] sm:$0xff] }
 0x20d   : > { %v3051_v14 = vmul.f32 %v8605_v16, %v3019_v37  ;;  %v6975_v48 = vpop.f32.mrf.mxu0  ;;  %v2729_v61 = vadd.f32 %v10220_v4, %v2435_v56  ;;  %v2727_v27 = vadd.f32 %v10221_v46, %v2433_v13  ;;  %v8706_v37 = vsel %vm609_vm0, %v10222_v51, 0  ;;  %v8716_v4 = vpop.f32.mrf.mxu1 }
 0x20e   : > { %3174 = vst.msk [vmem:[#allocation3 + $0x19] sm:$0xff] %vm313_vm1, %v3141_v8  ;;  %v3144_v60 = vmin.f32 %v3112_v54, 20.0  ;;  %v3110_v17 = vmax.f32 %v3078_v55, 0.0  ;;  %v3049_v35 = vmul.f32 %v8605_v16, %v3017_v10  ;;  %v3020_v59 = vadd.f32 %v6975_v48, %v2726_v38  ;;  %v10223_v38 = vld [vmem:[#allocation59_spill] sm:$0xff]  ;;  %v10224_v10 = vld [vmem:[#allocation60_spill] sm:$0xff] }
 0x20f   : > { %v3083_v21 = vadd.f32 %v8634_v23, %v3051_v14  ;;  %v2905_v26 = vpop.f32.mrf.mxu0  ;;  %v2434_v56 = vadd.f32 %v10223_v38, %v8562_v12  ;;  %v2730_v13 = vadd.f32 %v8467_v31, %v2436_v45  ;;  %v2439_v19 = vadd.f32 %v10224_v10, %v8569_v50  ;;  %v10226_v31 = vld [vmem:[#allocation63_spill] sm:$0xff]  ;;  %v10227_v50 = vld [vmem:[#allocation65_spill] sm:$0xff] }
 0x210   : > { %3177 = vst.msk [vmem:[#allocation3 + $0x39] sm:$0xff] %vm313_vm1, %v3144_v60  ;;  %v3142_v5 = vmin.f32 %v3110_v17, 20.0  ;;  %v3081_v8 = vadd.f32 %v8634_v23, %v3049_v35  ;;  %v3052_v54 = vmul.f32 %v8605_v16, %v3020_v59  ;;  %v3018_v55 = vadd.f32 %v2905_v26, %v2724_v34  ;;  %v10225_v59 = vld [vmem:[#allocation62_spill] sm:$0xff] }
 0x211   : > { %v3115_v14 = vmax.f32 %v3083_v21, 0.0  ;;  %v6978_v48 = vpop.f32.mrf.mxu0  ;;  %v2437_v12 = vadd.f32 %v10225_v59, %v8573_v9  ;;  %v2440_v45 = vadd.f32 %v10226_v31, %v8577_v7  ;;  %v2438_v46 = vadd.f32 %v10227_v50, %v8583_v11  ;;  %v10228_v9 = vld [vmem:[#allocation66_spill] sm:$0xff]  ;;  %v8734_v11 = vpop.f32.mrf.mxu1 }
 0x212   : > { %3175 = vst.msk [vmem:[#allocation3 + $0x21] sm:$0xff] %vm313_vm1, %v3142_v5  ;;  %v3113_v60 = vmax.f32 %v3081_v8, 0.0  ;;  %v3084_v17 = vadd.f32 %v8634_v23, %v3052_v54  ;;  %v3050_v35 = vmul.f32 %v8605_v16, %v3018_v55  ;;  %v3023_v34 = vadd.f32 %v6978_v48, %v2729_v61 }
 0x213   : > { %v3147_v21 = vmin.f32 %v3115_v14, 20.0  ;;  %v2918_v26 = vpop.f32.mrf.mxu0  ;;  %v2728_v54 = vadd.f32 %v8473_v30, %v2434_v56  ;;  %v2733_v61 = vadd.f32 %v8479_v20, %v2439_v19  ;;  %v2443_v55 = vadd.f32 %v10228_v9, %v8587_v24 }
 0x214   : > { %v3145_v51 = vmin.f32 %v3113_v60, 20.0  ;;  %v3116_v38 = vmax.f32 %v3084_v17, 0.0  ;;  %v3082_v5 = vadd.f32 %v8634_v23, %v3050_v35  ;;  %v3055_v8 = vmul.f32 %v8605_v16, %v3023_v34  ;;  %v10229_v35 = vld [vmem:[#allocation76_spill] sm:$0xff] }
 0x215   : > { %3180 = vst.msk [vmem:[#allocation3 + $0x61] sm:$0xff] %vm313_vm1, %v3147_v21  ;;  %v3021_v7 = vadd.f32 %v2918_v26, %v2727_v27  ;;  %v6979_v10 = vpop.f32.mrf.mxu0  ;;  %v2731_v30 = vadd.f32 %v10229_v35, %v2437_v12  ;;  %v2734_v20 = vadd.f32 %v8504_v43, %v2440_v45  ;;  %v8741_v56 = vadd.f32 %v8525_v42, %v2438_v46  ;;  %v10231_v43 = vld [vmem:[#allocation69_spill] sm:$0xff] }
 0x216   : > { %3178 = vst.msk [vmem:[#allocation3 + $0x49] sm:$0xff] %vm313_vm1, %v3145_v51  ;;  %v3148_v14 = vmin.f32 %v3116_v38, 20.0  ;;  %v3114_v48 = vmax.f32 %v3082_v5, 0.0  ;;  %v3087_v60 = vadd.f32 %v8634_v23, %v3055_v8  ;;  %v3024_v17 = vadd.f32 %v6979_v10, %v2730_v13  ;;  %v10230_v13 = vld [vmem:[#allocation68_spill] sm:$0xff]  ;;  %v8754_v5 = vpop.f32.mrf.mxu1  ;;  %v3257_v9 = vld [vmem:[#allocation3 + $0x19] sm:$0xff] }
 0x217   : > { %v3053_v24 = vmul.f32 %v8605_v16, %v3021_v7  ;;  %v2921_v27 = vpop.f32.mrf.mxu0  ;;  %v3260_v50 = vld [vmem:[#allocation3 + $0x39] sm:$0xff]  ;;  %v2441_v21 = vadd.f32 %v10230_v13, %v8593_v49  ;;  %v8749_v12 = vadd.f32 %v8565_v6, %v2443_v55  ;;  %v2444_v42 = vadd.f32 %v10231_v43, %v8597_v1  ;;  %v3259_v38 = vld [vmem:[#allocation3 + $0x31] sm:$0xff] }
 0x218   : > { %3181 = vst.msk [vmem:[#allocation3 + $0x69] sm:$0xff] %vm313_vm1, %v3148_v14  ;;  %v3146_v19 = vmin.f32 %v3114_v48, 20.0  ;;  %v3119_v34 = vmax.f32 %v3087_v60, 0.0  ;;  %v3056_v59 = vmul.f32 %v8605_v16, %v3024_v17  ;;  %v3022_v31 = vadd.f32 %v2921_v27, %v2728_v54  ;;  %v3208_v55 = vld [vmem:[#allocation3 + $0x18] sm:$0xff] }
 0x219   : > { %v3085_v45 = vadd.f32 %v8634_v23, %v3053_v24  ;;  %v6982_v46 = vpop.f32.mrf.mxu0  ;;  %v3258_v26 = vld [vmem:[#allocation3 + $0x21] sm:$0xff]  ;;  %v3211_v7 = vld [vmem:[#allocation3 + $0x38] sm:$0xff]  ;;  %v8763_v60 = vpack.c.bf16 %v3260_v50, %v3259_v38 }
 0x21a   : > { %v3209_v51 = vld [vmem:[#allocation3 + $0x20] sm:$0xff]  ;;  %3179 = vst.msk [vmem:[#allocation3 + $0x51] sm:$0xff] %vm313_vm1, %v3146_v19  ;;  %v3151_v8 = vmin.f32 %v3119_v34, 20.0  ;;  %v3088_v54 = vadd.f32 %v8634_v23, %v3056_v59  ;;  %v3054_v49 = vmul.f32 %v8605_v16, %v3022_v31  ;;  %v3027_v6 = vadd.f32 %v6982_v46, %v2733_v61  ;;  %v3210_v61 = vld [vmem:[#allocation3 + $0x30] sm:$0xff] }
 0x21b   : > { %v3117_v1 = vmax.f32 %v3085_v45, 0.0  ;;  %v2934_v10 = vpop.f32.mrf.mxu0  ;;  %v8759_v14 = vpack.c.bf16 %v3258_v26, %v3257_v9  ;;  %v8761_v48 = vpack.c.bf16 %v3209_v51, %v3208_v55  ;;  %v2735_v19 = vadd.f32 %v8617_v62, %v2441_v21  ;;  %v10232_v34 = vld [vmem:[#allocation70_spill] sm:$0xff]  ;;  %v8785_v62 = vld [vmem:[%s10084_s4 + $0xa] sm:$0x3]  ;;  %v10233_v51 = vld [vmem:[#allocation71_spill] sm:$0xff] }
 0x21c   : > { %3184 = vst.msk [vmem:[#allocation3 + $0x91] sm:$0xff] %vm313_vm1, %v3151_v8  ;;  %v3120_v17 = vmax.f32 %v3088_v54, 0.0  ;;  %v3086_v35 = vadd.f32 %v8634_v23, %v3054_v49  ;;  %v3059_v24 = vmul.f32 %v8605_v16, %v3027_v6  ;;  %v3025_v27 = vadd.f32 %v2934_v10, %v2731_v30  ;;  %v8780_v30 = vld [vmem:[%s10084_s4 + $0x8] sm:$0x3] }
 0x21d   : > { %v2442_v59 = vadd.f32 %v10232_v34, %v8600_v15  ;;  %v3149_v31 = vmin.f32 %v3117_v1, 20.0  ;;  %7003 = vmatmul.mubr.msk.bf16.vlgmr.msra.gmra.mxu1 %vm313_vm1, %v8759_v14  ;;  %7037 = vmatmul.mubr.msk.bf16.vlgmr.msra.gmra.mxu0 %vm313_vm1, %v8761_v48  ;;  %v6983_v50 = vpop.f32.mrf.mxu0  ;;  %v8775_v13 = vpack.c.bf16 %v3211_v7, %v3210_v61  ;;  %v8787_v15 = vpop.f32.mrf.mxu1  ;;  %v2738_v26 = vadd.f32 %v8653_v32, %v2444_v42  ;;  %v3263_v42 = vld [vmem:[#allocation3 + $0x61] sm:$0xff] }
 0x21e   : > { %v3152_v21 = vmin.f32 %v3120_v17, 20.0  ;;  %v3118_v43 = vmax.f32 %v3086_v35, 0.0  ;;  %v3091_v45 = vadd.f32 %v8634_v23, %v3059_v24  ;;  %v3057_v46 = vmul.f32 %v8605_v16, %v3025_v27  ;;  %7069 = vmatpush3.bf16.msra.mxu1 %v8609_v33  ;;  %7006 = vmatprep.mubr.msk.bf16.mxu1 %vm313_vm1, %v8763_v60 }
 0x21f   : > { %v2447_v38 = vadd.f32 %v10233_v51, %v8613_v36  ;;  %3182 = vst.msk [vmem:[#allocation3 + $0x79] sm:$0xff] %vm313_vm1, %v3149_v31  ;;  %v3028_v8 = vadd.f32 %v6983_v50, %v2734_v20  ;;  %7040 = vmatprep.mubr.msk.bf16.mxu0 %vm313_vm1, %v8775_v13  ;;  %v2937_v54 = vpop.f32.mrf.mxu0  ;;  %v3264_v49 = vld [vmem:[#allocation3 + $0x69] sm:$0xff]  ;;  %7103 = vmatpush3.bf16.msra.mxu0 %v8706_v37  ;;  %v10235_v37 = vld [vmem:[#allocation73_spill] sm:$0xff]  ;;  %v8815_v24 = vpop.f32.mrf.mxu1 }
 0x220   : > { %3185 = vst.msk [vmem:[#allocation3 + $0x99] sm:$0xff] %vm313_vm1, %v3152_v21  ;;  %v3150_v33 = vmin.f32 %v3118_v43, 20.0  ;;  %v3123_v6 = vmax.f32 %v3091_v45, 0.0  ;;  %v3089_v9 = vadd.f32 %v8634_v23, %v3057_v46  ;;  %v3026_v32 = vadd.f32 %v2937_v54, %v8741_v56  ;;  %v3215_v36 = vld [vmem:[#allocation3 + $0x68] sm:$0xff]  ;;  %7319 = vmatprep.subr.msk.bf16.mxu1 %vm609_vm0, %v8780_v30  ;;  %7320 = vmatprep.subr.msk.bf16.mxu0 %vm609_vm0, %v8785_v62  ;;  %v10234_v20 = vld [vmem:[#allocation72_spill] sm:$0xff] }
 0x221   : > { %v2445_v55 = vadd.f32 %v10234_v20, %v8621_v44  ;;  %v2448_v7 = vadd.f32 %v10235_v37, %v8625_v0  ;;  %v3060_v1 = vmul.f32 %v8605_v16, %v3028_v8  ;;  %v6986_v10 = vpop.f32.mrf.mxu0  ;;  %v3262_v17 = vld [vmem:[#allocation3 + $0x51] sm:$0xff]  ;;  %v8813_v56 = vpack.c.bf16 %v3264_v49, %v3263_v42  ;;  %v3261_v31 = vld [vmem:[#allocation3 + $0x49] sm:$0xff]  ;;  %v3214_v0 = vld [vmem:[#allocation3 + $0x60] sm:$0xff] }
 0x222   : > { %v3213_v35 = vld [vmem:[#allocation3 + $0x50] sm:$0xff]  ;;  %3183 = vst.msk [vmem:[#allocation3 + $0x81] sm:$0xff] %vm313_vm1, %v3150_v33  ;;  %v3155_v27 = vmin.f32 %v3123_v6, 20.0  ;;  %v3121_v61 = vmax.f32 %v3089_v9, 0.0  ;;  %v3058_v34 = vmul.f32 %v8605_v16, %v3026_v32  ;;  %v3031_v44 = vadd.f32 %v6986_v10, %v8749_v12  ;;  %v3212_v50 = vld [vmem:[#allocation3 + $0x48] sm:$0xff] }
 0x223   : > { %v3092_v21 = vadd.f32 %v8634_v23, %v3060_v1  ;;  %v2950_v43 = vpop.f32.mrf.mxu0  ;;  %v8821_v45 = vpack.c.bf16 %v3262_v17, %v3261_v31  ;;  %v8823_v46 = vpack.c.bf16 %v3213_v35, %v3212_v50  ;;  %v8825_v51 = vpack.c.bf16 %v3215_v36, %v3214_v0  ;;  %v8837_v36 = vpop.f32.mrf.mxu1  ;;  %v10238_v31 = vld [vmem:[#allocation77_spill] sm:$0xff] }
 0x224   : > { %3188 = vst.msk [vmem:[#allocation3 + $0xc1] sm:$0xff] %vm313_vm1, %v3155_v27  ;;  %v3153_v8 = vmin.f32 %v3121_v61, 20.0  ;;  %v3090_v54 = vadd.f32 %v8634_v23, %v3058_v34  ;;  %v3063_v49 = vmul.f32 %v8605_v16, %v3031_v44  ;;  %v3029_v12 = vadd.f32 %v2950_v43, %v2735_v19  ;;  %v3267_v34 = vld [vmem:[#allocation3 + $0x91] sm:$0xff] }
 0x225   : > { %v2736_v33 = vadd.f32 %v8678_v40, %v2442_v59  ;;  %v2741_v6 = vadd.f32 %v8697_v52, %v2447_v38  ;;  %v2739_v9 = vadd.f32 %v8716_v4, %v2445_v55  ;;  %v3124_v32 = vmax.f32 %v3092_v21, 0.0  ;;  %7007 = vmatmul.mubr.msk.bf16.gmra.mxu1 %vm313_vm1, %v8821_v45  ;;  %7041 = vmatmul.mubr.msk.bf16.gmra.mxu0 %vm313_vm1, %v8823_v46  ;;  %v6987_v42 = vpop.f32.mrf.mxu0  ;;  %v10236_v4 = vld [vmem:[#allocation74_spill] sm:$0xff]  ;;  %v10237_v55 = vld [vmem:[#allocation75_spill] sm:$0xff]  ;;  %v8860_v43 = vpop.f32.mrf.mxu1 }
 0x226   : > { %3186 = vst.msk [vmem:[#allocation3 + $0xa9] sm:$0xff] %vm313_vm1, %v3153_v8  ;;  %v3122_v20 = vmax.f32 %v3090_v54, 0.0  ;;  %v3095_v19 = vadd.f32 %v8634_v23, %v3063_v49  ;;  %v3061_v40 = vmul.f32 %v8605_v16, %v3029_v12  ;;  %v3032_v52 = vadd.f32 %v6987_v42, %v2738_v26  ;;  %7010 = vmatprep.mubr.msk.bf16.mxu1 %vm313_vm1, %v8813_v56  ;;  %v3265_v12 = vld [vmem:[#allocation3 + $0x79] sm:$0xff] }
 0x227   : > { %7044 = vmatprep.mubr.msk.bf16.mxu0 %vm313_vm1, %v8825_v51  ;;  %v2446_v59 = vadd.f32 %v10236_v4, %v8628_v63  ;;  %v2742_v38 = vadd.f32 %v8734_v11, %v2448_v7  ;;  %v2451_v37 = vadd.f32 %v10237_v55, %v8638_v41  ;;  %v3156_v1 = vmin.f32 %v3124_v32, 20.0  ;;  %v2953_v10 = vpop.f32.mrf.mxu0  ;;  %v3268_v17 = vld [vmem:[#allocation3 + $0x99] sm:$0xff] }
 0x228   : > { %v3154_v35 = vmin.f32 %v3122_v20, 20.0  ;;  %v3127_v27 = vmax.f32 %v3095_v19, 0.0  ;;  %v3093_v26 = vadd.f32 %v8634_v23, %v3061_v40  ;;  %v3064_v61 = vmul.f32 %v8605_v16, %v3032_v52  ;;  %v3219_v44 = vld [vmem:[#allocation3 + $0x98] sm:$0xff] }
 0x229   : > { %v2449_v50 = vadd.f32 %v10238_v31, %v8644_v18  ;;  %v2452_v63 = vadd.f32 %v8500_v3, %v8648_v2  ;;  %3189 = vst.msk [vmem:[#allocation3 + $0xc9] sm:$0xff] %vm313_vm1, %v3156_v1  ;;  %v3030_v41 = vadd.f32 %v2953_v10, %v2736_v33  ;;  %v6990_v11 = vpop.f32.mrf.mxu0  ;;  %v3266_v7 = vld [vmem:[#allocation3 + $0x81] sm:$0xff]  ;;  %v8858_v21 = vpack.c.bf16 %v3268_v17, %v3267_v34  ;;  %v3216_v32 = vld [vmem:[#allocation3 + $0x78] sm:$0xff]  ;;  %v3218_v3 = vld [vmem:[#allocation3 + $0x90] sm:$0xff] }
 0x22a   : > { %v3217_v0 = vld [vmem:[#allocation3 + $0x80] sm:$0xff]  ;;  %3187 = vst.msk [vmem:[#allocation3 + $0xb1] sm:$0xff] %vm313_vm1, %v3154_v35  ;;  %v3159_v8 = vmin.f32 %v3127_v27, 20.0  ;;  %v3125_v54 = vmax.f32 %v3093_v26, 0.0  ;;  %v3096_v49 = vadd.f32 %v8634_v23, %v3064_v61  ;;  %v3035_v18 = vadd.f32 %v6990_v11, %v2741_v6  ;;  %v6964_v35 = vpop.f32.mrf.mxu1 }
 0x22b   : > { %v3062_v2 = vmul.f32 %v8605_v16, %v3030_v41  ;;  %v2966_v33 = vpop.f32.mrf.mxu0  ;;  %v8865_v42 = vpack.c.bf16 %v3266_v7, %v3265_v12  ;;  %v8867_v20 = vpack.c.bf16 %v3217_v0, %v3216_v32  ;;  %v8869_v19 = vpack.c.bf16 %v3219_v44, %v3218_v3  ;;  %v3271_v11 = vld [vmem:[#allocation3 + $0xc1] sm:$0xff] }
 0x22c   : > { %3192 = vst.msk [vmem:[#allocation3 + $0xf1] sm:$0xff] %vm313_vm1, %v3159_v8  ;;  %v3157_v40 = vmin.f32 %v3125_v54, 20.0  ;;  %v3128_v52 = vmax.f32 %v3096_v49, 0.0  ;;  %v3067_v4 = vmul.f32 %v8605_v16, %v3035_v18  ;;  %v3033_v55 = vadd.f32 %v2966_v33, %v2739_v9  ;;  %v2704_v54 = vpop.f32.mrf.mxu1  ;;  %v3222_v33 = vld [vmem:[#allocation3 + $0xc0] sm:$0xff] }
 0x22d   : > { %v2740_v6 = vadd.f32 %v8754_v5, %v2446_v59  ;;  %v2745_v1 = vadd.f32 %v8787_v15, %v2451_v37  ;;  %v3094_v10 = vadd.f32 %v8634_v23, %v3062_v2  ;;  %7011 = vmatmul.mubr.msk.bf16.gmra.mxu1 %vm313_vm1, %v8865_v42  ;;  %7045 = vmatmul.mubr.msk.bf16.gmra.mxu0 %vm313_vm1, %v8867_v20  ;;  %v6991_v17 = vpop.f32.mrf.mxu0  ;;  %v3269_v3 = vld [vmem:[#allocation3 + $0xa9] sm:$0xff] }
 0x22e   : > { %3190 = vst.msk [vmem:[#allocation3 + $0xd9] sm:$0xff] %vm313_vm1, %v3157_v40  ;;  %v3160_v27 = vmin.f32 %v3128_v52, 20.0  ;;  %v3099_v26 = vadd.f32 %v8634_v23, %v3067_v4  ;;  %v3065_v9 = vmul.f32 %v8605_v16, %v3033_v55  ;;  %v3036_v5 = vadd.f32 %v6991_v17, %v2742_v38  ;;  %7014 = vmatprep.mubr.msk.bf16.mxu1 %vm313_vm1, %v8858_v21  ;;  %v3220_v2 = vld [vmem:[#allocation3 + $0xa8] sm:$0xff] }
 0x22f   : > { %7048 = vmatprep.mubr.msk.bf16.mxu0 %vm313_vm1, %v8869_v19  ;;  %v2743_v15 = vadd.f32 %v8815_v24, %v2449_v50  ;;  %v2450_v59 = vadd.f32 %v8510_v39, %v8658_v25  ;;  %v2746_v37 = vadd.f32 %v8837_v36, %v2452_v63  ;;  %v3126_v61 = vmax.f32 %v3094_v10, 0.0  ;;  %v2969_v34 = vpop.f32.mrf.mxu0 }
 0x230   : > { %3193 = vst.msk [vmem:[#allocation3 + $0xf9] sm:$0xff] %vm313_vm1, %v3160_v27  ;;  %v3131_v44 = vmax.f32 %v3099_v26, 0.0  ;;  %v3097_v38 = vadd.f32 %v8634_v23, %v3065_v9  ;;  %v3068_v31 = vmul.f32 %v8605_v16, %v3036_v5  ;;  %v3034_v41 = vadd.f32 %v2969_v34, %v2740_v6  ;;  %v3272_v7 = vld [vmem:[#allocation3 + $0xc9] sm:$0xff]  ;;  %v6965_v26 = vpop.f32.mrf.mxu1 }
 0x231   : > { %v3223_v0 = vld [vmem:[#allocation3 + $0xc8] sm:$0xff]  ;;  %v2455_v24 = vadd.f32 %v8518_v22, %v8662_v58  ;;  %v2453_v39 = vadd.f32 %v8535_v28, %v8666_v57  ;;  %v3158_v25 = vmin.f32 %v3126_v61, 20.0  ;;  %v6994_v36 = vpop.f32.mrf.mxu0  ;;  %v3270_v50 = vld [vmem:[#allocation3 + $0xb1] sm:$0xff]  ;;  %v8898_v8 = vpack.c.bf16 %v3272_v7, %v3271_v11 }
 0x232   : > { %v3221_v63 = vld [vmem:[#allocation3 + $0xb0] sm:$0xff]  ;;  %v3163_v49 = vmin.f32 %v3131_v44, 20.0  ;;  %v3129_v18 = vmax.f32 %v3097_v38, 0.0  ;;  %v3100_v12 = vadd.f32 %v8634_v23, %v3068_v31  ;;  %v3066_v32 = vmul.f32 %v8605_v16, %v3034_v41 }
 0x233   : > { %3191 = vst.msk [vmem:[#allocation3 + $0xe1] sm:$0xff] %vm313_vm1, %v3158_v25  ;;  %v3039_v22 = vadd.f32 %v6994_v36, %v2745_v1  ;;  %v2982_v28 = vpop.f32.mrf.mxu0  ;;  %v8903_v58 = vpack.c.bf16 %v3270_v50, %v3269_v3  ;;  %v8905_v57 = vpack.c.bf16 %v3221_v63, %v3220_v2  ;;  %v8907_v40 = vpack.c.bf16 %v3223_v0, %v3222_v33  ;;  %v3275_v7 = vld [vmem:[#allocation3 + $0xf1] sm:$0xff] }
 0x234   : > { %3196 = vst.msk [vmem:[#allocation3 + $0x121] sm:$0xff] %vm313_vm1, %v3163_v49  ;;  %v3161_v52 = vmin.f32 %v3129_v18, 20.0  ;;  %v3132_v4 = vmax.f32 %v3100_v12, 0.0  ;;  %v3098_v55 = vadd.f32 %v8634_v23, %v3066_v32  ;;  %v3037_v6 = vadd.f32 %v2982_v28, %v2743_v15  ;;  %v10240_v25 = vld [vmem:[#allocation4_spill] sm:$0xff] }
 0x235   : > { %v2744_v10 = vadd.f32 %v8860_v43, %v2450_v59  ;;  %v2456_v17 = vadd.f32 %v8551_v53, %v8691_v47  ;;  %v3071_v1 = vmul.f32 %v8605_v16, %v3039_v22  ;;  %7015 = vmatmul.mubr.msk.bf16.gmra.mxu1 %vm313_vm1, %v8903_v58  ;;  %7049 = vmatmul.mubr.msk.bf16.gmra.mxu0 %vm313_vm1, %v8905_v57  ;;  %v6995_v27 = vpop.f32.mrf.mxu0  ;;  %v10239_v53 = vld [vmem:[#allocation45_spill] sm:$0xff]  ;;  %v3226_v63 = vld [vmem:[#allocation3 + $0xf0] sm:$0xff] }
 0x236   : > { %3194 = vst.msk [vmem:[#allocation3 + $0x109] sm:$0xff] %vm313_vm1, %v3161_v52  ;;  %v3164_v9 = vmin.f32 %v3132_v4, 20.0  ;;  %v3130_v5 = vmax.f32 %v3098_v55, 0.0  ;;  %v3069_v15 = vmul.f32 %v8605_v16, %v3037_v6  ;;  %v3040_v43 = vadd.f32 %v6995_v27, %v2746_v37  ;;  %7018 = vmatprep.mubr.msk.bf16.mxu1 %vm313_vm1, %v8898_v8  ;;  %7052 = vmatprep.mubr.msk.bf16.mxu0 %vm313_vm1, %v8907_v40  ;;  %v3224_v2 = vld [vmem:[#allocation3 + $0xd8] sm:$0xff] }
 0x237   : > { %v2159_v47 = vadd.f32 %v10239_v53, %v8673_v29  ;;  %v2749_v59 = vadd.f32 %v6964_v35, %v2455_v24  ;;  %v2747_v61 = vadd.f32 %v2704_v54, %v2453_v39  ;;  %v3103_v34 = vadd.f32 %v8634_v23, %v3071_v1  ;;  %v2985_v44 = vpop.f32.mrf.mxu0  ;;  %v3276_v38 = vld [vmem:[#allocation3 + $0xf9] sm:$0xff]  ;;  %v2707_v54 = vpop.f32.mrf.mxu1 }
 0x238   : > { %3197 = vst.msk [vmem:[#allocation3 + $0x129] sm:$0xff] %vm313_vm1, %v3164_v9  ;;  %v3162_v31 = vmin.f32 %v3130_v5, 20.0  ;;  %v3101_v37 = vadd.f32 %v8634_v23, %v3069_v15  ;;  %v3072_v41 = vmul.f32 %v8605_v16, %v3040_v43  ;;  %v3038_v11 = vadd.f32 %v2985_v44, %v2744_v10  ;;  %v3227_v0 = vld [vmem:[#allocation3 + $0xf8] sm:$0xff] }
 0x239   : > { %v2454_v36 = vadd.f32 %v10240_v25, %v2159_v47  ;;  %v2750_v50 = vadd.f32 %v6965_v26, %v2456_v17  ;;  %v3135_v29 = vmax.f32 %v3103_v34, 0.0  ;;  %v6998_v35 = vpop.f32.mrf.mxu0  ;;  %v3273_v24 = vld [vmem:[#allocation3 + $0xd9] sm:$0xff]  ;;  %v8932_v39 = vpack.c.bf16 %v3276_v38, %v3275_v7 }
 0x23a   : > { %3195 = vst.msk [vmem:[#allocation3 + $0x111] sm:$0xff] %vm313_vm1, %v3162_v31  ;;  %v3133_v49 = vmax.f32 %v3101_v37, 0.0  ;;  %v3104_v18 = vadd.f32 %v8634_v23, %v3072_v41  ;;  %v3070_v12 = vmul.f32 %v8605_v16, %v3038_v11  ;;  %v3043_v32 = vadd.f32 %v6998_v35, %v2749_v59  ;;  %v3274_v3 = vld [vmem:[#allocation3 + $0xe1] sm:$0xff] }
 0x23b   : > { %v3225_v33 = vld [vmem:[#allocation3 + $0xe0] sm:$0xff]  ;;  %v3167_v22 = vmin.f32 %v3135_v29, 20.0  ;;  %v2998_v28 = vpop.f32.mrf.mxu0  ;;  %v8937_v52 = vpack.c.bf16 %v3274_v3, %v3273_v24  ;;  %v8941_v55 = vpack.c.bf16 %v3227_v0, %v3226_v63  ;;  %v2748_v27 = vadd.f32 %v2707_v54, %v2454_v36 }
 0x23c   : > { %v8939_v4 = vpack.c.bf16 %v3225_v33, %v3224_v2  ;;  %v3165_v6 = vmin.f32 %v3133_v49, 20.0  ;;  %v3136_v10 = vmax.f32 %v3104_v18, 0.0  ;;  %v3102_v17 = vadd.f32 %v8634_v23, %v3070_v12  ;;  %v3279_v54 = vld [vmem:[#allocation3 + $0x121] sm:$0xff] }
 0x23d   : > { %v3075_v1 = vmul.f32 %v8605_v16, %v3043_v32  ;;  %3200 = vst.msk [vmem:[#allocation3 + $0x151] sm:$0xff] %vm313_vm1, %v3167_v22  ;;  %v3041_v26 = vadd.f32 %v2998_v28, %v2747_v61  ;;  %7019 = vmatmul.mubr.msk.bf16.gmra.mxu1 %vm313_vm1, %v8937_v52  ;;  %v6999_v9 = vpop.f32.mrf.mxu0  ;;  %v3277_v31 = vld [vmem:[#allocation3 + $0x109] sm:$0xff]  ;;  %v3230_v49 = vld [vmem:[#allocation3 + $0x120] sm:$0xff] }
 0x23e   : > { %7053 = vmatmul.mubr.msk.bf16.gmra.mxu0 %vm313_vm1, %v8939_v4  ;;  %3198 = vst.msk [vmem:[#allocation3 + $0x139] sm:$0xff] %vm313_vm1, %v3165_v6  ;;  %v3168_v5 = vmin.f32 %v3136_v10, 20.0  ;;  %v3134_v15 = vmax.f32 %v3102_v17, 0.0  ;;  %v3044_v53 = vadd.f32 %v6999_v9, %v2750_v50  ;;  %7022 = vmatprep.mubr.msk.bf16.mxu1 %vm313_vm1, %v8932_v39  ;;  %v3228_v35 = vld [vmem:[#allocation3 + $0x108] sm:$0xff] }
 0x23f   : > { %v3107_v43 = vadd.f32 %v8634_v23, %v3075_v1  ;;  %7056 = vmatprep.mubr.msk.bf16.mxu0 %vm313_vm1, %v8941_v55  ;;  %v3073_v47 = vmul.f32 %v8605_v16, %v3041_v26  ;;  %v3001_v59 = vpop.f32.mrf.mxu0  ;;  %v3280_v37 = vld [vmem:[#allocation3 + $0x129] sm:$0xff] }
 0x240   : > { %3201 = vst.msk [vmem:[#allocation3 + $0x159] sm:$0xff] %vm313_vm1, %v3168_v5  ;;  %v3166_v61 = vmin.f32 %v3134_v15, 20.0  ;;  %v3076_v44 = vmul.f32 %v8605_v16, %v3044_v53  ;;  %v3042_v38 = vadd.f32 %v3001_v59, %v2748_v27  ;;  %v3231_v0 = vld [vmem:[#allocation3 + $0x128] sm:$0xff]  ;;  %v8969_v32 = vpack.c.bf16 %v3280_v37, %v3279_v54 }
 0x241   : > { %v3139_v34 = vmax.f32 %v3107_v43, 0.0  ;;  %v3105_v41 = vadd.f32 %v8634_v23, %v3073_v47  ;;  %v3278_v11 = vld [vmem:[#allocation3 + $0x111] sm:$0xff]  ;;  %v8971_v3 = vpack.c.bf16 %v3231_v0, %v3230_v49  ;;  %v3729_v53 = vld [vmem:[#allocation3 + $0x2] sm:$0xff]  ;;  %v3734_v0 = vld [vmem:[#allocation3 + $0x3a] sm:$0xff] }
 0x242   : > { %v3229_v7 = vld [vmem:[#allocation3 + $0x110] sm:$0xff]  ;;  %3199 = vst.msk [vmem:[#allocation3 + $0x141] sm:$0xff] %vm313_vm1, %v3166_v61  ;;  %v3108_v36 = vadd.f32 %v8634_v23, %v3076_v44  ;;  %v3074_v50 = vmul.f32 %v8605_v16, %v3042_v38  ;;  %v8963_v29 = vpack.c.bf16 %v3278_v11, %v3277_v31  ;;  %v3732_v11 = vld [vmem:[#allocation3 + $0x22] sm:$0xff] }
 0x243   : > { %v3171_v25 = vmin.f32 %v3139_v34, 20.0  ;;  %v3137_v24 = vmax.f32 %v3105_v41, 0.0  ;;  %v8965_v63 = vpack.c.bf16 %v3229_v7, %v3228_v35  ;;  %v3730_v47 = vld [vmem:[#allocation3 + $0xa] sm:$0xff]  ;;  %v3731_v41 = vld [vmem:[#allocation3 + $0x1a] sm:$0xff]  ;;  %v3733_v7 = vld [vmem:[#allocation3 + $0x32] sm:$0xff]  ;;  %v4710_v35 = vsel %vm609_vm0, %v8785_v62, 0 }
 0x244   : > { %v3140_v18 = vmax.f32 %v3108_v36, 0.0  ;;  %v3106_v12 = vadd.f32 %v8634_v23, %v3074_v50  ;;  %v3283_v9 = vld [vmem:[#allocation3 + $0x151] sm:$0xff]  ;;  %v3761_v37 = vpack.c.bf16 %v3730_v47, %v3729_v53  ;;  %v4416_v36 = vsel %vm609_vm0, %v8780_v30, 0  ;;  %v9031_v30 = vld [vmem:[%s10084_s4 + $0xe] sm:$0x3]  ;;  %v3737_v54 = vld [vmem:[#allocation3 + $0x62] sm:$0xff] }
 0x245   : > { %3204 = vst.msk [vmem:[#allocation3 + $0x181] sm:$0xff] %vm313_vm1, %v3171_v25  ;;  %v3169_v2 = vmin.f32 %v3137_v24, 20.0  ;;  %7023 = vmatmul.mubr.msk.bf16.gmra.mxu1 %vm313_vm1, %v8963_v29  ;;  %v3281_v22 = vld [vmem:[#allocation3 + $0x139] sm:$0xff]  ;;  %v3234_v5 = vld [vmem:[#allocation3 + $0x150] sm:$0xff]  ;;  %v9011_v25 = vpack.c.bf16 %v3732_v11, %v3731_v41  ;;  %v9015_v50 = vpack.c.bf16 %v3734_v0, %v3733_v7  ;;  %v3748_v47 = vld [vmem:[#allocation3 + $0xe2] sm:$0xff] }
 0x246   : > { %7057 = vmatmul.mubr.msk.bf16.gmra.mxu0 %vm313_vm1, %v8965_v63  ;;  %v3172_v16 = vmin.f32 %v3140_v18, 20.0  ;;  %v3138_v33 = vmax.f32 %v3106_v12, 0.0  ;;  %7026 = vmatprep.mubr.msk.bf16.mxu1 %vm313_vm1, %v8969_v32  ;;  %v3232_v28 = vld [vmem:[#allocation3 + $0x138] sm:$0xff]  ;;  %v3735_v62 = vld [vmem:[#allocation3 + $0x4a] sm:$0xff]  ;;  %v3753_v11 = vld [vmem:[#allocation3 + $0x122] sm:$0xff] }
 0x247   : > { %7060 = vmatprep.mubr.msk.bf16.mxu0 %vm313_vm1, %v8971_v3  ;;  %3202 = vst.msk [vmem:[#allocation3 + $0x169] sm:$0xff] %vm313_vm1, %v3169_v2  ;;  %v3284_v6 = vld [vmem:[#allocation3 + $0x159] sm:$0xff]  ;;  %v3738_v49 = vld [vmem:[#allocation3 + $0x6a] sm:$0xff] }
 0x248   : > { %3205 = vst.msk [vmem:[#allocation3 + $0x189] sm:$0xff] %vm313_vm1, %v3172_v16  ;;  %v3170_v23 = vmin.f32 %v3138_v33, 20.0  ;;  %v3235_v1 = vld [vmem:[#allocation3 + $0x158] sm:$0xff]  ;;  %v8988_v15 = vpack.c.bf16 %v3284_v6, %v3283_v9  ;;  %v9043_v12 = vpack.c.bf16 %v3738_v49, %v3737_v54  ;;  %v3740_v16 = vld [vmem:[#allocation3 + $0x82] sm:$0xff]  ;;  %v3743_v6 = vld [vmem:[#allocation3 + $0xaa] sm:$0xff] }
 0x249   : > { %v3282_v10 = vld [vmem:[#allocation3 + $0x141] sm:$0xff]  ;;  %v8990_v43 = vpack.c.bf16 %v3235_v1, %v3234_v5  ;;  %v3736_v24 = vld [vmem:[#allocation3 + $0x52] sm:$0xff]  ;;  %v3746_v1 = vld [vmem:[#allocation3 + $0xca] sm:$0xff] }
 0x24a   : > { %v3233_v17 = vld [vmem:[#allocation3 + $0x140] sm:$0xff]  ;;  %3203 = vst.msk [vmem:[#allocation3 + $0x171] sm:$0xff] %vm313_vm1, %v3170_v23  ;;  %v8984_v27 = vpack.c.bf16 %v3282_v10, %v3281_v22  ;;  %v9041_v18 = vpack.c.bf16 %v3736_v24, %v3735_v62  ;;  %v3741_v33 = vld [vmem:[#allocation3 + $0x92] sm:$0xff]  ;;  %v3754_v7 = vld [vmem:[#allocation3 + $0x12a] sm:$0xff] }
 0x24b   : > { %v8986_v26 = vpack.c.bf16 %v3233_v17, %v3232_v28  ;;  %v3739_v2 = vld [vmem:[#allocation3 + $0x7a] sm:$0xff]  ;;  %v3744_v10 = vld [vmem:[#allocation3 + $0xb2] sm:$0xff]  ;;  %v3745_v17 = vld [vmem:[#allocation3 + $0xc2] sm:$0xff] }
 0x24c   : > { %v3742_v23 = vld [vmem:[#allocation3 + $0x9a] sm:$0xff]  ;;  %v9053_v22 = vpack.c.bf16 %v3740_v16, %v3739_v2  ;;  %v9065_v9 = vpack.c.bf16 %v3744_v10, %v3743_v6  ;;  %v9067_v5 = vpack.c.bf16 %v3746_v1, %v3745_v17  ;;  %v3752_v41 = vld [vmem:[#allocation3 + $0x112] sm:$0xff]  ;;  %v3756_v62 = vld [vmem:[#allocation3 + $0x142] sm:$0xff] }
 0x24d   : > { %7027 = vmatmul.mubr.msk.bf16.gmra.mxu1 %vm313_vm1, %v8984_v27  ;;  %v9055_v28 = vpack.c.bf16 %v3742_v23, %v3741_v33  ;;  %v3747_v53 = vld [vmem:[#allocation3 + $0xda] sm:$0xff]  ;;  %v3757_v24 = vld [vmem:[#allocation3 + $0x152] sm:$0xff] }
 0x24e   : > { %7061 = vmatmul.mubr.msk.bf16.gmra.mxu0 %vm313_vm1, %v8986_v26  ;;  %7030 = vmatprep.mubr.msk.bf16.mxu1 %vm313_vm1, %v8988_v15  ;;  %v3285_v59 = vld [vmem:[#allocation3 + $0x169] sm:$0xff]  ;;  %v3758_v54 = vld [vmem:[#allocation3 + $0x15a] sm:$0xff] }
 0x24f   : > { %7064 = vmatprep.mubr.msk.bf16.mxu0 %vm313_vm1, %v8990_v43  ;;  %v3236_v34 = vld [vmem:[#allocation3 + $0x168] sm:$0xff]  ;;  %v3775_v2 = vpack.c.bf16 %v3758_v54, %v3757_v24  ;;  %v4053_v6 = vld [vmem:[#allocation3 + $0x180] sm:$0xff] }
 0x250   : > { %v4054_v23 = vld [vmem:[#allocation3 + $0x188] sm:$0xff] }
 0x251   : > { %v3286_v61 = vld [vmem:[#allocation3 + $0x171] sm:$0xff]  ;;  %v9107_v17 = vpack.c.bf16 %v4054_v23, %v4053_v6 }
 0x252   : > { %v3237_v44 = vld [vmem:[#allocation3 + $0x170] sm:$0xff]  ;;  %v9000_v38 = vpack.c.bf16 %v3286_v61, %v3285_v59  ;;  %v3750_v61 = vld [vmem:[#allocation3 + $0xfa] sm:$0xff] }
 0x253   : > { %v9002_v31 = vpack.c.bf16 %v3237_v44, %v3236_v34  ;;  %v3749_v59 = vld [vmem:[#allocation3 + $0xf2] sm:$0xff]  ;;  %v9077_v34 = vpack.c.bf16 %v3748_v47, %v3747_v53  ;;  %v3759_v16 = vld [vmem:[#allocation3 + $0x16a] sm:$0xff]  ;;  %v5299_v53 = vsel %vm609_vm0, %v9031_v30, 0  ;;  %v6367_v47 = vld [vmem:[%s10084_s4 + $0x10] sm:$0x3] }
 0x254   : > { %v9079_v44 = vpack.c.bf16 %v3750_v61, %v3749_v59  ;;  %v3760_v33 = vld [vmem:[#allocation3 + $0x172] sm:$0xff] }
 0x255   : > { %7031 = vmatmul.mubr.msk.bf16.gmra.mxu1 %vm313_vm1, %v9000_v38  ;;  %v3776_v10 = vpack.c.bf16 %v3760_v33, %v3759_v16 }
 0x256   : > { %7065 = vmatmul.mubr.msk.bf16.gmra.mxu0 %vm313_vm1, %v9002_v31  ;;  %7070 = vmatprep.mubr.msk.bf16.mxu1 %vm313_vm1, %v3761_v37  ;;  %v3751_v37 = vld [vmem:[#allocation3 + $0x10a] sm:$0xff] }
 0x257   : > { %7104 = vmatprep.mubr.msk.bf16.mxu0 %vm313_vm1, %v8761_v48  ;;  %v9026_v48 = vld [vmem:[%s10084_s4 + $0xc] sm:$0x3]  ;;  %v9089_v0 = vpack.c.bf16 %v3752_v41, %v3751_v37  ;;  %v5593_v37 = vsel %vm609_vm0, %v6367_v47, 0 }
 0x258   : > { %v5005_v1 = vsel %vm609_vm0, %v9026_v48, 0 }
 0x25d   : > { %7071 = vmatmul.mubr.msk.bf16.vlgmr.msra.gmra.mxu1 %vm313_vm1, %v9011_v25 }
 0x25e   : > { %7105 = vmatmul.mubr.msk.bf16.vlgmr.msra.gmra.mxu0 %vm313_vm1, %v8775_v13  ;;  %7137 = vmatpush3.bf16.msra.mxu1 %v4416_v36  ;;  %v9091_v36 = vpack.c.bf16 %v3754_v7, %v3753_v11 }
 0x25f   : > { %7074 = vmatprep.mubr.msk.bf16.mxu1 %vm313_vm1, %v9015_v50  ;;  %7108 = vmatprep.mubr.msk.bf16.mxu0 %vm313_vm1, %v8823_v46 }
 0x260   : > { %7171 = vmatpush3.bf16.msra.mxu0 %v4710_v35  ;;  %7321 = vmatprep.subr.msk.bf16.mxu1 %vm609_vm0, %v9026_v48  ;;  %v3755_v35 = vld [vmem:[#allocation3 + $0x13a] sm:$0xff]  ;;  %v4642_v48 = vld [vmem:[#allocation3 + $0x18a] sm:$0xff] }
 0x261   : > { %7322 = vmatprep.subr.msk.bf16.mxu0 %vm609_vm0, %v9031_v30  ;;  %v3774_v49 = vpack.c.bf16 %v3756_v62, %v3755_v35  ;;  %v4347_v30 = vld [vmem:[#allocation3 + $0x181] sm:$0xff] }
 0x265   : > { %7075 = vmatmul.mubr.msk.bf16.gmra.mxu1 %vm313_vm1, %v9041_v18 }
 0x266   : > { %7109 = vmatmul.mubr.msk.bf16.gmra.mxu0 %vm313_vm1, %v8825_v51  ;;  %7078 = vmatprep.mubr.msk.bf16.mxu1 %vm313_vm1, %v9043_v12 }
 0x267   : > { %7112 = vmatprep.mubr.msk.bf16.mxu0 %vm313_vm1, %v8867_v20 }
 0x26d   : > { %7079 = vmatmul.mubr.msk.bf16.gmra.mxu1 %vm313_vm1, %v9053_v22 }
 0x26e   : > { %7113 = vmatmul.mubr.msk.bf16.gmra.mxu0 %vm313_vm1, %v8869_v19  ;;  %7082 = vmatprep.mubr.msk.bf16.mxu1 %vm313_vm1, %v9055_v28 }
 0x26f   : > { %7116 = vmatprep.mubr.msk.bf16.mxu0 %vm313_vm1, %v8905_v57 }
 0x275   : > { %7083 = vmatmul.mubr.msk.bf16.gmra.mxu1 %vm313_vm1, %v9065_v9 }
 0x276   : > { %7117 = vmatmul.mubr.msk.bf16.gmra.mxu0 %vm313_vm1, %v8907_v40  ;;  %7086 = vmatprep.mubr.msk.bf16.mxu1 %vm313_vm1, %v9067_v5 }
 0x277   : > { %7120 = vmatprep.mubr.msk.bf16.mxu0 %vm313_vm1, %v8939_v4 }
 0x27d   : > { %7087 = vmatmul.mubr.msk.bf16.gmra.mxu1 %vm313_vm1, %v9077_v34 }
 0x27e   : > { %7121 = vmatmul.mubr.msk.bf16.gmra.mxu0 %vm313_vm1, %v8941_v55  ;;  %7090 = vmatprep.mubr.msk.bf16.mxu1 %vm313_vm1, %v9079_v44 }
 0x27f   : > { %7124 = vmatprep.mubr.msk.bf16.mxu0 %vm313_vm1, %v8965_v63 }
 0x285   : > { %7091 = vmatmul.mubr.msk.bf16.gmra.mxu1 %vm313_vm1, %v9089_v0 }
 0x286   : > { %7125 = vmatmul.mubr.msk.bf16.gmra.mxu0 %vm313_vm1, %v8971_v3  ;;  %7094 = vmatprep.mubr.msk.bf16.mxu1 %vm313_vm1, %v9091_v36 }
 0x287   : > { %7128 = vmatprep.mubr.msk.bf16.mxu0 %vm313_vm1, %v8986_v26 }
 0x28d   : > { %7095 = vmatmul.mubr.msk.bf16.gmra.mxu1 %vm313_vm1, %v3774_v49 }
 0x28e   : > { %7129 = vmatmul.mubr.msk.bf16.gmra.mxu0 %vm313_vm1, %v8990_v43  ;;  %7098 = vmatprep.mubr.msk.bf16.mxu1 %vm313_vm1, %v3775_v2 }
 0x28f   : > { %7132 = vmatprep.mubr.msk.bf16.mxu0 %vm313_vm1, %v9002_v31 }
 0x295   : > { %7099 = vmatmul.mubr.msk.bf16.gmra.mxu1 %vm313_vm1, %v3776_v10 }
 0x296   : > { %7133 = vmatmul.mubr.msk.bf16.gmra.mxu0 %vm313_vm1, %v9107_v17  ;;  %7138 = vmatprep.mubr.msk.bf16.mxu1 %vm313_vm1, %v8759_v14  ;;  %v4348_v14 = vld [vmem:[#allocation3 + $0x189] sm:$0xff] }
 0x297   : > { %7172 = vmatprep.mubr.msk.bf16.mxu0 %vm313_vm1, %v9011_v25  ;;  %v4641_v25 = vld [vmem:[#allocation3 + $0x182] sm:$0xff]  ;;  %v9177_v59 = vpack.c.bf16 %v4348_v14, %v4347_v30 }
 0x298   : > { %v9179_v61 = vpack.c.bf16 %v4642_v48, %v4641_v25 }
 0x29d   : > { %7139 = vmatmul.mubr.msk.bf16.vlgmr.msra.gmra.mxu1 %vm313_vm1, %v8763_v60 }
 0x29e   : > { %7173 = vmatmul.mubr.msk.bf16.vlgmr.msra.gmra.mxu0 %vm313_vm1, %v9015_v50  ;;  %7205 = vmatpush3.bf16.msra.mxu1 %v5005_v1 }
 0x29f   : > { %7142 = vmatprep.mubr.msk.bf16.mxu1 %vm313_vm1, %v8821_v45  ;;  %7176 = vmatprep.mubr.msk.bf16.mxu0 %vm313_vm1, %v9041_v18 }
 0x2a0   : > { %7239 = vmatpush3.bf16.msra.mxu0 %v5299_v53  ;;  %7323 = vmatprep.subr.msk.bf16.mxu1 %vm609_vm0, %v6367_v47 }
 0x2a5   : > { %7143 = vmatmul.mubr.msk.bf16.gmra.mxu1 %vm313_vm1, %v8813_v56 }
 0x2a6   : > { %7177 = vmatmul.mubr.msk.bf16.gmra.mxu0 %vm313_vm1, %v9043_v12  ;;  %7146 = vmatprep.mubr.msk.bf16.mxu1 %vm313_vm1, %v8865_v42 }
 0x2a7   : > { %7180 = vmatprep.mubr.msk.bf16.mxu0 %vm313_vm1, %v9053_v22 }
 0x2ad   : > { %7147 = vmatmul.mubr.msk.bf16.gmra.mxu1 %vm313_vm1, %v8858_v21 }
 0x2ae   : > { %7181 = vmatmul.mubr.msk.bf16.gmra.mxu0 %vm313_vm1, %v9055_v28  ;;  %7150 = vmatprep.mubr.msk.bf16.mxu1 %vm313_vm1, %v8903_v58 }
 0x2af   : > { %7184 = vmatprep.mubr.msk.bf16.mxu0 %vm313_vm1, %v9065_v9 }
 0x2b5   : > { %7151 = vmatmul.mubr.msk.bf16.gmra.mxu1 %vm313_vm1, %v8898_v8 }
 0x2b6   : > { %7185 = vmatmul.mubr.msk.bf16.gmra.mxu0 %vm313_vm1, %v9067_v5  ;;  %7154 = vmatprep.mubr.msk.bf16.mxu1 %vm313_vm1, %v8937_v52 }
 0x2b7   : > { %7188 = vmatprep.mubr.msk.bf16.mxu0 %vm313_vm1, %v9077_v34 }
 0x2bd   : > { %7155 = vmatmul.mubr.msk.bf16.gmra.mxu1 %vm313_vm1, %v8932_v39 }
 0x2be   : > { %7189 = vmatmul.mubr.msk.bf16.gmra.mxu0 %vm313_vm1, %v9079_v44  ;;  %7158 = vmatprep.mubr.msk.bf16.mxu1 %vm313_vm1, %v8963_v29 }
 0x2bf   : > { %7192 = vmatprep.mubr.msk.bf16.mxu0 %vm313_vm1, %v9089_v0 }
 0x2c5   : > { %7159 = vmatmul.mubr.msk.bf16.gmra.mxu1 %vm313_vm1, %v8969_v32 }
 0x2c6   : > { %7193 = vmatmul.mubr.msk.bf16.gmra.mxu0 %vm313_vm1, %v9091_v36  ;;  %7162 = vmatprep.mubr.msk.bf16.mxu1 %vm313_vm1, %v8984_v27 }
 0x2c7   : > { %7196 = vmatprep.mubr.msk.bf16.mxu0 %vm313_vm1, %v3774_v49 }
 0x2cd   : > { %7163 = vmatmul.mubr.msk.bf16.gmra.mxu1 %vm313_vm1, %v8988_v15 }
 0x2ce   : > { %7197 = vmatmul.mubr.msk.bf16.gmra.mxu0 %vm313_vm1, %v3775_v2  ;;  %7166 = vmatprep.mubr.msk.bf16.mxu1 %vm313_vm1, %v9000_v38 }
 0x2cf   : > { %7200 = vmatprep.mubr.msk.bf16.mxu0 %vm313_vm1, %v3776_v10 }
 0x2d5   : > { %7167 = vmatmul.mubr.msk.bf16.gmra.mxu1 %vm313_vm1, %v9177_v59 }
 0x2d6   : > { %7201 = vmatmul.mubr.msk.bf16.gmra.mxu0 %vm313_vm1, %v9179_v61  ;;  %7206 = vmatprep.mubr.msk.bf16.mxu1 %vm313_vm1, %v8775_v13 }
 0x2d7   : > { %7240 = vmatprep.mubr.msk.bf16.mxu0 %vm313_vm1, %v8763_v60 }
 0x2dd   : > { %v7004_v41 = vpop.f32.mrf.mxu1  ;;  %v7038_v11 = vpop.f32.mrf.mxu0  ;;  %7207 = vmatmul.mubr.msk.bf16.vlgmr.msra.gmra.mxu1 %vm313_vm1, %v8823_v46 }
 0x2de   : > { %7241 = vmatmul.mubr.msk.bf16.vlgmr.msra.gmra.mxu0 %vm313_vm1, %v8821_v45  ;;  %v9194_v7 = vadd.f32 %v7038_v11, %v7004_v41  ;;  %7273 = vmatpush3.bf16.msra.mxu1 %v5593_v37 }
 0x2df   : > { %7210 = vmatprep.mubr.msk.bf16.mxu1 %vm313_vm1, %v8825_v51  ;;  %7244 = vmatprep.mubr.msk.bf16.mxu0 %vm313_vm1, %v8813_v56  ;;  %v3390_v60 = vpop.f32.mrf.mxu1  ;;  %v3602_v13 = vpop.f32.mrf.mxu0 }
 0x2e0   : > { %v9200_v35 = vadd.f32 %v3602_v13, %v3390_v60 }
 0x2e1   : > { %v7005_v62 = vpop.f32.mrf.mxu1  ;;  %v7039_v24 = vpop.f32.mrf.mxu0 }
 0x2e2   : > { %v9202_v54 = vadd.f32 %v7039_v24, %v7005_v62 }
 0x2e3   : > { %v3393_v46 = vpop.f32.mrf.mxu1  ;;  %v3605_v49 = vpop.f32.mrf.mxu0 }
 0x2e4   : > { %v9204_v45 = vadd.f32 %v3605_v49, %v3393_v46 }
 0x2e5   : > { %v7008_v2 = vpop.f32.mrf.mxu1  ;;  %v7042_v16 = vpop.f32.mrf.mxu0  ;;  %7211 = vmatmul.mubr.msk.bf16.gmra.mxu1 %vm313_vm1, %v8867_v20 }
 0x2e6   : > { %7245 = vmatmul.mubr.msk.bf16.gmra.mxu0 %vm313_vm1, %v8865_v42  ;;  %v9210_v56 = vadd.f32 %v7042_v16, %v7008_v2  ;;  %7214 = vmatprep.mubr.msk.bf16.mxu1 %vm313_vm1, %v8869_v19 }
 0x2e7   : > { %7248 = vmatprep.mubr.msk.bf16.mxu0 %vm313_vm1, %v8858_v21  ;;  %v3406_v51 = vpop.f32.mrf.mxu1  ;;  %v3618_v33 = vpop.f32.mrf.mxu0 }
 0x2e8   : > { %v9216_v23 = vadd.f32 %v3618_v33, %v3406_v51 }
 0x2e9   : > { %v7009_v6 = vpop.f32.mrf.mxu1  ;;  %v7043_v10 = vpop.f32.mrf.mxu0 }
 0x2ea   : > { %v9218_v1 = vadd.f32 %v7043_v10, %v7009_v6 }
 0x2eb   : > { %v3409_v20 = vpop.f32.mrf.mxu1  ;;  %v3621_v53 = vpop.f32.mrf.mxu0 }
 0x2ec   : > { %v9220_v47 = vadd.f32 %v3621_v53, %v3409_v20 }
 0x2ed   : > { %v7012_v42 = vpop.f32.mrf.mxu1  ;;  %v7046_v14 = vpop.f32.mrf.mxu0  ;;  %7215 = vmatmul.mubr.msk.bf16.gmra.mxu1 %vm313_vm1, %v8905_v57 }
 0x2ee   : > { %7249 = vmatmul.mubr.msk.bf16.gmra.mxu0 %vm313_vm1, %v8903_v58  ;;  %v9226_v21 = vadd.f32 %v7046_v14, %v7012_v42  ;;  %7218 = vmatprep.mubr.msk.bf16.mxu1 %vm313_vm1, %v8907_v40 }
 0x2ef   : > { %7252 = vmatprep.mubr.msk.bf16.mxu0 %vm313_vm1, %v8898_v8  ;;  %v3422_v19 = vpop.f32.mrf.mxu1  ;;  %v3634_v25 = vpop.f32.mrf.mxu0 }
 0x2f0   : > { %v9232_v48 = vadd.f32 %v3634_v25, %v3422_v19 }
 0x2f1   : > { %v7013_v30 = vpop.f32.mrf.mxu1  ;;  %v7047_v37 = vpop.f32.mrf.mxu0 }
 0x2f2   : > { %v9234_v41 = vadd.f32 %v7047_v37, %v7013_v30 }
 0x2f3   : > { %v3425_v57 = vpop.f32.mrf.mxu1  ;;  %v3637_v11 = vpop.f32.mrf.mxu0 }
 0x2f4   : > { %v9236_v60 = vadd.f32 %v3637_v11, %v3425_v57 }
 0x2f5   : > { %v7016_v58 = vpop.f32.mrf.mxu1  ;;  %v7050_v13 = vpop.f32.mrf.mxu0  ;;  %7219 = vmatmul.mubr.msk.bf16.gmra.mxu1 %vm313_vm1, %v8939_v4 }
 0x2f6   : > { %7253 = vmatmul.mubr.msk.bf16.gmra.mxu0 %vm313_vm1, %v8937_v52  ;;  %v9242_v8 = vadd.f32 %v7050_v13, %v7016_v58  ;;  %7222 = vmatprep.mubr.msk.bf16.mxu1 %vm313_vm1, %v8941_v55 }
 0x2f7   : > { %7256 = vmatprep.mubr.msk.bf16.mxu0 %vm313_vm1, %v8932_v39  ;;  %v3438_v40 = vpop.f32.mrf.mxu1  ;;  %v3650_v62 = vpop.f32.mrf.mxu0 }
 0x2f8   : > { %v9248_v24 = vadd.f32 %v3650_v62, %v3438_v40 }
 0x2f9   : > { %v7017_v46 = vpop.f32.mrf.mxu1  ;;  %v7051_v49 = vpop.f32.mrf.mxu0 }
 0x2fa   : > { %v9250_v2 = vadd.f32 %v7051_v49, %v7017_v46  ;;  %v4937_v46 = vld [vmem:[#allocation3 + $0x1a0] sm:$0xff] }
 0x2fb   : > { %v3441_v4 = vpop.f32.mrf.mxu1  ;;  %v3653_v16 = vpop.f32.mrf.mxu0  ;;  %v5230_v49 = vld [vmem:[#allocation3 + $0x199] sm:$0xff] }
 0x2fc   : > { %v9252_v51 = vadd.f32 %v3653_v16, %v3441_v4  ;;  %v5231_v4 = vld [vmem:[#allocation3 + $0x1a1] sm:$0xff] }
 0x2fd   : > { %v7020_v52 = vpop.f32.mrf.mxu1  ;;  %7223 = vmatmul.mubr.msk.bf16.gmra.mxu1 %vm313_vm1, %v8965_v63 }
 0x2fe   : > { %v7054_v33 = vpop.f32.mrf.mxu0  ;;  %7257 = vmatmul.mubr.msk.bf16.gmra.mxu0 %vm313_vm1, %v8963_v29  ;;  %7226 = vmatprep.mubr.msk.bf16.mxu1 %vm313_vm1, %v8971_v3 }
 0x2ff   : > { %v9258_v39 = vadd.f32 %v7054_v33, %v7020_v52  ;;  %7260 = vmatprep.mubr.msk.bf16.mxu0 %vm313_vm1, %v8969_v32  ;;  %v3454_v55 = vpop.f32.mrf.mxu1 }
 0x300   : > { %v3666_v6 = vpop.f32.mrf.mxu0 }
 0x301   : > { %v9264_v10 = vadd.f32 %v3666_v6, %v3454_v55  ;;  %v7021_v20 = vpop.f32.mrf.mxu1 }
 0x302   : > { %v7055_v53 = vpop.f32.mrf.mxu0 }
 0x303   : > { %v9266_v42 = vadd.f32 %v7055_v53, %v7021_v20  ;;  %v3457_v63 = vpop.f32.mrf.mxu1 }
 0x304   : > { %v3669_v14 = vpop.f32.mrf.mxu0 }
 0x305   : > { %v9268_v19 = vadd.f32 %v3669_v14, %v3457_v63  ;;  %v7024_v29 = vpop.f32.mrf.mxu1  ;;  %7227 = vmatmul.mubr.msk.bf16.gmra.mxu1 %vm313_vm1, %v8986_v26 }
 0x306   : > { %v7058_v25 = vpop.f32.mrf.mxu0  ;;  %7261 = vmatmul.mubr.msk.bf16.gmra.mxu0 %vm313_vm1, %v8984_v27  ;;  %7230 = vmatprep.mubr.msk.bf16.mxu1 %vm313_vm1, %v8990_v43 }
 0x307   : > { %v9274_v32 = vadd.f32 %v7058_v25, %v7024_v29  ;;  %7264 = vmatprep.mubr.msk.bf16.mxu0 %vm313_vm1, %v8988_v15  ;;  %v3470_v3 = vpop.f32.mrf.mxu1  ;;  %v4936_v15 = vld [vmem:[#allocation3 + $0x198] sm:$0xff] }
 0x308   : > { %v3682_v30 = vpop.f32.mrf.mxu0  ;;  %v4953_v6 = vpack.c.bf16 %v4937_v46, %v4936_v15 }
 0x309   : > { %v9280_v37 = vadd.f32 %v3682_v30, %v3470_v3  ;;  %v7025_v57 = vpop.f32.mrf.mxu1 }
 0x30a   : > { %v7059_v11 = vpop.f32.mrf.mxu0 }
 0x30b   : > { %v9282_v58 = vadd.f32 %v7059_v11, %v7025_v57  ;;  %v3473_v26 = vpop.f32.mrf.mxu1 }
 0x30c   : > { %v3685_v13 = vpop.f32.mrf.mxu0 }
 0x30d   : > { %v9284_v40 = vadd.f32 %v3685_v13, %v3473_v26  ;;  %v7028_v27 = vpop.f32.mrf.mxu1  ;;  %7231 = vmatmul.mubr.msk.bf16.gmra.mxu1 %vm313_vm1, %v9002_v31 }
 0x30e   : > { %v7062_v62 = vpop.f32.mrf.mxu0  ;;  %7265 = vmatmul.mubr.msk.bf16.gmra.mxu0 %vm313_vm1, %v9000_v38  ;;  %7234 = vmatprep.mubr.msk.bf16.mxu1 %vm313_vm1, %v9107_v17  ;;  %v5247_v38 = vpack.c.bf16 %v5231_v4, %v5230_v49 }
 0x30f   : > { %v9290_v43 = vadd.f32 %v7062_v62, %v7028_v27  ;;  %7268 = vmatprep.mubr.msk.bf16.mxu0 %vm313_vm1, %v9177_v59  ;;  %v3486_v16 = vpop.f32.mrf.mxu1 }
 0x310   : > { %v3698_v52 = vpop.f32.mrf.mxu0 }
 0x311   : > { %v9296_v33 = vadd.f32 %v3698_v52, %v3486_v16  ;;  %v7029_v31 = vpop.f32.mrf.mxu1 }
 0x312   : > { %v7063_v55 = vpop.f32.mrf.mxu0 }
 0x313   : > { %v9298_v20 = vadd.f32 %v7063_v55, %v7029_v31  ;;  %v3489_v53 = vpop.f32.mrf.mxu1 }
 0x314   : > { %v3701_v63 = vpop.f32.mrf.mxu0 }
 0x315   : > { %v9300_v14 = vadd.f32 %v3701_v63, %v3489_v53  ;;  %v7032_v17 = vpop.f32.mrf.mxu1  ;;  %7235 = vmatmul.mubr.msk.bf16.gmra.mxu1 %vm313_vm1, %v4953_v6 }
 0x316   : > { %v7066_v29 = vpop.f32.mrf.mxu0  ;;  %7269 = vmatmul.mubr.msk.bf16.gmra.mxu0 %vm313_vm1, %v5247_v38  ;;  %7274 = vmatprep.mubr.msk.bf16.mxu1 %vm313_vm1, %v9015_v50 }
 0x317   : > { %v9304_v59 = vadd.f32 %v7066_v29, %v7032_v17  ;;  %v3502_v25 = vpop.f32.mrf.mxu1 }
 0x318   : > { %v3714_v3 = vpop.f32.mrf.mxu0 }
 0x319   : > { %v9308_v30 = vadd.f32 %v3714_v3, %v3502_v25  ;;  %v7033_v57 = vpop.f32.mrf.mxu1 }
 0x31a   : > { %v7067_v11 = vpop.f32.mrf.mxu0 }
 0x31b   : > { %v9310_v26 = vadd.f32 %v7067_v11, %v7033_v57  ;;  %v3505_v13 = vpop.f32.mrf.mxu1 }
 0x31c   : > { %v3717_v27 = vpop.f32.mrf.mxu0 }
 0x31d   : > { %v9312_v62 = vadd.f32 %v3717_v27, %v3505_v13  ;;  %v7072_v15 = vpop.f32.mrf.mxu1  ;;  %7275 = vmatmul.mubr.msk.bf16.vlgmr.msra.gmra.mxu1 %vm313_vm1, %v9041_v18 }
 0x31e   : > { %v7106_v46 = vpop.f32.mrf.mxu0  ;;  %v3993_v49 = vadd.f32 %v7072_v15, %v9194_v7  ;;  %7278 = vmatprep.mubr.msk.bf16.mxu1 %vm313_vm1, %v9043_v12 }
 0x31f   : > { %v3864_v50 = vpop.f32.mrf.mxu1 }
 0x320   : > { %v4158_v4 = vpop.f32.mrf.mxu0  ;;  %v9319_v16 = vadd.f32 %v7106_v46, %v3993_v49  ;;  %v3991_v52 = vadd.f32 %v3864_v50, %v9200_v35 }
 0x321   : > { %v7073_v31 = vpop.f32.mrf.mxu1 }
 0x322   : > { %v7107_v55 = vpop.f32.mrf.mxu0  ;;  %v9322_v6 = vadd.f32 %v4158_v4, %v3991_v52  ;;  %v3994_v38 = vadd.f32 %v7073_v31, %v9202_v54 }
 0x323   : > { %v3867_v53 = vpop.f32.mrf.mxu1 }
 0x324   : > { %v4161_v63 = vpop.f32.mrf.mxu0  ;;  %v9325_v18 = vadd.f32 %v7107_v55, %v3994_v38  ;;  %v3992_v7 = vadd.f32 %v3867_v53, %v9204_v45 }
 0x325   : > { %v7076_v17 = vpop.f32.mrf.mxu1  ;;  %7279 = vmatmul.mubr.msk.bf16.gmra.mxu1 %vm313_vm1, %v9053_v22 }
 0x326   : > { %v7110_v12 = vpop.f32.mrf.mxu0  ;;  %v9330_v29 = vadd.f32 %v4161_v63, %v3992_v7  ;;  %v3997_v35 = vadd.f32 %v7076_v17, %v9210_v56  ;;  %7282 = vmatprep.mubr.msk.bf16.mxu1 %vm313_vm1, %v9055_v28 }
 0x327   : > { %v3880_v25 = vpop.f32.mrf.mxu1 }
 0x328   : > { %v4174_v54 = vpop.f32.mrf.mxu0  ;;  %v9335_v3 = vadd.f32 %v7110_v12, %v3997_v35  ;;  %v3995_v57 = vadd.f32 %v3880_v25, %v9216_v23 }
 0x329   : > { %v7077_v11 = vpop.f32.mrf.mxu1 }
 0x32a   : > { %v7111_v45 = vpop.f32.mrf.mxu0  ;;  %v9338_v13 = vadd.f32 %v4174_v54, %v3995_v57  ;;  %v3998_v27 = vadd.f32 %v7077_v11, %v9218_v1 }
 0x32b   : > { %v3883_v22 = vpop.f32.mrf.mxu1 }
 0x32c   : > { %v4177_v15 = vpop.f32.mrf.mxu0  ;;  %v9341_v46 = vadd.f32 %v7111_v45, %v3998_v27  ;;  %v3996_v56 = vadd.f32 %v3883_v22, %v9220_v47 }
 0x32d   : > { %v7080_v49 = vpop.f32.mrf.mxu1  ;;  %7283 = vmatmul.mubr.msk.bf16.gmra.mxu1 %vm313_vm1, %v9065_v9 }
 0x32e   : > { %v7114_v28 = vpop.f32.mrf.mxu0  ;;  %v9346_v50 = vadd.f32 %v4177_v15, %v3996_v56  ;;  %v4001_v23 = vadd.f32 %v7080_v49, %v9226_v21  ;;  %7286 = vmatprep.mubr.msk.bf16.mxu1 %vm313_vm1, %v9067_v5 }
 0x32f   : > { %v3896_v4 = vpop.f32.mrf.mxu1 }
 0x330   : > { %v4190_v1 = vpop.f32.mrf.mxu0  ;;  %v9351_v52 = vadd.f32 %v7114_v28, %v4001_v23  ;;  %v3999_v31 = vadd.f32 %v3896_v4, %v9232_v48  ;;  %v5516_v4 = vld [vmem:[#allocation3 + $0x13a] sm:$0xff] }
 0x331   : > { %v7081_v55 = vpop.f32.mrf.mxu1 }
 0x332   : > { %v7115_v47 = vpop.f32.mrf.mxu0  ;;  %v9354_v38 = vadd.f32 %v4190_v1, %v3999_v31  ;;  %v4002_v53 = vadd.f32 %v7081_v55, %v9234_v41  ;;  %v5518_v55 = vld [vmem:[#allocation3 + $0x152] sm:$0xff] }
 0x333   : > { %v3899_v9 = vpop.f32.mrf.mxu1 }
 0x334   : > { %v4193_v63 = vpop.f32.mrf.mxu0  ;;  %v9357_v7 = vadd.f32 %v7115_v47, %v4002_v53  ;;  %v4000_v21 = vadd.f32 %v3899_v9, %v9236_v60  ;;  %v5519_v47 = vld [vmem:[#allocation3 + $0x15a] sm:$0xff] }
 0x335   : > { %v7084_v17 = vpop.f32.mrf.mxu1  ;;  %7287 = vmatmul.mubr.msk.bf16.gmra.mxu1 %vm313_vm1, %v9077_v34 }
 0x336   : > { %v7118_v5 = vpop.f32.mrf.mxu0  ;;  %v9362_v12 = vadd.f32 %v4193_v63, %v4000_v21  ;;  %v4005_v48 = vadd.f32 %v7084_v17, %v9242_v8  ;;  %7290 = vmatprep.mubr.msk.bf16.mxu1 %vm313_vm1, %v9079_v44  ;;  %v5538_v17 = vpack.c.bf16 %v5519_v47, %v5518_v55 }
 0x337   : > { %v3912_v35 = vpop.f32.mrf.mxu1 }
 0x338   : > { %v4206_v41 = vpop.f32.mrf.mxu0  ;;  %v9367_v25 = vadd.f32 %v7118_v5, %v4005_v48  ;;  %v4003_v54 = vadd.f32 %v3912_v35, %v9248_v24 }
 0x339   : > { %v7085_v57 = vpop.f32.mrf.mxu1 }
 0x33a   : > { %v7119_v60 = vpop.f32.mrf.mxu0  ;;  %v9370_v11 = vadd.f32 %v4206_v41, %v4003_v54  ;;  %v4006_v45 = vadd.f32 %v7085_v57, %v9250_v2 }
 0x33b   : > { %v3915_v34 = vpop.f32.mrf.mxu1 }
 0x33c   : > { %v4209_v27 = vpop.f32.mrf.mxu0  ;;  %v9373_v22 = vadd.f32 %v7119_v60, %v4006_v45  ;;  %v4004_v8 = vadd.f32 %v3915_v34, %v9252_v51  ;;  %v5517_v51 = vld [vmem:[#allocation3 + $0x142] sm:$0xff]  ;;  %v5520_v60 = vld [vmem:[#allocation3 + $0x16a] sm:$0xff]  ;;  %v5521_v45 = vld [vmem:[#allocation3 + $0x172] sm:$0xff] }
 0x33d   : > { %v7088_v15 = vpop.f32.mrf.mxu1  ;;  %7291 = vmatmul.mubr.msk.bf16.gmra.mxu1 %vm313_vm1, %v9089_v0  ;;  %v5537_v63 = vpack.c.bf16 %v5517_v51, %v5516_v4  ;;  %v5524_v51 = vld [vmem:[#allocation3 + $0x19a] sm:$0xff] }
 0x33e   : > { %v7122_v44 = vpop.f32.mrf.mxu0  ;;  %v9378_v56 = vadd.f32 %v4209_v27, %v4004_v8  ;;  %v4009_v24 = vadd.f32 %v7088_v15, %v9258_v39  ;;  %7294 = vmatprep.mubr.msk.bf16.mxu1 %vm313_vm1, %v9091_v36 }
 0x33f   : > { %v3928_v49 = vpop.f32.mrf.mxu1 }
 0x340   : > { %v4222_v2 = vpop.f32.mrf.mxu0  ;;  %v9383_v28 = vadd.f32 %v7122_v44, %v4009_v24  ;;  %v4007_v23 = vadd.f32 %v3928_v49, %v9264_v10  ;;  %v5539_v24 = vpack.c.bf16 %v5521_v45, %v5520_v60 }
 0x341   : > { %v7089_v1 = vpop.f32.mrf.mxu1 }
 0x342   : > { %v7123_v31 = vpop.f32.mrf.mxu0  ;;  %v9386_v0 = vadd.f32 %v4222_v2, %v4007_v23  ;;  %v4010_v53 = vadd.f32 %v7089_v1, %v9266_v42 }
 0x343   : > { %v3931_v39 = vpop.f32.mrf.mxu1 }
 0x344   : > { %v4225_v9 = vpop.f32.mrf.mxu0  ;;  %v9389_v36 = vadd.f32 %v7123_v31, %v4010_v53  ;;  %v4008_v21 = vadd.f32 %v3931_v39, %v9268_v19 }
 0x345   : > { %v7092_v5 = vpop.f32.mrf.mxu1  ;;  %7295 = vmatmul.mubr.msk.bf16.gmra.mxu1 %vm313_vm1, %v5537_v63 }
 0x346   : > { %v7126_v10 = vpop.f32.mrf.mxu0  ;;  %v9393_v48 = vadd.f32 %v4225_v9, %v4008_v21  ;;  %v4013_v35 = vadd.f32 %v7092_v5, %v9274_v32  ;;  %7298 = vmatprep.mubr.msk.bf16.mxu1 %vm313_vm1, %v5538_v17 }
 0x347   : > { %v3944_v41 = vpop.f32.mrf.mxu1 }
 0x348   : > { %v4238_v42 = vpop.f32.mrf.mxu0  ;;  %v9397_v54 = vadd.f32 %v7126_v10, %v4013_v35  ;;  %v4011_v57 = vadd.f32 %v3944_v41, %v9280_v37 }
 0x349   : > { %v7093_v19 = vpop.f32.mrf.mxu1 }
 0x34a   : > { %v7127_v34 = vpop.f32.mrf.mxu0  ;;  %v9400_v27 = vadd.f32 %v4238_v42, %v4011_v57  ;;  %v4014_v8 = vadd.f32 %v7093_v19, %v9282_v58  ;;  %v5525_v58 = vld [vmem:[#allocation3 + $0x1a2] sm:$0xff] }
 0x34b   : > { %v3947_v15 = vpop.f32.mrf.mxu1  ;;  %v5541_v39 = vpack.c.bf16 %v5525_v58, %v5524_v51 }
 0x34c   : > { %v4241_v44 = vpop.f32.mrf.mxu0  ;;  %v9403_v32 = vadd.f32 %v7127_v34, %v4014_v8  ;;  %v4012_v49 = vadd.f32 %v3947_v15, %v9284_v40 }
 0x34d   : > { %v7096_v2 = vpop.f32.mrf.mxu1  ;;  %7299 = vmatmul.mubr.msk.bf16.gmra.mxu1 %vm313_vm1, %v5539_v24 }
 0x34e   : > { %v7130_v23 = vpop.f32.mrf.mxu0  ;;  %v9407_v37 = vadd.f32 %v4241_v44, %v4012_v49  ;;  %v4017_v4 = vadd.f32 %v7096_v2, %v9290_v43  ;;  %7302 = vmatprep.mubr.msk.bf16.mxu1 %vm313_vm1, %v9179_v61 }
 0x34f   : > { %v3960_v1 = vpop.f32.mrf.mxu1 }
 0x350   : > { %v4254_v31 = vpop.f32.mrf.mxu0  ;;  %v9412_v55 = vadd.f32 %v7130_v23, %v4017_v4  ;;  %v4015_v47 = vadd.f32 %v3960_v1, %v9296_v33 }
 0x351   : > { %v7097_v40 = vpop.f32.mrf.mxu1 }
 0x352   : > { %v7131_v53 = vpop.f32.mrf.mxu0  ;;  %v9415_v9 = vadd.f32 %v4254_v31, %v4015_v47  ;;  %v4018_v63 = vadd.f32 %v7097_v40, %v9298_v20 }
 0x353   : > { %v3963_v21 = vpop.f32.mrf.mxu1 }
 0x354   : > { %v4257_v43 = vpop.f32.mrf.mxu0  ;;  %v9418_v17 = vadd.f32 %v7131_v53, %v4018_v63  ;;  %v4016_v61 = vadd.f32 %v3963_v21, %v9300_v14 }
 0x355   : > { %v7100_v5 = vpop.f32.mrf.mxu1  ;;  %7303 = vmatmul.mubr.msk.bf16.gmra.mxu1 %vm313_vm1, %v5541_v39 }
 0x356   : > { %v7134_v10 = vpop.f32.mrf.mxu0  ;;  %v9422_v35 = vadd.f32 %v4257_v43, %v4016_v61  ;;  %v4021_v33 = vadd.f32 %v7100_v5, %v9304_v59 }
 0x357   : > { %v3976_v41 = vpop.f32.mrf.mxu1 }
 0x358   : > { %v4270_v42 = vpop.f32.mrf.mxu0  ;;  %v9425_v57 = vadd.f32 %v7134_v10, %v4021_v33  ;;  %v4019_v20 = vadd.f32 %v3976_v41, %v9308_v30 }
 0x359   : > { %v7101_v60 = vpop.f32.mrf.mxu1 }
 0x35a   : > { %v7135_v45 = vpop.f32.mrf.mxu0  ;;  %v9428_v19 = vadd.f32 %v4270_v42, %v4019_v20  ;;  %v4022_v14 = vadd.f32 %v7101_v60, %v9310_v26 }
 0x35b   : > { %v3979_v34 = vpop.f32.mrf.mxu1 }
 0x35c   : > { %v4273_v8 = vpop.f32.mrf.mxu0  ;;  %v9431_v15 = vadd.f32 %v7135_v45, %v4022_v14  ;;  %v4020_v44 = vadd.f32 %v3979_v34, %v9312_v62 }
 0x35d   : > { %v7140_v24 = vpop.f32.mrf.mxu1 }
 0x35e   : > { %v9434_v59 = vpop.f32.mrf.mxu0  ;;  %v9436_v49 = vadd.f32 %v4273_v8, %v4020_v44  ;;  %v9439_v2 = vadd.f32 %v7140_v24, %v9319_v16 }
 0x35f   : > { %v4452_v30 = vpop.f32.mrf.mxu1 }
 0x360   : > { %v9441_v23 = vpop.f32.mrf.mxu0  ;;  %v9444_v4 = vadd.f32 %v4452_v30, %v9322_v6 }
 0x361   : > { %v7141_v26 = vpop.f32.mrf.mxu1 }
 0x362   : > { %v9446_v51 = vpop.f32.mrf.mxu0  ;;  %v9449_v58 = vadd.f32 %v7141_v26, %v9325_v18 }
 0x363   : > { %v4455_v62 = vpop.f32.mrf.mxu1 }
 0x364   : > { %v9451_v1 = vpop.f32.mrf.mxu0  ;;  %v9454_v31 = vadd.f32 %v4455_v62, %v9330_v29 }
 0x365   : > { %v7144_v16 = vpop.f32.mrf.mxu1 }
 0x366   : > { %v9456_v47 = vpop.f32.mrf.mxu0  ;;  %v9459_v40 = vadd.f32 %v7144_v16, %v9335_v3 }
 0x367   : > { %v4468_v6 = vpop.f32.mrf.mxu1 }
 0x368   : > { %v9461_v53 = vpop.f32.mrf.mxu0  ;;  %v9464_v39 = vadd.f32 %v4468_v6, %v9338_v13 }
 0x369   : > { %v7145_v18 = vpop.f32.mrf.mxu1 }
 0x36a   : > { %v9466_v63 = vpop.f32.mrf.mxu0  ;;  %v9469_v21 = vadd.f32 %v7145_v18, %v9341_v46 }
 0x36b   : > { %v4471_v29 = vpop.f32.mrf.mxu1 }
 0x36c   : > { %v9471_v43 = vpop.f32.mrf.mxu0  ;;  %v9474_v61 = vadd.f32 %v4471_v29, %v9346_v50 }
 0x36d   : > { %v7148_v3 = vpop.f32.mrf.mxu1 }
 0x36e   : > { %v9476_v5 = vpop.f32.mrf.mxu0  ;;  %v9479_v10 = vadd.f32 %v7148_v3, %v9351_v52 }
 0x36f   : > { %v4484_v13 = vpop.f32.mrf.mxu1 }
 0x370   : > { %v9481_v33 = vpop.f32.mrf.mxu0  ;;  %v9484_v41 = vadd.f32 %v4484_v13, %v9354_v38 }
 0x371   : > { %v7149_v46 = vpop.f32.mrf.mxu1 }
 0x372   : > { %v9486_v42 = vpop.f32.mrf.mxu0  ;;  %v9489_v20 = vadd.f32 %v7149_v46, %v9357_v7 }
 0x373   : > { %v4487_v50 = vpop.f32.mrf.mxu1 }
 0x374   : > { %v9491_v60 = vpop.f32.mrf.mxu0  ;;  %v9494_v45 = vadd.f32 %v4487_v50, %v9362_v12 }
 0x375   : > { %v7152_v52 = vpop.f32.mrf.mxu1 }
 0x376   : > { %v9496_v14 = vpop.f32.mrf.mxu0  ;;  %v9499_v34 = vadd.f32 %v7152_v52, %v9367_v25 }
 0x377   : > { %v4500_v38 = vpop.f32.mrf.mxu1 }
 0x378   : > { %v9501_v8 = vpop.f32.mrf.mxu0  ;;  %v9504_v44 = vadd.f32 %v4500_v38, %v9370_v11 }
 0x379   : > { %v7153_v7 = vpop.f32.mrf.mxu1 }
 0x37a   : > { %v9506_v24 = vpop.f32.mrf.mxu0  ;;  %v9509_v30 = vadd.f32 %v7153_v7, %v9373_v22 }
 0x37b   : > { %v4503_v12 = vpop.f32.mrf.mxu1 }
 0x37c   : > { %v9511_v26 = vpop.f32.mrf.mxu0  ;;  %v9514_v62 = vadd.f32 %v4503_v12, %v9378_v56 }
 0x37d   : > { %v7156_v25 = vpop.f32.mrf.mxu1 }
 0x37e   : > { %v9516_v16 = vpop.f32.mrf.mxu0  ;;  %v9519_v6 = vadd.f32 %v7156_v25, %v9383_v28 }
 0x37f   : > { %v4516_v11 = vpop.f32.mrf.mxu1 }
 0x380   : > { %v9521_v18 = vpop.f32.mrf.mxu0  ;;  %v9524_v29 = vadd.f32 %v4516_v11, %v9386_v0 }
 0x381   : > { %v7157_v22 = vpop.f32.mrf.mxu1 }
 0x382   : > { %v9526_v3 = vpop.f32.mrf.mxu0  ;;  %v9529_v13 = vadd.f32 %v7157_v22, %v9389_v36 }
 0x383   : > { %v4519_v56 = vpop.f32.mrf.mxu1 }
 0x384   : > { %v9531_v46 = vpop.f32.mrf.mxu0  ;;  %v9534_v50 = vadd.f32 %v4519_v56, %v9393_v48 }
 0x385   : > { %v7160_v28 = vpop.f32.mrf.mxu1 }
 0x386   : > { %v9536_v52 = vpop.f32.mrf.mxu0  ;;  %v9539_v38 = vadd.f32 %v7160_v28, %v9397_v54 }
 0x387   : > { %v4532_v0 = vpop.f32.mrf.mxu1 }
 0x388   : > { %v9541_v7 = vpop.f32.mrf.mxu0  ;;  %v9544_v12 = vadd.f32 %v4532_v0, %v9400_v27 }
 0x389   : > { %10241 = vst [vmem:[#allocation5_spill] sm:$0xff] %v9541_v7  ;;  %v7161_v36 = vpop.f32.mrf.mxu1 }
 0x38a   : > { %v9546_v25 = vpop.f32.mrf.mxu0  ;;  %v9549_v11 = vadd.f32 %v7161_v36, %v9403_v32 }
 0x38b   : > { %10242 = vst [vmem:[#allocation6_spill] sm:$0xff] %v9546_v25  ;;  %v4535_v48 = vpop.f32.mrf.mxu1 }
 0x38c   : > { %v9551_v22 = vpop.f32.mrf.mxu0  ;;  %v9554_v56 = vadd.f32 %v4535_v48, %v9407_v37 }
 0x38d   : > { %10243 = vst [vmem:[#allocation7_spill] sm:$0xff] %v9551_v22  ;;  %v7164_v54 = vpop.f32.mrf.mxu1 }
 0x38e   : > { %v9556_v28 = vpop.f32.mrf.mxu0  ;;  %v9559_v7 = vadd.f32 %v7164_v54, %v9412_v55 }
 0x38f   : > { %10244 = vst [vmem:[#allocation8_spill] sm:$0xff] %v9556_v28  ;;  %v4548_v27 = vpop.f32.mrf.mxu1 }
 0x390   : > { %v9561_v0 = vpop.f32.mrf.mxu0  ;;  %v9564_v25 = vadd.f32 %v4548_v27, %v9415_v9 }
 0x391   : > { %10245 = vst [vmem:[#allocation9_spill] sm:$0xff] %v9561_v0  ;;  %v7165_v32 = vpop.f32.mrf.mxu1 }
 0x392   : > { %10246 = vst [vmem:[#allocation10_spill] sm:$0xff] %v9564_v25  ;;  %v9566_v36 = vpop.f32.mrf.mxu0  ;;  %v9569_v22 = vadd.f32 %v7165_v32, %v9418_v17 }
 0x393   : > { %10247 = vst [vmem:[#allocation11_spill] sm:$0xff] %v9566_v36  ;;  %v4551_v37 = vpop.f32.mrf.mxu1 }
 0x394   : > { %10248 = vst [vmem:[#allocation12_spill] sm:$0xff] %v9569_v22  ;;  %v9571_v48 = vpop.f32.mrf.mxu0  ;;  %v9574_v28 = vadd.f32 %v4551_v37, %v9422_v35 }
 0x395   : > { %10249 = vst [vmem:[#allocation13_spill] sm:$0xff] %v9571_v48  ;;  %v7168_v55 = vpop.f32.mrf.mxu1 }
 0x396   : > { %10250 = vst [vmem:[#allocation14_spill] sm:$0xff] %v9574_v28  ;;  %v9576_v54 = vpop.f32.mrf.mxu0  ;;  %v9579_v0 = vadd.f32 %v7168_v55, %v9425_v57 }
 0x397   : > { %10251 = vst [vmem:[#allocation15_spill] sm:$0xff] %v9576_v54  ;;  %v4564_v9 = vpop.f32.mrf.mxu1 }
 0x398   : > { %10252 = vst [vmem:[#allocation16_spill] sm:$0xff] %v9579_v0  ;;  %v9581_v27 = vpop.f32.mrf.mxu0  ;;  %v9584_v36 = vadd.f32 %v4564_v9, %v9428_v19 }
 0x399   : > { %10253 = vst [vmem:[#allocation17_spill] sm:$0xff] %v9581_v27  ;;  %v7169_v17 = vpop.f32.mrf.mxu1 }
 0x39a   : > { %10254 = vst [vmem:[#allocation18_spill] sm:$0xff] %v9584_v36  ;;  %v9586_v32 = vpop.f32.mrf.mxu0  ;;  %v9589_v48 = vadd.f32 %v7169_v17, %v9431_v15 }
 0x39b   : > { %10255 = vst [vmem:[#allocation19_spill] sm:$0xff] %v9586_v32  ;;  %v4567_v35 = vpop.f32.mrf.mxu1 }
 0x39c   : > { %10256 = vst [vmem:[#allocation20_spill] sm:$0xff] %v9589_v48  ;;  %v9591_v37 = vpop.f32.mrf.mxu0  ;;  %v9594_v54 = vadd.f32 %v4567_v35, %v9436_v49 }
 0x39d   : > { %10257 = vst [vmem:[#allocation21_spill] sm:$0xff] %v9591_v37  ;;  %v7208_v57 = vpop.f32.mrf.mxu1 }
 0x39e   : > { %10258 = vst [vmem:[#allocation22_spill] sm:$0xff] %v9594_v54  ;;  %v9596_v55 = vpop.f32.mrf.mxu0 }
 0x39f   : > { %v5041_v0 = vpop.f32.mrf.mxu1 }
 0x3a0   : > { %v9598_v27 = vpop.f32.mrf.mxu0 }
 0x3a1   : > { %v7209_v19 = vpop.f32.mrf.mxu1 }
 0x3a2   : > { %v9602_v36 = vpop.f32.mrf.mxu0 }
 0x3a3   : > { %v9600_v9 = vpop.f32.mrf.mxu1 }
 0x3a4   : > { %v9608_v17 = vpop.f32.mrf.mxu0 }
 0x3a5   : > { %v9604_v32 = vpop.f32.mrf.mxu1  ;;  %10261 = vst [vmem:[#allocation25_spill] sm:$0xff] %v9608_v17 }
 0x3a6   : > { %10259 = vst [vmem:[#allocation24_spill] sm:$0xff] %v9604_v32  ;;  %v9614_v35 = vpop.f32.mrf.mxu0 }
 0x3a7   : > { %v9606_v15 = vpop.f32.mrf.mxu1  ;;  %10264 = vst [vmem:[#allocation28_spill] sm:$0xff] %v9614_v35 }
 0x3a8   : > { %10260 = vst [vmem:[#allocation23_spill] sm:$0xff] %v9606_v15  ;;  %v9620_v28 = vpop.f32.mrf.mxu0 }
 0x3a9   : > { %v9610_v37 = vpop.f32.mrf.mxu1  ;;  %10267 = vst [vmem:[#allocation30_spill] sm:$0xff] %v9620_v28 }
 0x3aa   : > { %10262 = vst [vmem:[#allocation26_spill] sm:$0xff] %v9610_v37  ;;  %v9626_v32 = vpop.f32.mrf.mxu0 }
 0x3ab   : > { %v9612_v49 = vpop.f32.mrf.mxu1  ;;  %10270 = vst [vmem:[#allocation32_spill] sm:$0xff] %v9626_v32 }
 0x3ac   : > { %10263 = vst [vmem:[#allocation27_spill] sm:$0xff] %v9612_v49  ;;  %v9632_v37 = vpop.f32.mrf.mxu0 }
 0x3ad   : > { %v9616_v54 = vpop.f32.mrf.mxu1  ;;  %10273 = vst [vmem:[#allocation35_spill] sm:$0xff] %v9632_v37 }
 0x3ae   : > { %10265 = vst [vmem:[#allocation29_spill] sm:$0xff] %v9616_v54  ;;  %v9638_v54 = vpop.f32.mrf.mxu0 }
 0x3af   : > { %v9618_v48 = vpop.f32.mrf.mxu1  ;;  %10276 = vst [vmem:[#allocation48_spill] sm:$0xff] %v9638_v54 }
 0x3b0   : > { %10266 = vst [vmem:[#allocation36_spill] sm:$0xff] %v9618_v48 }
 0x3b1   : > { %v9622_v22 = vpop.f32.mrf.mxu1 }
 0x3b2   : > { %10268 = vst [vmem:[#allocation31_spill] sm:$0xff] %v9622_v22  ;;  %v9644_v22 = vpop.f32.mrf.mxu0 }
 0x3b3   : > { %v9624_v25 = vpop.f32.mrf.mxu1  ;;  %10279 = vst [vmem:[#allocation39_spill] sm:$0xff] %v9644_v22 }
 0x3b4   : > { %10269 = vst [vmem:[#allocation46_spill] sm:$0xff] %v9624_v25 }
 0x3b5   : > { %v9628_v15 = vpop.f32.mrf.mxu1 }
 0x3b6   : > { %10271 = vst [vmem:[#allocation33_spill] sm:$0xff] %v9628_v15  ;;  %v9650_v15 = vpop.f32.mrf.mxu0 }
 0x3b7   : > { %v9630_v17 = vpop.f32.mrf.mxu1  ;;  %10282 = vst [vmem:[#allocation50_spill] sm:$0xff] %v9650_v15 }
 0x3b8   : > { %10272 = vst [vmem:[#allocation34_spill] sm:$0xff] %v9630_v17 }
 0x3b9   : > { %v9634_v49 = vpop.f32.mrf.mxu1 }
 0x3ba   : > { %10274 = vst [vmem:[#allocation47_spill] sm:$0xff] %v9634_v49  ;;  %v9656_v49 = vpop.f32.mrf.mxu0 }
 0x3bb   : > { %v9636_v35 = vpop.f32.mrf.mxu1 }
 0x3bc   : > { %10275 = vst [vmem:[#allocation49_spill] sm:$0xff] %v9636_v35 }
 0x3bd   : > { %v9640_v48 = vpop.f32.mrf.mxu1 }
 0x3be   : > { %10277 = vst [vmem:[#allocation37_spill] sm:$0xff] %v9640_v48  ;;  %v9662_v48 = vpop.f32.mrf.mxu0 }
 0x3bf   : > { %v9642_v28 = vpop.f32.mrf.mxu1  ;;  %10287 = vst [vmem:[#allocation57_spill] sm:$0xff] %v9662_v48 }
 0x3c0   : > { %10278 = vst [vmem:[#allocation38_spill] sm:$0xff] %v9642_v28 }
 0x3c1   : > { %v9646_v25 = vpop.f32.mrf.mxu1 }
 0x3c2   : > { %10280 = vst [vmem:[#allocation40_spill] sm:$0xff] %v9646_v25  ;;  %v9668_v25 = vpop.f32.mrf.mxu0 }
 0x3c3   : > { %v9648_v32 = vpop.f32.mrf.mxu1 }
 0x3c4   : > { %10281 = vst [vmem:[#allocation41_spill] sm:$0xff] %v9648_v32 }
 0x3c5   : > { %v9652_v17 = vpop.f32.mrf.mxu1 }
 0x3c6   : > { %10283 = vst [vmem:[#allocation44_spill] sm:$0xff] %v9652_v17  ;;  %v9674_v17 = vpop.f32.mrf.mxu0 }
 0x3c7   : > { %v9654_v37 = vpop.f32.mrf.mxu1  ;;  %10292 = vst [vmem:[#allocation61_spill] sm:$0xff] %v9674_v17 }
 0x3c8   : > { %10284 = vst [vmem:[#allocation51_spill] sm:$0xff] %v9654_v37 }
 0x3c9   : > { %v9658_v35 = vpop.f32.mrf.mxu1 }
 0x3ca   : > { %10285 = vst [vmem:[#allocation54_spill] sm:$0xff] %v9658_v35  ;;  %v4875_v35 = vadd.f32 %v9434_v59, %v9439_v2  ;;  %v4877_v59 = vadd.f32 %v9461_v53, %v9464_v39  ;;  %v4880_v2 = vadd.f32 %v9466_v63, %v9469_v21  ;;  %v9724_v53 = vadd.f32 %v9501_v8, %v9504_v44  ;;  %v10294_v8 = vld [vmem:[#allocation5_spill] sm:$0xff] }
 0x3cb   : > { %v9660_v54 = vpop.f32.mrf.mxu1  ;;  %v9766_v44 = vadd.f32 %v10294_v8, %v9544_v12  ;;  %v5788_v8 = vld [vmem:[%s7596_s15] sm:$0xff] }
 0x3cc   : > { %10286 = vst [vmem:[#allocation52_spill] sm:$0xff] %v9660_v54  ;;  %v5170_v48 = vadd.f32 %v7208_v57, %v4875_v35 }
 0x3cd   : > { %v9664_v28 = vpop.f32.mrf.mxu1 }
 0x3ce   : > { %10288 = vst [vmem:[#allocation53_spill] sm:$0xff] %v9664_v28  ;;  %v4873_v28 = vadd.f32 %v9441_v23, %v9444_v4  ;;  %v4878_v23 = vadd.f32 %v9471_v43, %v9474_v61  ;;  %v5464_v39 = vadd.f32 %v9596_v55, %v5170_v48  ;;  %v9731_v43 = vadd.f32 %v9506_v24, %v9509_v30  ;;  %v10295_v24 = vld [vmem:[#allocation6_spill] sm:$0xff] }
 0x3cf   : > { %v9666_v22 = vpop.f32.mrf.mxu1  ;;  %v9735_v61 = vadd.f32 %v9511_v26, %v9514_v62  ;;  %v9770_v30 = vadd.f32 %v10295_v24, %v9549_v11  ;;  %v9775_v26 = vld [vmem:[%s10086_s6] ss:$0 sm:$0xff]  ;;  %v5790_v48 = vld [vmem:[%s7596_s15 + $0x10] sm:$0xff] }
 0x3d0   : > { %10289 = vst [vmem:[#allocation55_spill] sm:$0xff] %v9666_v22  ;;  %v9684_v22 = vpop.f32.mrf.mxu0  ;;  %v5168_v4 = vadd.f32 %v5041_v0, %v4873_v28  ;;  %v10300_v11 = vld [vmem:[#allocation12_spill] sm:$0xff]  ;;  %v10301_v28 = vld [vmem:[#allocation11_spill] sm:$0xff] }
 0x3d1   : > { %v9670_v32 = vpop.f32.mrf.mxu1  ;;  %v10302_v0 = vld [vmem:[#allocation24_spill] sm:$0xff] }
 0x3d2   : > { %10290 = vst [vmem:[#allocation42_spill] sm:$0xff] %v9670_v32  ;;  %v4876_v32 = vadd.f32 %v9446_v51, %v9449_v58  ;;  %v9702_v51 = vadd.f32 %v9476_v5, %v9479_v10  ;;  %v9706_v58 = vadd.f32 %v9481_v33, %v9484_v41  ;;  %v9727_v21 = vpop.f32.mrf.mxu0  ;;  %v9739_v5 = vadd.f32 %v9516_v16, %v9519_v6  ;;  %v9748_v33 = vld [vmem:[%s10085_s5] ss:$0 sm:$0xff]  ;;  %v10296_v16 = vld [vmem:[#allocation7_spill] sm:$0xff] }
 0x3d3   : > { %v9672_v15 = vpop.f32.mrf.mxu1  ;;  %v9743_v10 = vadd.f32 %v9521_v18, %v9524_v29  ;;  %v9779_v6 = vadd.f32 %v10296_v16, %v9554_v56  ;;  %v9795_v56 = vadd.f32 %v10301_v28, %v10300_v11 }
 0x3d4   : > { %10291 = vst [vmem:[#allocation43_spill] sm:$0xff] %v9672_v15  ;;  %v4874_v15 = vadd.f32 %v9451_v1, %v9454_v31  ;;  %v9710_v1 = vadd.f32 %v9486_v42, %v9489_v20  ;;  %v9714_v31 = vadd.f32 %v9491_v60, %v9494_v45  ;;  %v5171_v63 = vadd.f32 %v7209_v19, %v4876_v32  ;;  %v9782_v29 = vpop.f32.mrf.mxu0  ;;  %v10303_v32 = vld [vmem:[#allocation25_spill] sm:$0xff] }
 0x3d5   : > { %v9676_v37 = vpop.f32.mrf.mxu1  ;;  %v9752_v42 = vadd.f32 %v9526_v3, %v9529_v13  ;;  %v5462_v20 = vadd.f32 %v9598_v27, %v5168_v4  ;;  %v10306_v4 = vld [vmem:[#allocation16_spill] sm:$0xff] }
 0x3d6   : > { %10293 = vst [vmem:[#allocation56_spill] sm:$0xff] %v9676_v37  ;;  %v4879_v37 = vadd.f32 %v9456_v47, %v9459_v40  ;;  %v9720_v40 = vadd.f32 %v9496_v14, %v9499_v34  ;;  %v5169_v60 = vadd.f32 %v9600_v9, %v4874_v15  ;;  %v9758_v14 = vadd.f32 %v9531_v46, %v9534_v50  ;;  %v10297_v46 = vld [vmem:[#allocation8_spill] sm:$0xff]  ;;  %v10304_v9 = vld [vmem:[#allocation14_spill] sm:$0xff]  ;;  %v10305_v15 = vld [vmem:[#allocation13_spill] sm:$0xff]  ;;  %v9813_v24 = vpop.f32.mrf.mxu0 }
 0x3d7   : > { %v9680_v54 = vpop.f32.mrf.mxu1  ;;  %v9762_v34 = vadd.f32 %v9536_v52, %v9539_v38  ;;  %v5465_v18 = vadd.f32 %v9602_v36, %v5171_v63  ;;  %v9787_v50 = vadd.f32 %v10297_v46, %v9559_v7  ;;  %v10298_v52 = vld [vmem:[#allocation10_spill] sm:$0xff]  ;;  %v10299_v38 = vld [vmem:[#allocation9_spill] sm:$0xff]  ;;  %v9804_v35 = vadd.f32 %v10305_v15, %v10304_v9 }
 0x3d8   : > { %v9791_v12 = vadd.f32 %v10299_v38, %v10298_v52  ;;  %v5174_v36 = vadd.f32 %v10302_v0, %v4879_v37  ;;  %v5463_v57 = vadd.f32 %v10303_v32, %v5169_v60  ;;  %v10311_v46 = vld [vmem:[#allocation17_spill] sm:$0xff]  ;;  %v10312_v38 = vld [vmem:[#allocation20_spill] sm:$0xff]  ;;  %v10315_v0 = vld [vmem:[#allocation27_spill] sm:$0xff] }
 0x3d9   : > { %v9692_v17 = vpop.f32.mrf.mxu1  ;;  %v10316_v9 = vld [vmem:[#allocation30_spill] sm:$0xff] }
 0x3db   : > { %v9716_v47 = vpop.f32.mrf.mxu1 }
 0x3dd   : > { %v7276_v41 = vpop.f32.mrf.mxu1 }
 0x3de   : > { %v5758_v45 = vadd.f32 %v7276_v41, %v5464_v39  ;;  %v10307_v39 = vld [vmem:[#allocation15_spill] sm:$0xff] }
 0x3df   : > { %v5629_v62 = vpop.f32.mrf.mxu1  ;;  %v9808_v63 = vadd.f32 %v10307_v39, %v10306_v4  ;;  %v10308_v41 = vld [vmem:[#allocation23_spill] sm:$0xff]  ;;  %v10317_v4 = vld [vmem:[#allocation32_spill] sm:$0xff] }
 0x3e0   : > { %v5822_v3 = vmul.f32 %v9748_v33, %v5758_v45  ;;  %v5756_v13 = vadd.f32 %v5629_v62, %v5462_v20  ;;  %v5172_v37 = vadd.f32 %v10308_v41, %v4877_v59  ;;  %v10309_v20 = vld [vmem:[#allocation26_spill] sm:$0xff]  ;;  %v10313_v59 = vld [vmem:[#allocation19_spill] sm:$0xff]  ;;  %v10318_v41 = vld [vmem:[#allocation29_spill] sm:$0xff] }
 0x3e1   : > { %v7277_v27 = vpop.f32.mrf.mxu1  ;;  %v5175_v45 = vadd.f32 %v10309_v20, %v4880_v2  ;;  %v9823_v11 = vadd.f32 %v10313_v59, %v10312_v38  ;;  %v10314_v2 = vld [vmem:[#allocation28_spill] sm:$0xff]  ;;  %v5178_v20 = vadd.f32 %v10318_v41, %v9702_v51 }
 0x3e2   : > { %v5854_v55 = vadd.f32 %v9775_v26, %v5822_v3  ;;  %v5820_v19 = vmul.f32 %v9748_v33, %v5756_v13  ;;  %v5759_v7 = vadd.f32 %v7277_v27, %v5465_v18  ;;  %v10310_v13 = vld [vmem:[#allocation18_spill] sm:$0xff]  ;;  %v5468_v28 = vadd.f32 %v10314_v2, %v5174_v36 }
 0x3e3   : > { %v5632_v60 = vpop.f32.mrf.mxu1  ;;  %v9819_v52 = vadd.f32 %v10311_v46, %v10310_v13  ;;  %v5173_v27 = vadd.f32 %v10315_v0, %v4878_v23  ;;  %v5466_v15 = vadd.f32 %v10316_v9, %v5172_v37  ;;  %v5469_v39 = vadd.f32 %v10317_v4, %v5175_v45  ;;  %v5789_v23 = vld [vmem:[%s7596_s15 + $0x8] sm:$0xff] }
 0x3e4   : > { %v5886_v62 = vadd.f32 %v5854_v55, %v5790_v48  ;;  %v5852_v16 = vadd.f32 %v9775_v26, %v5820_v19  ;;  %v5823_v18 = vmul.f32 %v9748_v33, %v5759_v7  ;;  %v5757_v3 = vadd.f32 %v5632_v60, %v5463_v57  ;;  %v5791_v48 = vld [vmem:[%s7596_s15 + $0x18] sm:$0xff]  ;;  %v9842_v60 = vpop.f32.mrf.mxu0 }
 0x3e5   : > { %v7280_v32 = vpop.f32.mrf.mxu1 }
 0x3e6   : > { %v5918_v55 = vmax.f32 %v5886_v62, 0.0  ;;  %v5884_v19 = vadd.f32 %v5852_v16, %v5788_v8  ;;  %v5855_v7 = vadd.f32 %v9775_v26, %v5823_v18  ;;  %v5821_v57 = vmul.f32 %v9748_v33, %v5757_v3  ;;  %v10319_v18 = vld [vmem:[#allocation35_spill] sm:$0xff]  ;;  %v10320_v3 = vld [vmem:[#allocation36_spill] sm:$0xff] }
 0x3e7   : > { %v5762_v36 = vadd.f32 %v7280_v32, %v5468_v28  ;;  %v5645_v8 = vpop.f32.mrf.mxu1  ;;  %v5467_v51 = vadd.f32 %v10319_v18, %v5173_v27  ;;  %v5176_v13 = vadd.f32 %v10320_v3, %v9706_v58  ;;  %v5794_v32 = vld [vmem:[%s7596_s15 + $0x30] sm:$0xff]  ;;  %v10322_v27 = vld [vmem:[#allocation31_spill] sm:$0xff] }
 0x3e8   : > { %v5950_v62 = vmin.f32 %v5918_v55, 20.0  ;;  %v5916_v37 = vmax.f32 %v5884_v19, 0.0  ;;  %v5887_v16 = vadd.f32 %v5855_v7, %v5791_v48  ;;  %v5853_v45 = vadd.f32 %v9775_v26, %v5821_v57  ;;  %v10321_v55 = vld [vmem:[#allocation48_spill] sm:$0xff] }
 0x3e9   : > { %v5826_v46 = vmul.f32 %v9748_v33, %v5762_v36  ;;  %v5760_v38 = vadd.f32 %v5645_v8, %v5466_v15  ;;  %v7281_v59 = vpop.f32.mrf.mxu1  ;;  %v5472_v19 = vadd.f32 %v10321_v55, %v5178_v20  ;;  %v5179_v7 = vadd.f32 %v10322_v27, %v9710_v1  ;;  %v9857_v15 = vpop.f32.mrf.mxu0  ;;  %v10323_v36 = vld [vmem:[#allocation39_spill] sm:$0xff]  ;;  %v10324_v1 = vld [vmem:[#allocation46_spill] sm:$0xff] }
 0x3ea   : > { %5982 = vst.msk [vmem:[%s9839_s16 + $0x10] sm:$0xff] %vm313_vm1, %v5950_v62  ;;  %v5948_v2 = vmin.f32 %v5916_v37, 20.0  ;;  %v5919_v28 = vmax.f32 %v5887_v16, 0.0  ;;  %v5885_v0 = vadd.f32 %v5853_v45, %v5789_v23  ;;  %v5763_v48 = vadd.f32 %v7281_v59, %v5469_v39  ;;  %v5792_v23 = vld [vmem:[%s7596_s15 + $0x20] sm:$0xff]  ;;  %v5795_v45 = vld [vmem:[%s7596_s15 + $0x38] sm:$0xff]  ;;  %v10325_v59 = vld [vmem:[#allocation50_spill] sm:$0xff] }
 0x3eb   : > { %v5858_v58 = vadd.f32 %v9775_v26, %v5826_v46  ;;  %v5824_v57 = vmul.f32 %v9748_v33, %v5760_v38  ;;  %v5648_v9 = vpop.f32.mrf.mxu1  ;;  %v5470_v8 = vadd.f32 %v10323_v36, %v5176_v13  ;;  %v5177_v62 = vadd.f32 %v10324_v1, %v9714_v31  ;;  %v10326_v13 = vld [vmem:[#allocation33_spill] sm:$0xff]  ;;  %v9876_v55 = vpop.f32.mrf.mxu0 }
 0x3ec   : > { %5980 = vst.msk [vmem:[%s9839_s16] sm:$0xff] %vm313_vm1, %v5948_v2  ;;  %v5951_v4 = vmin.f32 %v5919_v28, 20.0  ;;  %v5917_v41 = vmax.f32 %v5885_v0, 0.0  ;;  %v5827_v39 = vmul.f32 %v9748_v33, %v5763_v48  ;;  %v5761_v20 = vadd.f32 %v5648_v9, %v5467_v51 }
 0x3ed   : > { %v5890_v37 = vadd.f32 %v5858_v58, %v5794_v32  ;;  %v5856_v16 = vadd.f32 %v9775_v26, %v5824_v57  ;;  %v7284_v18 = vpop.f32.mrf.mxu1  ;;  %v5473_v2 = vadd.f32 %v10325_v59, %v5179_v7  ;;  %v5182_v31 = vadd.f32 %v10326_v13, %v9720_v40  ;;  %v5793_v32 = vld [vmem:[%s7596_s15 + $0x28] sm:$0xff]  ;;  %v10327_v40 = vld [vmem:[#allocation34_spill] sm:$0xff] }
 0x3ee   : > { %5983 = vst.msk [vmem:[%s9839_s16 + $0x18] sm:$0xff] %vm313_vm1, %v5951_v4  ;;  %v5949_v3 = vmin.f32 %v5917_v41, 20.0  ;;  %v5859_v46 = vadd.f32 %v9775_v26, %v5827_v39  ;;  %v5825_v38 = vmul.f32 %v9748_v33, %v5761_v20  ;;  %v5766_v51 = vadd.f32 %v7284_v18, %v5472_v19 }
 0x3ef   : > { %v5922_v28 = vmax.f32 %v5890_v37, 0.0  ;;  %v5888_v0 = vadd.f32 %v5856_v16, %v5792_v23  ;;  %v5661_v48 = vpop.f32.mrf.mxu1  ;;  %v5471_v57 = vadd.f32 %v9656_v49, %v5177_v62  ;;  %v5180_v9 = vadd.f32 %v10327_v40, %v9724_v53  ;;  %v5798_v23 = vld [vmem:[%s7596_s15 + $0x50] sm:$0xff]  ;;  %v10328_v16 = vld [vmem:[#allocation57_spill] sm:$0xff]  ;;  %v5796_v53 = vld [vmem:[%s7596_s15 + $0x40] sm:$0xff] }
 0x3f0   : > { %5981 = vst.msk [vmem:[%s9839_s16 + $0x8] sm:$0xff] %vm313_vm1, %v5949_v3  ;;  %v5891_v27 = vadd.f32 %v5859_v46, %v5795_v45  ;;  %v5857_v58 = vadd.f32 %v9775_v26, %v5825_v38  ;;  %v5830_v19 = vmul.f32 %v9748_v33, %v5766_v51  ;;  %v5764_v7 = vadd.f32 %v5661_v48, %v5470_v8  ;;  %v10329_v8 = vld [vmem:[#allocation47_spill] sm:$0xff]  ;;  %v9894_v46 = vpop.f32.mrf.mxu0  ;;  %v10331_v40 = vld [vmem:[#allocation61_spill] sm:$0xff] }
 0x3f1   : > { %v5954_v4 = vmin.f32 %v5922_v28, 20.0  ;;  %v5920_v41 = vmax.f32 %v5888_v0, 0.0  ;;  %v7285_v39 = vpop.f32.mrf.mxu1  ;;  %v5476_v45 = vadd.f32 %v10328_v16, %v5182_v31  ;;  %v5183_v18 = vadd.f32 %v10329_v8, %v9731_v43  ;;  %v10330_v28 = vld [vmem:[#allocation49_spill] sm:$0xff] }
 0x3f2   : > { %v5923_v20 = vmax.f32 %v5891_v27, 0.0  ;;  %v5889_v36 = vadd.f32 %v5857_v58, %v5793_v32  ;;  %v5862_v1 = vadd.f32 %v9775_v26, %v5830_v19  ;;  %v5828_v37 = vmul.f32 %v9748_v33, %v5764_v7  ;;  %v5799_v19 = vld [vmem:[%s7596_s15 + $0x58] sm:$0xff] }
 0x3f3   : > { %5986 = vst.msk [vmem:[%s9839_s16 + $0x30] sm:$0xff] %vm313_vm1, %v5954_v4  ;;  %v5952_v49 = vmin.f32 %v5920_v41, 20.0  ;;  %v5767_v62 = vadd.f32 %v7285_v39, %v5473_v2  ;;  %v5664_v3 = vpop.f32.mrf.mxu1  ;;  %v5474_v31 = vadd.f32 %v9668_v25, %v5180_v9  ;;  %v5181_v43 = vadd.f32 %v10330_v28, %v9735_v61  ;;  %v10332_v9 = vld [vmem:[#allocation37_spill] sm:$0xff]  ;;  %v5800_v28 = vld [vmem:[%s7596_s15 + $0x60] sm:$0xff] }
 0x3f4   : > { %v5955_v38 = vmin.f32 %v5923_v20, 20.0  ;;  %v5921_v51 = vmax.f32 %v5889_v36, 0.0  ;;  %v5894_v59 = vadd.f32 %v5862_v1, %v5798_v23  ;;  %v5860_v13 = vadd.f32 %v9775_v26, %v5828_v37  ;;  %v9911_v23 = vpop.f32.mrf.mxu0  ;;  %v5797_v36 = vld [vmem:[%s7596_s15 + $0x48] sm:$0xff] }
 0x3f5   : > { %5984 = vst.msk [vmem:[%s9839_s16 + $0x20] sm:$0xff] %vm313_vm1, %v5952_v49  ;;  %v5831_v0 = vmul.f32 %v9748_v33, %v5767_v62  ;;  %v5765_v2 = vadd.f32 %v5664_v3, %v5471_v57  ;;  %v7288_v32 = vpop.f32.mrf.mxu1  ;;  %v5477_v25 = vadd.f32 %v10331_v40, %v5183_v18  ;;  %v5186_v61 = vadd.f32 %v10332_v9, %v9739_v5  ;;  %v10333_v5 = vld [vmem:[#allocation38_spill] sm:$0xff]  ;;  %v5803_v40 = vld [vmem:[%s7596_s15 + $0x78] sm:$0xff] }
 0x3f6   : > { %5987 = vst.msk [vmem:[%s9839_s16 + $0x38] sm:$0xff] %vm313_vm1, %v5955_v38  ;;  %v5953_v48 = vmin.f32 %v5921_v51, 20.0  ;;  %v5926_v27 = vmax.f32 %v5894_v59, 0.0  ;;  %v5892_v58 = vadd.f32 %v5860_v13, %v5796_v53  ;;  %v5770_v7 = vadd.f32 %v7288_v32, %v5476_v45  ;;  %v5802_v49 = vld [vmem:[%s7596_s15 + $0x70] sm:$0xff] }
 0x3f7   : > { %v5863_v4 = vadd.f32 %v9775_v26, %v5831_v0  ;;  %v5829_v57 = vmul.f32 %v9748_v33, %v5765_v2  ;;  %v5677_v41 = vpop.f32.mrf.mxu1  ;;  %v5475_v16 = vadd.f32 %v9684_v22, %v5181_v43  ;;  %v5184_v45 = vadd.f32 %v10333_v5, %v9743_v10  ;;  %v10334_v22 = vld [vmem:[#allocation40_spill] sm:$0xff]  ;;  %v9930_v0 = vpop.f32.mrf.mxu0 }
 0x3f8   : > { %5985 = vst.msk [vmem:[%s9839_s16 + $0x28] sm:$0xff] %vm313_vm1, %v5953_v48  ;;  %v5958_v39 = vmin.f32 %v5926_v27, 20.0  ;;  %v5924_v20 = vmax.f32 %v5892_v58, 0.0  ;;  %v5834_v1 = vmul.f32 %v9748_v33, %v5770_v7  ;;  %v5768_v37 = vadd.f32 %v5677_v41, %v5474_v31 }
 0x3f9   : > { %v5895_v8 = vadd.f32 %v5863_v4, %v5799_v19  ;;  %v5861_v18 = vadd.f32 %v9775_v26, %v5829_v57  ;;  %v7289_v53 = vpop.f32.mrf.mxu1  ;;  %v5480_v59 = vadd.f32 %v9727_v21, %v5186_v61  ;;  %v5187_v10 = vadd.f32 %v10334_v22, %v9752_v42  ;;  %v10335_v42 = vld [vmem:[#allocation41_spill] sm:$0xff] }
 0x3fa   : > { %5990 = vst.msk [vmem:[%s9839_s16 + $0x50] sm:$0xff] %vm313_vm1, %v5958_v39  ;;  %v5956_v62 = vmin.f32 %v5924_v20, 20.0  ;;  %v5866_v3 = vadd.f32 %v9775_v26, %v5834_v1  ;;  %v5832_v38 = vmul.f32 %v9748_v33, %v5768_v37  ;;  %v5771_v51 = vadd.f32 %v7289_v53, %v5477_v25  ;;  %v10336_v39 = vld [vmem:[#allocation44_spill] sm:$0xff]  ;;  %v9948_v37 = vpop.f32.mrf.mxu0 }
 0x3fb   : > { %v5927_v13 = vmax.f32 %v5895_v8, 0.0  ;;  %v5893_v31 = vadd.f32 %v5861_v18, %v5797_v36  ;;  %v5680_v43 = vpop.f32.mrf.mxu1  ;;  %v5478_v27 = vadd.f32 %v9782_v29, %v5184_v45  ;;  %v5185_v58 = vadd.f32 %v10335_v42, %v9758_v14  ;;  %v5801_v29 = vld [vmem:[%s7596_s15 + $0x68] sm:$0xff]  ;;  %v10337_v18 = vld [vmem:[#allocation51_spill] sm:$0xff] }
 0x3fc   : > { %5988 = vst.msk [vmem:[%s9839_s16 + $0x40] sm:$0xff] %vm313_vm1, %v5956_v62  ;;  %v5898_v2 = vadd.f32 %v5866_v3, %v5802_v49  ;;  %v5864_v32 = vadd.f32 %v9775_v26, %v5832_v38  ;;  %v5835_v48 = vmul.f32 %v9748_v33, %v5771_v51  ;;  %v5769_v21 = vadd.f32 %v5680_v43, %v5475_v16  ;;  %v9965_v43 = vpop.f32.mrf.mxu0 }
 0x3fd   : > { %v5959_v19 = vmin.f32 %v5927_v13, 20.0  ;;  %v5925_v7 = vmax.f32 %v5893_v31, 0.0  ;;  %v7292_v25 = vpop.f32.mrf.mxu1  ;;  %v5481_v41 = vadd.f32 %v9813_v24, %v5187_v10  ;;  %v5190_v20 = vadd.f32 %v10336_v39, %v9762_v34  ;;  %v10338_v10 = vld [vmem:[#allocation54_spill] sm:$0xff] }
 0x3fe   : > { %v5930_v9 = vmax.f32 %v5898_v2, 0.0  ;;  %v5896_v61 = vadd.f32 %v5864_v32, %v5800_v28  ;;  %v5867_v4 = vadd.f32 %v9775_v26, %v5835_v48  ;;  %v5833_v57 = vmul.f32 %v9748_v33, %v5769_v21  ;;  %v5804_v48 = vld [vmem:[%s7596_s15 + $0x80] sm:$0xff] }
 0x3ff   : > { %5991 = vst.msk [vmem:[%s9839_s16 + $0x58] sm:$0xff] %vm313_vm1, %v5959_v19  ;;  %v5957_v14 = vmin.f32 %v5925_v7, 20.0  ;;  %v5774_v36 = vadd.f32 %v7292_v25, %v5480_v59  ;;  %v5693_v1 = vpop.f32.mrf.mxu1  ;;  %v5479_v24 = vadd.f32 %v9842_v60, %v5185_v58  ;;  %v5188_v34 = vadd.f32 %v10337_v18, %v9766_v44  ;;  %v5806_v59 = vld [vmem:[%s7596_s15 + $0x90] sm:$0xff]  ;;  %v5807_v7 = vld [vmem:[%s7596_s15 + $0x98] sm:$0xff] }
 0x400   : > { %v5962_v16 = vmin.f32 %v5930_v9, 20.0  ;;  %v5928_v5 = vmax.f32 %v5896_v61, 0.0  ;;  %v5899_v45 = vadd.f32 %v5867_v4, %v5803_v40  ;;  %v5865_v8 = vadd.f32 %v9775_v26, %v5833_v57  ;;  %v5810_v18 = vld [vmem:[%s7596_s15 + $0xb0] sm:$0xff] }
 0x401   : > { %5989 = vst.msk [vmem:[%s9839_s16 + $0x48] sm:$0xff] %vm313_vm1, %v5957_v14  ;;  %v5838_v49 = vmul.f32 %v9748_v33, %v5774_v36  ;;  %v5772_v53 = vadd.f32 %v5693_v1, %v5478_v27  ;;  %v7293_v62 = vpop.f32.mrf.mxu1  ;;  %v5484_v60 = vadd.f32 %v9857_v15, %v5190_v20  ;;  %v5191_v44 = vadd.f32 %v10338_v10, %v9770_v30  ;;  %v10339_v30 = vld [vmem:[#allocation52_spill] sm:$0xff]  ;;  %v5805_v20 = vld [vmem:[%s7596_s15 + $0x88] sm:$0xff] }
 0x402   : > { %5994 = vst.msk [vmem:[%s9839_s16 + $0x70] sm:$0xff] %vm313_vm1, %v5962_v16  ;;  %v5960_v3 = vmin.f32 %v5928_v5, 20.0  ;;  %v5931_v38 = vmax.f32 %v5899_v45, 0.0  ;;  %v5897_v51 = vadd.f32 %v5865_v8, %v5801_v29  ;;  %v5775_v22 = vadd.f32 %v7293_v62, %v5481_v41  ;;  %v5434_v29 = vpop.f32.mrf.mxu0  ;;  %v10341_v45 = vld [vmem:[#allocation55_spill] sm:$0xff] }
 0x403   : > { %v5870_v13 = vadd.f32 %v9775_v26, %v5838_v49  ;;  %v5836_v31 = vmul.f32 %v9748_v33, %v5772_v53  ;;  %v5696_v28 = vpop.f32.mrf.mxu1  ;;  %v5482_v27 = vadd.f32 %v9876_v55, %v5188_v34  ;;  %v5189_v42 = vadd.f32 %v10339_v30, %v9779_v6  ;;  %v10340_v55 = vld [vmem:[#allocation53_spill] sm:$0xff] }
 0x404   : > { %5992 = vst.msk [vmem:[%s9839_s16 + $0x60] sm:$0xff] %vm313_vm1, %v5960_v3  ;;  %v5963_v2 = vmin.f32 %v5931_v38, 20.0  ;;  %v5929_v32 = vmax.f32 %v5897_v51, 0.0  ;;  %v5839_v21 = vmul.f32 %v9748_v33, %v5775_v22  ;;  %v5773_v15 = vadd.f32 %v5696_v28, %v5479_v24  ;;  %v9992_v49 = vpop.f32.mrf.mxu0  ;;  %v5808_v22 = vld [vmem:[%s7596_s15 + $0xa0] sm:$0xff] }
 0x405   : > { %v5902_v58 = vadd.f32 %v5870_v13, %v5806_v59  ;;  %v5868_v19 = vadd.f32 %v9775_v26, %v5836_v31  ;;  %v7296_v40 = vpop.f32.mrf.mxu1  ;;  %v5485_v57 = vadd.f32 %v9894_v46, %v5191_v44  ;;  %v5194_v6 = vadd.f32 %v10340_v55, %v9787_v50  ;;  %v5809_v55 = vld [vmem:[%s7596_s15 + $0xa8] sm:$0xff] }
 0x406   : > { %5995 = vst.msk [vmem:[%s9839_s16 + $0x78] sm:$0xff] %vm313_vm1, %v5963_v2  ;;  %v5961_v25 = vmin.f32 %v5929_v32, 20.0  ;;  %v5871_v9 = vadd.f32 %v9775_v26, %v5839_v21  ;;  %v5837_v61 = vmul.f32 %v9748_v33, %v5773_v15  ;;  %v5778_v4 = vadd.f32 %v7296_v40, %v5484_v60  ;;  %v5447_v15 = vpop.f32.mrf.mxu0 }
 0x407   : > { %v5934_v41 = vmax.f32 %v5902_v58, 0.0  ;;  %v5900_v39 = vadd.f32 %v5868_v19, %v5804_v48  ;;  %v5709_v14 = vpop.f32.mrf.mxu1  ;;  %v5483_v46 = vadd.f32 %v9911_v23, %v5189_v42  ;;  %v5192_v50 = vadd.f32 %v10341_v45, %v9791_v12  ;;  %v10342_v23 = vld [vmem:[#allocation42_spill] sm:$0xff]  ;;  %v5811_v58 = vld [vmem:[%s7596_s15 + $0xb8] sm:$0xff] }
 0x408   : > { %5993 = vst.msk [vmem:[%s9839_s16 + $0x68] sm:$0xff] %vm313_vm1, %v5961_v25  ;;  %v5903_v36 = vadd.f32 %v5871_v9, %v5807_v7  ;;  %v5869_v1 = vadd.f32 %v9775_v26, %v5837_v61  ;;  %v5842_v16 = vmul.f32 %v9748_v33, %v5778_v4  ;;  %v5776_v5 = vadd.f32 %v5709_v14, %v5482_v27  ;;  %v10345_v7 = vld [vmem:[#allocation21_spill] sm:$0xff] }
 0x409   : > { %v5966_v8 = vmin.f32 %v5934_v41, 20.0  ;;  %v5932_v24 = vmax.f32 %v5900_v39, 0.0  ;;  %v7297_v34 = vpop.f32.mrf.mxu1  ;;  %v5488_v51 = vadd.f32 %v9930_v0, %v5194_v6  ;;  %v5195_v59 = vadd.f32 %v10342_v23, %v9795_v56  ;;  %v10343_v0 = vld [vmem:[#allocation43_spill] sm:$0xff] }
 0x40a   : > { %v5935_v53 = vmax.f32 %v5903_v36, 0.0  ;;  %v5901_v62 = vadd.f32 %v5869_v1, %v5805_v20  ;;  %v5874_v3 = vadd.f32 %v9775_v26, %v5842_v16  ;;  %v5840_v38 = vmul.f32 %v9748_v33, %v5776_v5  ;;  %v10346_v20 = vld [vmem:[#allocation56_spill] sm:$0xff]  ;;  %v5814_v1 = vld [vmem:[%s7596_s15 + $0xd0] sm:$0xff]  ;;  %v7271_v5 = vpop.f32.mrf.mxu0 }
 0x40b   : > { %5998 = vst.msk [vmem:[%s9839_s16 + $0x90] sm:$0xff] %vm313_vm1, %v5966_v8  ;;  %v5964_v12 = vmin.f32 %v5932_v24, 20.0  ;;  %v5779_v60 = vadd.f32 %v7297_v34, %v5485_v57  ;;  %v5712_v10 = vpop.f32.mrf.mxu1  ;;  %v5486_v2 = vadd.f32 %v9948_v37, %v5192_v50  ;;  %v5193_v32 = vadd.f32 %v10343_v0, %v9804_v35  ;;  %v10344_v37 = vld [vmem:[#allocation22_spill] sm:$0xff]  ;;  %v5812_v34 = vld [vmem:[%s7596_s15 + $0xc0] sm:$0xff] }
 0x40c   : > { %v5967_v44 = vmin.f32 %v5935_v53, 20.0  ;;  %v5933_v13 = vmax.f32 %v5901_v62, 0.0  ;;  %v5906_v31 = vadd.f32 %v5874_v3, %v5810_v18  ;;  %v5872_v28 = vadd.f32 %v9775_v26, %v5840_v38 }
 0x40d   : > { %5996 = vst.msk [vmem:[%s9839_s16 + $0x80] sm:$0xff] %vm313_vm1, %v5964_v12  ;;  %v5843_v56 = vmul.f32 %v9748_v33, %v5779_v60  ;;  %v5777_v48 = vadd.f32 %v5712_v10, %v5483_v46  ;;  %v7300_v21 = vpop.f32.mrf.mxu1  ;;  %v4902_v35 = vadd.f32 %v10345_v7, %v10344_v37  ;;  %v5489_v40 = vadd.f32 %v9965_v43, %v5195_v59  ;;  %v5450_v12 = vpop.f32.mrf.mxu0  ;;  %v5818_v37 = vld [vmem:[%s7596_s15 + $0xf0] sm:$0xff] }
 0x40e   : > { %5999 = vst.msk [vmem:[%s9839_s16 + $0x98] sm:$0xff] %vm313_vm1, %v5967_v44  ;;  %v5965_v27 = vmin.f32 %v5933_v13, 20.0  ;;  %v5938_v30 = vmax.f32 %v5906_v31, 0.0  ;;  %v5904_v42 = vadd.f32 %v5872_v28, %v5808_v22  ;;  %v5782_v19 = vadd.f32 %v7300_v21, %v5488_v51  ;;  %v5813_v28 = vld [vmem:[%s7596_s15 + $0xc8] sm:$0xff] }
 0x40f   : > { %v5875_v25 = vadd.f32 %v9775_v26, %v5843_v56  ;;  %v5841_v9 = vmul.f32 %v9748_v33, %v5777_v48  ;;  %v5725_v61 = vpop.f32.mrf.mxu1  ;;  %v5487_v39 = vadd.f32 %v5434_v29, %v5193_v32  ;;  %v5198_v14 = vadd.f32 %v10346_v20, %v9808_v63 }
 0x410   : > { %5997 = vst.msk [vmem:[%s9839_s16 + $0x88] sm:$0xff] %vm313_vm1, %v5965_v27  ;;  %v5970_v4 = vmin.f32 %v5938_v30, 20.0  ;;  %v5936_v57 = vmax.f32 %v5904_v42, 0.0  ;;  %v5846_v6 = vmul.f32 %v9748_v33, %v5782_v19  ;;  %v5780_v41 = vadd.f32 %v5725_v61, %v5486_v2 }
 0x411   : > { %v5907_v43 = vadd.f32 %v5875_v25, %v5811_v58  ;;  %v5873_v36 = vadd.f32 %v9775_v26, %v5841_v9  ;;  %v7301_v16 = vpop.f32.mrf.mxu1  ;;  %v5196_v29 = vadd.f32 %v9680_v54, %v9819_v52  ;;  %v5199_v63 = vadd.f32 %v9692_v17, %v9823_v11  ;;  %v5815_v11 = vld [vmem:[%s7596_s15 + $0xd8] sm:$0xff] }
 0x412   : > { %6002 = vst.msk [vmem:[%s9839_s16 + $0xb0] sm:$0xff] %vm313_vm1, %v5970_v4  ;;  %v5968_v46 = vmin.f32 %v5936_v57, 20.0  ;;  %v5878_v45 = vadd.f32 %v9775_v26, %v5846_v6  ;;  %v5844_v50 = vmul.f32 %v9748_v33, %v5780_v41  ;;  %v5783_v8 = vadd.f32 %v7301_v16, %v5489_v40  ;;  %v5816_v4 = vld [vmem:[%s7596_s15 + $0xe0] sm:$0xff]  ;;  %v5817_v16 = vld [vmem:[%s7596_s15 + $0xe8] sm:$0xff] }
 0x413   : > { %v5939_v24 = vmax.f32 %v5907_v43, 0.0  ;;  %v5905_v18 = vadd.f32 %v5873_v36, %v5809_v55  ;;  %v5728_v53 = vpop.f32.mrf.mxu1  ;;  %v5492_v23 = vadd.f32 %v9992_v49, %v5198_v14  ;;  %v5197_v54 = vadd.f32 %v9716_v47, %v4902_v35 }
 0x414   : > { %6000 = vst.msk [vmem:[%s9839_s16 + $0xa0] sm:$0xff] %vm313_vm1, %v5968_v46  ;;  %v5910_v62 = vadd.f32 %v5878_v45, %v5814_v1  ;;  %v5876_v3 = vadd.f32 %v9775_v26, %v5844_v50  ;;  %v5847_v38 = vmul.f32 %v9748_v33, %v5783_v8  ;;  %v5781_v51 = vadd.f32 %v5728_v53, %v5487_v39  ;;  %v5819_v39 = vld [vmem:[%s7596_s15 + $0xf8] sm:$0xff] }
 0x415   : > { %v5971_v52 = vmin.f32 %v5939_v24, 20.0  ;;  %v5937_v17 = vmax.f32 %v5905_v18, 0.0  ;;  %v7304_v59 = vpop.f32.mrf.mxu1  ;;  %v5490_v13 = vadd.f32 %v5447_v15, %v5196_v29  ;;  %v5493_v31 = vadd.f32 %v7271_v5, %v5199_v63 }
 0x416   : > { %v5942_v22 = vmax.f32 %v5910_v62, 0.0  ;;  %v5908_v60 = vadd.f32 %v5876_v3, %v5812_v34  ;;  %v5879_v10 = vadd.f32 %v9775_v26, %v5847_v38  ;;  %v5845_v44 = vmul.f32 %v9748_v33, %v5781_v51 }
 0x417   : > { %6003 = vst.msk [vmem:[%s9839_s16 + $0xb8] sm:$0xff] %vm313_vm1, %v5971_v52  ;;  %v5969_v49 = vmin.f32 %v5937_v17, 20.0  ;;  %v5786_v47 = vadd.f32 %v7304_v59, %v5492_v23  ;;  %v5741_v2 = vpop.f32.mrf.mxu1  ;;  %v5491_v21 = vadd.f32 %v5450_v12, %v5197_v54 }
 0x418   : > { %v5974_v0 = vmin.f32 %v5942_v22, 20.0  ;;  %v5940_v32 = vmax.f32 %v5908_v60, 0.0  ;;  %v5911_v56 = vadd.f32 %v5879_v10, %v5815_v11  ;;  %v5877_v48 = vadd.f32 %v9775_v26, %v5845_v44 }
 0x419   : > { %6001 = vst.msk [vmem:[%s9839_s16 + $0xa8] sm:$0xff] %vm313_vm1, %v5969_v49  ;;  %v5850_v15 = vmul.f32 %v9748_v33, %v5786_v47  ;;  %v5784_v27 = vadd.f32 %v5741_v2, %v5490_v13  ;;  %v7305_v30 = vpop.f32.mrf.mxu1 }
 0x41a   : > { %6006 = vst.msk [vmem:[%s9839_s16 + $0xd0] sm:$0xff] %vm313_vm1, %v5974_v0  ;;  %v5972_v42 = vmin.f32 %v5940_v32, 20.0  ;;  %v5943_v58 = vmax.f32 %v5911_v56, 0.0  ;;  %v5909_v19 = vadd.f32 %v5877_v48, %v5813_v28  ;;  %v5787_v7 = vadd.f32 %v7305_v30, %v5493_v31 }
 0x41b   : > { %v5882_v35 = vadd.f32 %v9775_v26, %v5850_v15  ;;  %v5848_v40 = vmul.f32 %v9748_v33, %v5784_v27  ;;  %v5744_v25 = vpop.f32.mrf.mxu1 }
 0x41c   : > { %6004 = vst.msk [vmem:[%s9839_s16 + $0xc0] sm:$0xff] %vm313_vm1, %v5972_v42  ;;  %v5975_v9 = vmin.f32 %v5943_v58, 20.0  ;;  %v5941_v61 = vmax.f32 %v5909_v19, 0.0  ;;  %v5851_v57 = vmul.f32 %v9748_v33, %v5787_v7  ;;  %v5785_v55 = vadd.f32 %v5744_v25, %v5491_v21 }
 0x41d   : > { %v5914_v6 = vadd.f32 %v5882_v35, %v5818_v37  ;;  %v5880_v41 = vadd.f32 %v9775_v26, %v5848_v40 }
 0x41e   : > { %6007 = vst.msk [vmem:[%s9839_s16 + $0xd8] sm:$0xff] %vm313_vm1, %v5975_v9  ;;  %v5973_v20 = vmin.f32 %v5941_v61, 20.0  ;;  %v5883_v14 = vadd.f32 %v9775_v26, %v5851_v57  ;;  %v5849_v43 = vmul.f32 %v9748_v33, %v5785_v55 }
 0x41f   : > { %v5946_v36 = vmax.f32 %v5914_v6, 0.0  ;;  %v5912_v1 = vadd.f32 %v5880_v41, %v5816_v4 }
 0x420   : > { %6005 = vst.msk [vmem:[%s9839_s16 + $0xc8] sm:$0xff] %vm313_vm1, %v5973_v20  ;;  %v5915_v5 = vadd.f32 %v5883_v14, %v5819_v39  ;;  %v5881_v46 = vadd.f32 %v9775_v26, %v5849_v43 }
 0x421   : > { %v5978_v45 = vmin.f32 %v5946_v36, 20.0  ;;  %v5944_v50 = vmax.f32 %v5912_v1, 0.0 }
 0x422   : > { %v5947_v8 = vmax.f32 %v5915_v5, 0.0  ;;  %v5913_v29 = vadd.f32 %v5881_v46, %v5817_v16 }
 0x423   : > { %6010 = vst.msk [vmem:[%s9839_s16 + $0xf0] sm:$0xff] %vm313_vm1, %v5978_v45  ;;  %v5976_v63 = vmin.f32 %v5944_v50, 20.0 }
 0x424   : > { %v5979_v24 = vmin.f32 %v5947_v8, 20.0  ;;  %v5945_v18 = vmax.f32 %v5913_v29, 0.0 }
 0x425   : > { %6008 = vst.msk [vmem:[%s9839_s16 + $0xe0] sm:$0xff] %vm313_vm1, %v5976_v63 }
 0x426   : > { %6011 = vst.msk [vmem:[%s9839_s16 + $0xf8] sm:$0xff] %vm313_vm1, %v5979_v24  ;;  %v5977_v33 = vmin.f32 %v5945_v18, 20.0 }
 0x428   : > { %6009 = vst.msk [vmem:[%s9839_s16 + $0xe8] sm:$0xff] %vm313_vm1, %v5977_v33 }
 0x429 PF: > { %s17_s24 = sadd.s32 1, %s7339_s24  }
 0x42a   : > { %p14_p4 = scmp.ge.s32.totalorder %s17_s24, 4  }
 0x42c   :  { %16 = sbr.rel (!%p14_p4) target bundleno = 1 (0x1), region = 100 }

</bundles_post_ra>
